<compile_context>
chip_gen: v7x
topology: tpu7x:2x2x1
jax: 0.10.0
libtpu: 0.0.40
codegen_flags: <defaults>
</compile_context>

<pallas_src>
import functools

import jax
import jax.numpy as jnp
import numpy as np
from jax.experimental import pallas as pl
from jax.experimental.pallas import tpu as pltpu


# ------------------------- config (small, lane-dense) -----------------------
DIM = 128             # args.dim          (multiple of 128 -> lane-dense)
MULTIPLE_OF = 128     # args.multiple_of  (keeps hidden dim a multiple of 128)
NUM_EXPERTS = 4       # args.num_local_experts
TOP_K = 2             # args.num_experts_per_tok
BATCH = 2
SEQ = 64              # T = BATCH*SEQ = 128
TOKEN_TILE = 64       # grid=(2,) -> both v7x TensorCores get a token tile


def _ffn_hidden_dim(dim, multiple_of, ffn_dim_multiplier=None):
    hidden = 4 * dim
    hidden = int(2 * hidden / 3)
    if ffn_dim_multiplier is not None:
        hidden = int(ffn_dim_multiplier * hidden)
    return multiple_of * ((hidden + multiple_of - 1) // multiple_of)


HID = _ffn_hidden_dim(DIM, MULTIPLE_OF)   # 384 == expert_dim == shared hidden


# ------------------------------- Pallas kernel ------------------------------
def moe_kernel(x_ref, scores_ref, gu_ref, down_ref, out_ref, *, hid, n_experts):
    """Grid = (token_tiles,); all (E+1) experts are processed in one step.

    x_ref:      (TM, D)        f32 token tile
    scores_ref: (TM, E+1)      f32 per-token scores; column E == 1.0 (shared FFN)
    gu_ref:     (E+1, D, 2H)   bf16 fused gate|up projections (resident, DMA'd once)
    down_ref:   (E+1, H, D)    bf16 down projections (resident, DMA'd once)
    out_ref:    (TM, D)        f32 output block
    """
    x = x_ref[...]                       # (TM, D) f32
    scores = scores_ref[...]             # (TM, E+1) f32
    acc = jnp.zeros(out_ref.shape, jnp.float32)

    # Static unroll over (E+1) experts; the shared FFN is expert index E with
    # score 1.0, so every iteration is identical-shaped MXU work.
    for e in range(n_experts):
        s = scores[:, e:e + 1]                                   # (TM, 1) static slice
        xs = (x * s).astype(jnp.bfloat16)                        # scale in f32, bf16 to MXU
        gu = jnp.dot(xs, gu_ref[e], preferred_element_type=jnp.float32)   # (TM, 2H)
        g = gu[:, :hid]                  # hid is a multiple of 128 -> free view
        u = gu[:, hid:]
        h = (u * (g * jax.nn.sigmoid(g))).astype(jnp.bfloat16)  # silu in f32 (EUP)
        acc = acc + jnp.dot(h, down_ref[e], preferred_element_type=jnp.float32)

    out_ref[...] = acc


def _moe_pallas_call(T, D, H, E1, tm):
    kernel = functools.partial(moe_kernel, hid=H, n_experts=E1)

    weight_bytes = E1 * (D * 2 * H + H * D) * 2                  # bf16 weights
    cost = pl.CostEstimate(
        flops=6 * T * D * H * E1,                                # 2*T*D*2H + 2*T*H*D per expert
        transcendentals=T * H * E1,                              # sigmoid in silu
        bytes_accessed=weight_bytes + T * D * 4 * 2 + T * E1 * 4,
    )

    grid_spec = pltpu.PrefetchScalarGridSpec(
        num_scalar_prefetch=0,
        grid=(T // tm,),
        in_specs=[
            pl.BlockSpec((tm, D), lambda t: (t, 0)),             # x tile
            pl.BlockSpec((tm, E1), lambda t: (t, 0)),            # scores tile
            pl.BlockSpec((E1, D, 2 * H), lambda t: (0, 0, 0)),   # all gate|up weights (resident)
            pl.BlockSpec((E1, H, D), lambda t: (0, 0, 0)),       # all down weights (resident)
        ],
        out_specs=pl.BlockSpec((tm, D), lambda t: (t, 0)),
    )
    return pl.pallas_call(
        kernel,
        out_shape=jax.ShapeDtypeStruct((T, D), jnp.float32),
        grid_spec=grid_spec,
        compiler_params=pltpu.CompilerParams(
            dimension_semantics=("parallel",),                   # token tiles across TCs (v7x)
            vmem_limit_bytes=32 * 1024 * 1024),                  # safe on v5e/v6e/v7x; ~3 MB used
        cost_estimate=cost,
    )


# --------------------------------- routing ----------------------------------
def _router_scores(x_flat, router_w):
    """Top-k masked sigmoid router scores, (T, E) f32. Shared by kernel path
    and reference so both select identical experts."""
    # TODO(synk): torch.topk-style routing kept in plain JAX (lax.top_k); no
    # clean in-kernel Pallas top-k primitive.
    logits = jnp.dot(x_flat.astype(jnp.float32),
                     router_w.astype(jnp.float32).T)             # (T, E)
    top_vals, top_idx = jax.lax.top_k(logits, TOP_K)
    masked = jnp.full_like(logits, -jnp.inf)
    masked = masked.at[jnp.arange(logits.shape[0])[:, None], top_idx].set(top_vals)
    return jax.nn.sigmoid(masked)                                # (T, E) f32


# ------------------------- one-time weight packing ---------------------------
def pack_moe_weights(params):
    """Fold the shared FFN in as expert E, fuse gate|up, cast to bf16.
    Called ONCE at init -- not in the per-call forward path."""
    shared_gu = jnp.concatenate([params["w1"].T, params["w3"].T], axis=-1)        # (D, 2H)
    gu_all = jnp.concatenate(
        [params["gate_up_proj"], shared_gu[None]], axis=0).astype(jnp.bfloat16)   # (E+1, D, 2H)
    down_all = jnp.concatenate(
        [params["down_proj"], params["w2"].T[None]], axis=0).astype(jnp.bfloat16) # (E+1, H, D)
    return gu_all, down_all


# --------------------------------- wrapper ----------------------------------
@jax.jit
def moe_forward(hidden_states, router_w, gu_packed, down_packed):
    B, S, D = hidden_states.shape
    T = B * S
    E1 = gu_packed.shape[0]
    H = down_packed.shape[1]
    tm = TOKEN_TILE if T % TOKEN_TILE == 0 else T  # TODO(synk): pad ragged T to a multiple of 8/128

    x_flat = hidden_states.reshape(T, D).astype(jnp.float32)

    # Router scores (T, E) f32; append the shared expert as column E, score 1.
    scores_te = _router_scores(x_flat, router_w)
    scores_full = jnp.concatenate(
        [scores_te, jnp.ones((T, 1), jnp.float32)], axis=1)      # (T, E+1)

    out_flat = _moe_pallas_call(T, D, H, E1, tm)(
        x_flat, scores_full, gu_packed, down_packed)

    router_scores = scores_te.T.astype(hidden_states.dtype)      # (E, T), as in torch
    return out_flat.astype(hidden_states.dtype).reshape(B, S, D), router_scores


# ----------------------------- pure-JAX reference ---------------------------
def moe_reference(hidden_states, params):
    """Mirrors the kernel numerics (fused bf16 gate_up matmul, f32 accumulation)."""
    B, S, D = hidden_states.shape
    T = B * S
    E = params["gate_up_proj"].shape[0]
    H = params["down_proj"].shape[1]
    xf = hidden_states.reshape(T, D).astype(jnp.float32)

    scores_te = _router_scores(xf, params["router_w"])           # (T, E) f32

    def swiglu(xs_f32, guw, dw):
        xs = xs_f32.astype(jnp.bfloat16)
        gu = jnp.dot(xs, guw.astype(jnp.bfloat16), preferred_element_type=jnp.float32)
        g, u = gu[:, :H], gu[:, H:]
        h = (u * (g * jax.nn.sigmoid(g))).astype(jnp.bfloat16)
        return jnp.dot(h, dw.astype(jnp.bfloat16), preferred_element_type=jnp.float32)

    acc = jnp.zeros((T, D), jnp.float32)
    for e in range(E):                                           # routed experts
        xs = xf * scores_te[:, e:e + 1]
        acc = acc + swiglu(xs, params["gate_up_proj"][e], params["down_proj"][e])
    shared_gu = jnp.concatenate([params["w1"].T, params["w3"].T], axis=-1)
    acc = acc + swiglu(xf, shared_gu, params["w2"].T)            # shared expert

    out = acc.astype(hidden_states.dtype).reshape(B, S, D)
    return out, scores_te.T.astype(hidden_states.dtype)


# ----------------------------------- main ------------------------------------
if __name__ == "__main__":
    key = jax.random.PRNGKey(0)
    kx, kr, kg, kd, k1, k2, k3 = jax.random.split(key, 7)

    x = jax.random.normal(kx, (BATCH, SEQ, DIM), dtype=jnp.float32)

    params = {
        "router_w": 0.1 * jax.random.normal(kr, (NUM_EXPERTS, DIM), jnp.float32),
        "gate_up_proj": 0.05 * jax.random.normal(kg, (NUM_EXPERTS, DIM, 2 * HID), jnp.float32),
        "down_proj": 0.05 * jax.random.normal(kd, (NUM_EXPERTS, HID, DIM), jnp.float32),
        "w1": 0.05 * jax.random.normal(k1, (HID, DIM), jnp.float32),
        "w2": 0.05 * jax.random.normal(k2, (DIM, HID), jnp.float32),
        "w3": 0.05 * jax.random.normal(k3, (HID, DIM), jnp.float32),
    }

    # One-time packing (init-time, outside the hot per-call path).
    gu_packed, down_packed = pack_moe_weights(params)
    gu_packed = jax.block_until_ready(gu_packed)
    down_packed = jax.block_until_ready(down_packed)

    out, scores = moe_forward(x, params["router_w"], gu_packed, down_packed)
    out = jax.block_until_ready(out)
    scores = jax.block_until_ready(scores)

    ref_out, ref_scores = moe_reference(x, params)
    np.testing.assert_allclose(np.asarray(out), np.asarray(ref_out), rtol=2e-2, atol=2e-2)
    np.testing.assert_allclose(np.asarray(scores), np.asarray(ref_scores), rtol=1e-5, atol=1e-5)
    assert out.shape == (BATCH, SEQ, DIM)
    assert scores.shape == (NUM_EXPERTS, BATCH * SEQ)

    print("KERNEL_OK")
</pallas_src>

<mosaic_0001>
module attributes {stable_mosaic.version = 11 : i64} {
  func.func @moe_kernel(%arg0: i32, %arg1: memref<64x128xf32, #tpu.memory_space<vmem>>, %arg2: memref<64x5xf32, #tpu.memory_space<vmem>>, %arg3: memref<5x128x768xbf16, #tpu.memory_space<vmem>>, %arg4: memref<5x384x128xbf16, #tpu.memory_space<vmem>>, %arg5: memref<64x128xf32, #tpu.memory_space<vmem>>) attributes {dimension_semantics = [#tpu.dimension_semantics<parallel>], iteration_bounds = array<i64: 2>, scalar_prefetch = 0 : i64, scratch_operands = 0 : i64, tpu.core_type = #tpu.core_type<tc>, window_params = [{transform_indices = @transform_0, window_bounds = array<i64: 64, 128>}, {transform_indices = @transform_1, window_bounds = array<i64: 64, 5>}, {pipeline_mode = #tpu.pipeline_mode<synchronous>, transform_indices = @transform_2, window_bounds = array<i64: 5, 128, 768>}, {pipeline_mode = #tpu.pipeline_mode<synchronous>, transform_indices = @transform_3, window_bounds = array<i64: 5, 384, 128>}, {transform_indices = @transform_4, window_bounds = array<i64: 64, 128>}]} {
    %c0 = arith.constant 0 : index
    %c0_0 = arith.constant 0 : index
    %0 = vector.load %arg1[%c0, %c0_0] : memref<64x128xf32, #tpu.memory_space<vmem>>, vector<64x128xf32>
    %c0_1 = arith.constant 0 : index
    %c0_2 = arith.constant 0 : index
    %1 = vector.load %arg2[%c0_1, %c0_2] : memref<64x5xf32, #tpu.memory_space<vmem>>, vector<64x5xf32>
    %cst = arith.constant 0.000000e+00 : f32
    %2 = vector.broadcast %cst : f32 to vector<64x128xf32>
    %3 = vector.extract_strided_slice %1 {offsets = [0, 0], sizes = [64, 1], strides = [1, 1]} : vector<64x5xf32> to vector<64x1xf32>
    %4 = vector.broadcast %3 : vector<64x1xf32> to vector<64x128xf32>
    %5 = arith.mulf %0, %4 : vector<64x128xf32>
    %6 = arith.truncf %5 : vector<64x128xf32> to vector<64x128xbf16>
    %c0_3 = arith.constant 0 : index
    %c0_4 = arith.constant 0 : index
    %c0_5 = arith.constant 0 : index
    %7 = vector.load %arg3[%c0_3, %c0_4, %c0_5] : memref<5x128x768xbf16, #tpu.memory_space<vmem>>, vector<1x128x768xbf16>
    %8 = vector.shape_cast %7 : vector<1x128x768xbf16> to vector<128x768xbf16>
    %cst_6 = arith.constant dense<0.000000e+00> : vector<64x768xf32>
    %9 = tpu.matmul %6, %8, %cst_6 {dimension_numbers = #tpu.dot_dimension_numbers<[1], [0], [0], [1], [0, 0, 1, 1], [], []>} : vector<64x128xbf16>, vector<128x768xbf16>, vector<64x768xf32> -> vector<64x768xf32>
    %10 = vector.extract_strided_slice %9 {offsets = [0, 0], sizes = [64, 384], strides = [1, 1]} : vector<64x768xf32> to vector<64x384xf32>
    %11 = vector.extract_strided_slice %9 {offsets = [0, 384], sizes = [64, 384], strides = [1, 1]} : vector<64x768xf32> to vector<64x384xf32>
    %12 = arith.negf %10 : vector<64x384xf32>
    %13 = math.exp %12 : vector<64x384xf32>
    %cst_7 = arith.constant 1.000000e+00 : f32
    %14 = vector.broadcast %cst_7 : f32 to vector<64x384xf32>
    %15 = arith.addf %14, %13 : vector<64x384xf32>
    %16 = arith.divf %14, %15 : vector<64x384xf32>
    %17 = arith.mulf %10, %16 : vector<64x384xf32>
    %18 = arith.mulf %11, %17 : vector<64x384xf32>
    %19 = arith.truncf %18 : vector<64x384xf32> to vector<64x384xbf16>
    %c0_8 = arith.constant 0 : index
    %c0_9 = arith.constant 0 : index
    %c0_10 = arith.constant 0 : index
    %20 = vector.load %arg4[%c0_8, %c0_9, %c0_10] : memref<5x384x128xbf16, #tpu.memory_space<vmem>>, vector<1x384x128xbf16>
    %21 = vector.shape_cast %20 : vector<1x384x128xbf16> to vector<384x128xbf16>
    %cst_11 = arith.constant dense<0.000000e+00> : vector<64x128xf32>
    %22 = tpu.matmul %19, %21, %cst_11 {dimension_numbers = #tpu.dot_dimension_numbers<[1], [0], [0], [1], [0, 0, 1, 1], [], []>} : vector<64x384xbf16>, vector<384x128xbf16>, vector<64x128xf32> -> vector<64x128xf32>
    %23 = arith.addf %2, %22 : vector<64x128xf32>
    %24 = vector.extract_strided_slice %1 {offsets = [0, 1], sizes = [64, 1], strides = [1, 1]} : vector<64x5xf32> to vector<64x1xf32>
    %25 = vector.broadcast %24 : vector<64x1xf32> to vector<64x128xf32>
    %26 = arith.mulf %0, %25 : vector<64x128xf32>
    %27 = arith.truncf %26 : vector<64x128xf32> to vector<64x128xbf16>
    %c1 = arith.constant 1 : index
    %c0_12 = arith.constant 0 : index
    %c0_13 = arith.constant 0 : index
    %28 = vector.load %arg3[%c1, %c0_12, %c0_13] : memref<5x128x768xbf16, #tpu.memory_space<vmem>>, vector<1x128x768xbf16>
    %29 = vector.shape_cast %28 : vector<1x128x768xbf16> to vector<128x768xbf16>
    %cst_14 = arith.constant dense<0.000000e+00> : vector<64x768xf32>
    %30 = tpu.matmul %27, %29, %cst_14 {dimension_numbers = #tpu.dot_dimension_numbers<[1], [0], [0], [1], [0, 0, 1, 1], [], []>} : vector<64x128xbf16>, vector<128x768xbf16>, vector<64x768xf32> -> vector<64x768xf32>
    %31 = vector.extract_strided_slice %30 {offsets = [0, 0], sizes = [64, 384], strides = [1, 1]} : vector<64x768xf32> to vector<64x384xf32>
    %32 = vector.extract_strided_slice %30 {offsets = [0, 384], sizes = [64, 384], strides = [1, 1]} : vector<64x768xf32> to vector<64x384xf32>
    %33 = arith.negf %31 : vector<64x384xf32>
    %34 = math.exp %33 : vector<64x384xf32>
    %cst_15 = arith.constant 1.000000e+00 : f32
    %35 = vector.broadcast %cst_15 : f32 to vector<64x384xf32>
    %36 = arith.addf %35, %34 : vector<64x384xf32>
    %37 = arith.divf %35, %36 : vector<64x384xf32>
    %38 = arith.mulf %31, %37 : vector<64x384xf32>
    %39 = arith.mulf %32, %38 : vector<64x384xf32>
    %40 = arith.truncf %39 : vector<64x384xf32> to vector<64x384xbf16>
    %c1_16 = arith.constant 1 : index
    %c0_17 = arith.constant 0 : index
    %c0_18 = arith.constant 0 : index
    %41 = vector.load %arg4[%c1_16, %c0_17, %c0_18] : memref<5x384x128xbf16, #tpu.memory_space<vmem>>, vector<1x384x128xbf16>
    %42 = vector.shape_cast %41 : vector<1x384x128xbf16> to vector<384x128xbf16>
    %cst_19 = arith.constant dense<0.000000e+00> : vector<64x128xf32>
    %43 = tpu.matmul %40, %42, %cst_19 {dimension_numbers = #tpu.dot_dimension_numbers<[1], [0], [0], [1], [0, 0, 1, 1], [], []>} : vector<64x384xbf16>, vector<384x128xbf16>, vector<64x128xf32> -> vector<64x128xf32>
    %44 = arith.addf %23, %43 : vector<64x128xf32>
    %45 = vector.extract_strided_slice %1 {offsets = [0, 2], sizes = [64, 1], strides = [1, 1]} : vector<64x5xf32> to vector<64x1xf32>
    %46 = vector.broadcast %45 : vector<64x1xf32> to vector<64x128xf32>
    %47 = arith.mulf %0, %46 : vector<64x128xf32>
    %48 = arith.truncf %47 : vector<64x128xf32> to vector<64x128xbf16>
    %c2 = arith.constant 2 : index
    %c0_20 = arith.constant 0 : index
    %c0_21 = arith.constant 0 : index
    %49 = vector.load %arg3[%c2, %c0_20, %c0_21] : memref<5x128x768xbf16, #tpu.memory_space<vmem>>, vector<1x128x768xbf16>
    %50 = vector.shape_cast %49 : vector<1x128x768xbf16> to vector<128x768xbf16>
    %cst_22 = arith.constant dense<0.000000e+00> : vector<64x768xf32>
    %51 = tpu.matmul %48, %50, %cst_22 {dimension_numbers = #tpu.dot_dimension_numbers<[1], [0], [0], [1], [0, 0, 1, 1], [], []>} : vector<64x128xbf16>, vector<128x768xbf16>, vector<64x768xf32> -> vector<64x768xf32>
    %52 = vector.extract_strided_slice %51 {offsets = [0, 0], sizes = [64, 384], strides = [1, 1]} : vector<64x768xf32> to vector<64x384xf32>
    %53 = vector.extract_strided_slice %51 {offsets = [0, 384], sizes = [64, 384], strides = [1, 1]} : vector<64x768xf32> to vector<64x384xf32>
    %54 = arith.negf %52 : vector<64x384xf32>
    %55 = math.exp %54 : vector<64x384xf32>
    %cst_23 = arith.constant 1.000000e+00 : f32
    %56 = vector.broadcast %cst_23 : f32 to vector<64x384xf32>
    %57 = arith.addf %56, %55 : vector<64x384xf32>
    %58 = arith.divf %56, %57 : vector<64x384xf32>
    %59 = arith.mulf %52, %58 : vector<64x384xf32>
    %60 = arith.mulf %53, %59 : vector<64x384xf32>
    %61 = arith.truncf %60 : vector<64x384xf32> to vector<64x384xbf16>
    %c2_24 = arith.constant 2 : index
    %c0_25 = arith.constant 0 : index
    %c0_26 = arith.constant 0 : index
    %62 = vector.load %arg4[%c2_24, %c0_25, %c0_26] : memref<5x384x128xbf16, #tpu.memory_space<vmem>>, vector<1x384x128xbf16>
    %63 = vector.shape_cast %62 : vector<1x384x128xbf16> to vector<384x128xbf16>
    %cst_27 = arith.constant dense<0.000000e+00> : vector<64x128xf32>
    %64 = tpu.matmul %61, %63, %cst_27 {dimension_numbers = #tpu.dot_dimension_numbers<[1], [0], [0], [1], [0, 0, 1, 1], [], []>} : vector<64x384xbf16>, vector<384x128xbf16>, vector<64x128xf32> -> vector<64x128xf32>
    %65 = arith.addf %44, %64 : vector<64x128xf32>
    %66 = vector.extract_strided_slice %1 {offsets = [0, 3], sizes = [64, 1], strides = [1, 1]} : vector<64x5xf32> to vector<64x1xf32>
    %67 = vector.broadcast %66 : vector<64x1xf32> to vector<64x128xf32>
    %68 = arith.mulf %0, %67 : vector<64x128xf32>
    %69 = arith.truncf %68 : vector<64x128xf32> to vector<64x128xbf16>
    %c3 = arith.constant 3 : index
    %c0_28 = arith.constant 0 : index
    %c0_29 = arith.constant 0 : index
    %70 = vector.load %arg3[%c3, %c0_28, %c0_29] : memref<5x128x768xbf16, #tpu.memory_space<vmem>>, vector<1x128x768xbf16>
    %71 = vector.shape_cast %70 : vector<1x128x768xbf16> to vector<128x768xbf16>
    %cst_30 = arith.constant dense<0.000000e+00> : vector<64x768xf32>
    %72 = tpu.matmul %69, %71, %cst_30 {dimension_numbers = #tpu.dot_dimension_numbers<[1], [0], [0], [1], [0, 0, 1, 1], [], []>} : vector<64x128xbf16>, vector<128x768xbf16>, vector<64x768xf32> -> vector<64x768xf32>
    %73 = vector.extract_strided_slice %72 {offsets = [0, 0], sizes = [64, 384], strides = [1, 1]} : vector<64x768xf32> to vector<64x384xf32>
    %74 = vector.extract_strided_slice %72 {offsets = [0, 384], sizes = [64, 384], strides = [1, 1]} : vector<64x768xf32> to vector<64x384xf32>
    %75 = arith.negf %73 : vector<64x384xf32>
    %76 = math.exp %75 : vector<64x384xf32>
    %cst_31 = arith.constant 1.000000e+00 : f32
    %77 = vector.broadcast %cst_31 : f32 to vector<64x384xf32>
    %78 = arith.addf %77, %76 : vector<64x384xf32>
    %79 = arith.divf %77, %78 : vector<64x384xf32>
    %80 = arith.mulf %73, %79 : vector<64x384xf32>
    %81 = arith.mulf %74, %80 : vector<64x384xf32>
    %82 = arith.truncf %81 : vector<64x384xf32> to vector<64x384xbf16>
    %c3_32 = arith.constant 3 : index
    %c0_33 = arith.constant 0 : index
    %c0_34 = arith.constant 0 : index
    %83 = vector.load %arg4[%c3_32, %c0_33, %c0_34] : memref<5x384x128xbf16, #tpu.memory_space<vmem>>, vector<1x384x128xbf16>
    %84 = vector.shape_cast %83 : vector<1x384x128xbf16> to vector<384x128xbf16>
    %cst_35 = arith.constant dense<0.000000e+00> : vector<64x128xf32>
    %85 = tpu.matmul %82, %84, %cst_35 {dimension_numbers = #tpu.dot_dimension_numbers<[1], [0], [0], [1], [0, 0, 1, 1], [], []>} : vector<64x384xbf16>, vector<384x128xbf16>, vector<64x128xf32> -> vector<64x128xf32>
    %86 = arith.addf %65, %85 : vector<64x128xf32>
    %87 = vector.extract_strided_slice %1 {offsets = [0, 4], sizes = [64, 1], strides = [1, 1]} : vector<64x5xf32> to vector<64x1xf32>
    %88 = vector.broadcast %87 : vector<64x1xf32> to vector<64x128xf32>
    %89 = arith.mulf %0, %88 : vector<64x128xf32>
    %90 = arith.truncf %89 : vector<64x128xf32> to vector<64x128xbf16>
    %c4 = arith.constant 4 : index
    %c0_36 = arith.constant 0 : index
    %c0_37 = arith.constant 0 : index
    %91 = vector.load %arg3[%c4, %c0_36, %c0_37] : memref<5x128x768xbf16, #tpu.memory_space<vmem>>, vector<1x128x768xbf16>
    %92 = vector.shape_cast %91 : vector<1x128x768xbf16> to vector<128x768xbf16>
    %cst_38 = arith.constant dense<0.000000e+00> : vector<64x768xf32>
    %93 = tpu.matmul %90, %92, %cst_38 {dimension_numbers = #tpu.dot_dimension_numbers<[1], [0], [0], [1], [0, 0, 1, 1], [], []>} : vector<64x128xbf16>, vector<128x768xbf16>, vector<64x768xf32> -> vector<64x768xf32>
    %94 = vector.extract_strided_slice %93 {offsets = [0, 0], sizes = [64, 384], strides = [1, 1]} : vector<64x768xf32> to vector<64x384xf32>
    %95 = vector.extract_strided_slice %93 {offsets = [0, 384], sizes = [64, 384], strides = [1, 1]} : vector<64x768xf32> to vector<64x384xf32>
    %96 = arith.negf %94 : vector<64x384xf32>
    %97 = math.exp %96 : vector<64x384xf32>
    %cst_39 = arith.constant 1.000000e+00 : f32
    %98 = vector.broadcast %cst_39 : f32 to vector<64x384xf32>
    %99 = arith.addf %98, %97 : vector<64x384xf32>
    %100 = arith.divf %98, %99 : vector<64x384xf32>
    %101 = arith.mulf %94, %100 : vector<64x384xf32>
    %102 = arith.mulf %95, %101 : vector<64x384xf32>
    %103 = arith.truncf %102 : vector<64x384xf32> to vector<64x384xbf16>
    %c4_40 = arith.constant 4 : index
    %c0_41 = arith.constant 0 : index
    %c0_42 = arith.constant 0 : index
    %104 = vector.load %arg4[%c4_40, %c0_41, %c0_42] : memref<5x384x128xbf16, #tpu.memory_space<vmem>>, vector<1x384x128xbf16>
    %105 = vector.shape_cast %104 : vector<1x384x128xbf16> to vector<384x128xbf16>
    %cst_43 = arith.constant dense<0.000000e+00> : vector<64x128xf32>
    %106 = tpu.matmul %103, %105, %cst_43 {dimension_numbers = #tpu.dot_dimension_numbers<[1], [0], [0], [1], [0, 0, 1, 1], [], []>} : vector<64x384xbf16>, vector<384x128xbf16>, vector<64x128xf32> -> vector<64x128xf32>
    %107 = arith.addf %86, %106 : vector<64x128xf32>
    %c0_44 = arith.constant 0 : index
    %c0_45 = arith.constant 0 : index
    %108 = vector.load %arg5[%c0_44, %c0_45] : memref<64x128xf32, #tpu.memory_space<vmem>>, vector<64x128xf32>
    tpu.vector_store %arg5[%c0_44, %c0_45], %107 {strides = array<i32>} : memref<64x128xf32, #tpu.memory_space<vmem>>, vector<64x128xf32>,
    return
  }
  func.func @transform_0(%arg0: i32) -> (i32, i32) {
    %c0_i32 = arith.constant 0 : i32
    %c0_i32_0 = arith.constant 0 : i32
    return %arg0, %c0_i32 : i32, i32
  }
  func.func @transform_1(%arg0: i32) -> (i32, i32) {
    %c0_i32 = arith.constant 0 : i32
    %c0_i32_0 = arith.constant 0 : i32
    return %arg0, %c0_i32 : i32, i32
  }
  func.func @transform_2(%arg0: i32) -> (i32, i32, i32) {
    %c0_i32 = arith.constant 0 : i32
    %c0_i32_0 = arith.constant 0 : i32
    %c0_i32_1 = arith.constant 0 : i32
    %c0_i32_2 = arith.constant 0 : i32
    return %c0_i32, %c0_i32_0, %c0_i32_1 : i32, i32, i32
  }
  func.func @transform_3(%arg0: i32) -> (i32, i32, i32) {
    %c0_i32 = arith.constant 0 : i32
    %c0_i32_0 = arith.constant 0 : i32
    %c0_i32_1 = arith.constant 0 : i32
    %c0_i32_2 = arith.constant 0 : i32
    return %c0_i32, %c0_i32_0, %c0_i32_1 : i32, i32, i32
  }
  func.func @transform_4(%arg0: i32) -> (i32, i32) {
    %c0_i32 = arith.constant 0 : i32
    %c0_i32_0 = arith.constant 0 : i32
    return %arg0, %c0_i32 : i32, i32
  }
}

</mosaic_0001>

<bundles_post_ra>
// kernel: moe_forward.1
= control target key start
LH: loop header
LB: loop body
LE: loop exit
PB: predicated region body
PF: predicated region fallthrough
CT: control target
= control target key end

     0   :  { %9 = vsyncpa [#allocation3], 0  ;;  %s10634_s0 = inlined_call_operand.vmem [shape: f32[128,128], index: 0, kind: input, shape index: {}]   ;;  %s10635_s1 = inlined_call_operand.vmem [shape: f32[128,5], index: 1, kind: input, shape index: {}]   ;;  %s10636_s2 = inlined_call_operand.vmem [shape: bf16[5,128,768], index: 2, kind: input, shape index: {}]   ;;  %s10637_s3 = inlined_call_operand.vmem [shape: bf16[5,384,128], index: 3, kind: input, shape index: {}]   ;;  %s10638_s4 = inlined_call_operand.hbm [shape: f32[128,128], index: 4, kind: output, shape index: {}]  }
   0x1   :  { %11 = vsyncpa [#allocation3 + $0x1], 0  ;;  %s8252_s15 = smov 0   ;;  %s8254_s16 = smov 0  }
   0x2   :  { %s8256_s17 = smov 0   ;;  %s8258_s18 = smov 0  }
   0x3 LB: > { %s8273_s19 = sadd.s32 4294967295, %s8217_s18   ;;  %s5759_s20 = sadd.s32 4294967294, %s8217_s18   ;;  %s8217_s18 = sphi %s8258_s18, %s10686_s18   ;;  %s8213_s17 = sphi %s8256_s17, %s10685_s17   ;;  %s8209_s16 = sphi %s8254_s16, %s10684_s16   ;;  %s8205_s15 = sphi %s8252_s15, %s10683_s15  }
   0x4   : > { %s8277_s21 = sadd.s32 1, %s8217_s18   ;;  %s118_s22 = sadd.s32 1, %s8213_s17 }
   0x5   : > { %s115_s23 = ssub.s32 %s8217_s18, %s8277_s21  ;;  %p128_p0 = scmp.ne.s32.totalorder %s8213_s17, %s8209_s16 }
   0x6   : > { %p116_p1 = scmp.eq.s32.totalorder %s115_s23, 0  ;;  %p129_p2 = scmp.eq.s32.totalorder %s8273_s19, 1 }
   0x7   : > { %p134_p3 = scmp.ne.s32.totalorder %s8209_s16, %s8205_s15  ;;  %p135_p4 = scmp.eq.s32.totalorder %s5759_s20, 1 }
   0x8   : > { %s8288_s24 = scalar_select %p116_p1, %s8213_s17, %s118_s22  }
   0x9   : > { %p8290_p5 = por %p129_p2, %p128_p0  ;;  %p8294_p6 = por %p135_p4, %p134_p3 }
   0xa   : > { %p5762_p7 = scmp.ge.s32.totalorder %s8217_s18, 1  ;;  %p177_p8 = scmp.lt.s32.totalorder %s8217_s18, 3 }
   0xc   : > { %p178_p9 = pnand %p5762_p7, %p177_p8 }
   0xe   : > { %181 = sbr.rel (%p178_p9) target bundleno = 1622 (0x656), region = 36 }
  0x15   : > { %s5764_s27 = sshll.u32 %s8273_s19, 3  ;;  %v10639_v0 = vmov 0   ;;  %v7162_v1 = vld [vmem:[%s10636_s2 + $0x4] ss:$24 sps:$4 sm:$0xff]   ;;  %v7164_v2 = vld [vmem:[%s10636_s2] ss:$24 sps:$4 sm:$0xff]  }
  0x16   : > { %7153 = vset.pattern.permute.xlu1 %v10639_v0  ;;  %7152 = vset.pattern.permute.xlu0 %v10639_v0  ;;  %p209_p10 = scmp.lt.s32.totalorder %s5764_s27, 15  ;;  %v7165_v3 = vld [vmem:[%s10636_s2 + $0xc] ss:$24 sps:$4 sm:$0xff]   ;;  %v7167_v4 = vld [vmem:[%s10636_s2 + $0x8] ss:$24 sps:$4 sm:$0xff]   ;;  %v8220_v35 = vmov 1  }
  0x17   : > { %610 = vmatprep.mubr.bf16.mxu0 %v10639_v0  ;;  %683 = vmatprep.mubr.bf16.mxu1 %v10639_v0  ;;  %v7168_v5 = vld [vmem:[%s10636_s2 + $0x34] ss:$24 sps:$4 sm:$0xff]   ;;  %v7170_v6 = vld [vmem:[%s10636_s2 + $0x30] ss:$24 sps:$4 sm:$0xff]   ;;  %v7174_v9 = vld [vmem:[%s10636_s2 + $0x64] ss:$24 sps:$4 sm:$0xff]  }
  0x18   : > { %s10688_s27 = smov (!%p209_p10, %s5764_s27), 15  ;;  %578 = vmatprep.subr.bf16.mxu0 %v7162_v1  ;;  %651 = vmatprep.subr.bf16.mxu1 %v7165_v3  ;;  %v7171_v7 = vld [vmem:[%s10636_s2 + $0x3c] ss:$24 sps:$4 sm:$0xff]   ;;  %v7173_v8 = vld [vmem:[%s10636_s2 + $0x38] ss:$24 sps:$4 sm:$0xff]   ;;  %v8221_v44 = vmov 2  }
  0x19   : > { %579 = vmatpush1.bf16.msra.mxu0 %v7164_v2  ;;  %s5765_s22 = sshll.u32 %s10688_s27, 3  ;;  %652 = vmatpush1.bf16.msra.mxu1 %v7167_v4  ;;  %v7176_v12 = vld [vmem:[%s10636_s2 + $0x60] ss:$24 sps:$4 sm:$0xff]   ;;  %v7177_v15 = vld [vmem:[%s10636_s2 + $0x6c] ss:$24 sps:$4 sm:$0xff]   ;;  %s205_s9 = sand.u32 1, %s8209_s16  }
  0x1a   : > { %580 = vmatprep.subr.bf16.mxu0 %v7168_v5  ;;  %s8337_s5 = scalar_lea.vmem %s10635_s1, %s5765_s22  ;;  %653 = vmatprep.subr.bf16.mxu1 %v7171_v7  ;;  %v7179_v16 = vld [vmem:[%s10636_s2 + $0x68] ss:$24 sps:$4 sm:$0xff]   ;;  %v7180_v19 = vld [vmem:[%s10636_s2 + $0x94] ss:$24 sps:$4 sm:$0xff]   ;;  %v7185_v22 = vld [vmem:[%s10636_s2 + $0x98] ss:$24 sps:$4 sm:$0xff]   ;;  %s8465_s29 = scalar_lea.vmem %s10634_s0, %s5765_s22 }
  0x1b   : > { %v8343_v10 = vld [vmem:[%s8337_s5 + $0x10] sm:$0xff]  ;;  %v8346_v11 = vld [vmem:[%s8337_s5] sm:$0xff]  ;;  %v8354_v13 = vld [vmem:[%s8337_s5 + $0x18] sm:$0xff]  ;;  %s6637_s11 = sshll.u32 %s8273_s19, 10  ;;  %s10593_s19 = scalar_lea.sflag [#allocation3], %s205_s9 }
  0x1c   : > { %250 = vperm.xlu1 %7153, %v8343_v10   ;;  %240 = vperm.xlu0 %7152, %v8346_v11   ;;  %v8357_v14 = vld [vmem:[%s8337_s5 + $0x8] sm:$0xff]  ;;  %v8369_v18 = vld [vmem:[%s8337_s5 + $0x20] sm:$0xff]  ;;  %v7183_v20 = vld [vmem:[%s10636_s2 + $0x9c] ss:$24 sps:$4 sm:$0xff]   ;;  %s10584_s14 = scalar_lea.hbm %s10638_s4, %s6637_s11  ;;  %s8224_s23 = smov [#allocation2]  }
  0x1d   : > { %581 = vmatpush1.bf16.msra.mxu0 %v7170_v6  ;;  %654 = vmatpush1.bf16.msra.mxu1 %v7173_v8  ;;  %v8366_v17 = vld [vmem:[%s8337_s5 + $0x28] sm:$0xff]  ;;  %v7186_v23 = vld [vmem:[%s10636_s2 + $0xc4] ss:$24 sps:$4 sm:$0xff]   ;;  %v236_v26 = vld [vmem:[%s8337_s5 + $0x30] sm:$0xff]  ;;  %s8159_s28 = sshll.u32 %s8224_s23, 4  ;;  %s8160_s28 = int_to_ptr.vmem [resolvable:$false] %s8159_s28 }
  0x1e   : > { %582 = vmatprep.subr.bf16.mxu0 %v7174_v9  ;;  %655 = vmatprep.subr.bf16.mxu1 %v7177_v15  ;;  %v7182_v21 = vld [vmem:[%s10636_s2 + $0x90] ss:$24 sps:$4 sm:$0xff]   ;;  %v8389_v24 = vld [vmem:[%s8337_s5 + $0x38] sm:$0xff]  ;;  %v7189_v25 = vld [vmem:[%s10636_s2 + $0xcc] ss:$24 sps:$4 sm:$0xff]   ;;  %s8161_s30 = scalar_lea.vmem %s8160_s28, 2048 }
  0x1f   : > { %v7188_v27 = vld [vmem:[%s10636_s2 + $0xc0] ss:$24 sps:$4 sm:$0xff]   ;;  %v7192_v29 = vld [vmem:[%s10636_s2 + $0xf4] ss:$24 sps:$4 sm:$0xff]   ;;  %v7194_v31 = vld [vmem:[%s10636_s2 + $0xf0] ss:$24 sps:$4 sm:$0xff]  }
  0x20   : > { %255 = vperm.xlu1 %7153, %v8354_v13   ;;  %245 = vperm.xlu0 %7152, %v8357_v14   ;;  %v7191_v28 = vld [vmem:[%s10636_s2 + $0xc8] ss:$24 sps:$4 sm:$0xff]   ;;  %v7195_v30 = vld [vmem:[%s10636_s2 + $0xfc] ss:$24 sps:$4 sm:$0xff]   ;;  %v7197_v32 = vld [vmem:[%s10636_s2 + $0xf8] ss:$24 sps:$4 sm:$0xff]  }
  0x21   : > { %583 = vmatpush1.bf16.msra.mxu0 %v7176_v12  ;;  %656 = vmatpush1.bf16.msra.mxu1 %v7179_v16  ;;  %v7198_v33 = vld [vmem:[%s10636_s2 + $0x124] ss:$24 sps:$4 sm:$0xff]   ;;  %v7200_v36 = vld [vmem:[%s10636_s2 + $0x120] ss:$24 sps:$4 sm:$0xff]   ;;  %v7204_v38 = vld [vmem:[%s10636_s2 + $0x154] ss:$24 sps:$4 sm:$0xff]  }
  0x22   : > { %584 = vmatprep.subr.bf16.mxu0 %v7180_v19  ;;  %657 = vmatprep.subr.bf16.mxu1 %v7183_v20  ;;  %v7201_v34 = vld [vmem:[%s10636_s2 + $0x12c] ss:$24 sps:$4 sm:$0xff]   ;;  %v7203_v37 = vld [vmem:[%s10636_s2 + $0x128] ss:$24 sps:$4 sm:$0xff]   ;;  %v7207_v39 = vld [vmem:[%s10636_s2 + $0x15c] ss:$24 sps:$4 sm:$0xff]  }
  0x23   : > { %v7206_v40 = vld [vmem:[%s10636_s2 + $0x150] ss:$24 sps:$4 sm:$0xff]   ;;  %v7212_v42 = vld [vmem:[%s10636_s2 + $0x14] ss:$24 sps:$4 sm:$0xff]   ;;  %v7215_v43 = vld [vmem:[%s10636_s2 + $0x184] ss:$24 sps:$4 sm:$0xff]  }
  0x24   : > { %265 = vperm.xlu1 %7153, %v8366_v17   ;;  %260 = vperm.xlu0 %7152, %v8369_v18   ;;  %v7209_v41 = vld [vmem:[%s10636_s2 + $0x158] ss:$24 sps:$4 sm:$0xff]   ;;  %v8468_v46 = vld [vmem:[%s8465_s29] sm:$0xff]  ;;  %v8471_v47 = vld [vmem:[%s8465_s29 + $0x8] sm:$0xff] }
  0x25   : > { %585 = vmatpush1.bf16.msra.mxu0 %v7182_v21  ;;  %658 = vmatpush1.bf16.msra.mxu1 %v7185_v22  ;;  %v7210_v50 = vld [vmem:[%s10636_s2 + $0x10] ss:$24 sps:$4 sm:$0xff]   ;;  %v7213_v51 = vld [vmem:[%s10636_s2 + $0x180] ss:$24 sps:$4 sm:$0xff]   ;;  %v7218_v54 = vld [vmem:[%s10636_s2 + $0x44] ss:$24 sps:$4 sm:$0xff]  }
  0x26   : > { %586 = vmatprep.subr.bf16.mxu0 %v7186_v23  ;;  %659 = vmatprep.subr.bf16.mxu1 %v7189_v25  ;;  %v7221_v55 = vld [vmem:[%s10636_s2 + $0x1b4] ss:$24 sps:$4 sm:$0xff]   ;;  %v8491_v57 = vld [vmem:[%s8465_s29 + $0x18] sm:$0xff]  ;;  %v7219_v60 = vld [vmem:[%s10636_s2 + $0x1b0] ss:$24 sps:$4 sm:$0xff]  }
  0x27   : > { %v8488_v56 = vld [vmem:[%s8465_s29 + $0x10] sm:$0xff]  ;;  %v7216_v59 = vld [vmem:[%s10636_s2 + $0x40] ss:$24 sps:$4 sm:$0xff]   ;;  %v7227_v62 = vld [vmem:[%s10636_s2 + $0x1e4] ss:$24 sps:$4 sm:$0xff]  }
  0x28   : > { %275 = vperm.xlu1 %7153, %v8389_v24   ;;  %270 = vperm.xlu0 %7152, %v236_v26   ;;  %v7224_v61 = vld [vmem:[%s10636_s2 + $0x74] ss:$24 sps:$4 sm:$0xff]   ;;  %v7222_v3 = vld [vmem:[%s10636_s2 + $0x70] ss:$24 sps:$4 sm:$0xff]   ;;  %v7225_v4 = vld [vmem:[%s10636_s2 + $0x1e0] ss:$24 sps:$4 sm:$0xff]  }
  0x29   : > { %587 = vmatpush1.bf16.msra.mxu0 %v7188_v27  ;;  %660 = vmatpush1.bf16.msra.mxu1 %v7191_v28  ;;  %v7230_v5 = vld [vmem:[%s10636_s2 + $0xa4] ss:$24 sps:$4 sm:$0xff]   ;;  %v7233_v6 = vld [vmem:[%s10636_s2 + $0x214] ss:$24 sps:$4 sm:$0xff]   ;;  %v7228_v12 = vld [vmem:[%s10636_s2 + $0xa0] ss:$24 sps:$4 sm:$0xff]  }
  0x2a   : > { %588 = vmatprep.subr.bf16.mxu0 %v7192_v29  ;;  %661 = vmatprep.subr.bf16.mxu1 %v7195_v30  ;;  %v8526_v7 = vld [vmem:[%s8465_s29 + $0x28] sm:$0xff]  ;;  %v8529_v8 = vld [vmem:[%s8465_s29 + $0x20] sm:$0xff]  ;;  %v8564_v22 = vld [vmem:[%s8465_s29 + $0x38] sm:$0xff] }
  0x2b   : > { %v7239_v15 = vld [vmem:[%s10636_s2 + $0x244] ss:$24 sps:$4 sm:$0xff]   ;;  %v7237_v19 = vld [vmem:[%s10636_s2 + $0x240] ss:$24 sps:$4 sm:$0xff]   ;;  %v7245_v21 = vld [vmem:[%s10636_s2 + $0x274] ss:$24 sps:$4 sm:$0xff]  }
  0x2c   : > { %7155 = vset.pattern.permute.xlu1 %v8220_v35  ;;  %7154 = vset.pattern.permute.xlu0 %v8220_v35  ;;  %v7242_v20 = vld [vmem:[%s10636_s2 + $0x104] ss:$24 sps:$4 sm:$0xff]   ;;  %v8567_v23 = vld [vmem:[%s8465_s29 + $0x30] sm:$0xff]  ;;  %v7240_v27 = vld [vmem:[%s10636_s2 + $0x100] ss:$24 sps:$4 sm:$0xff]  }
  0x2d   : > { %1054 = vperm.xlu1 %7155, %v8357_v14   ;;  %1050 = vperm.xlu0 %7154, %v8346_v11   ;;  %v7243_v28 = vld [vmem:[%s10636_s2 + $0x270] ss:$24 sps:$4 sm:$0xff]   ;;  %v7248_v29 = vld [vmem:[%s10636_s2 + $0x134] ss:$24 sps:$4 sm:$0xff]   ;;  %v7251_v30 = vld [vmem:[%s10636_s2 + $0x2a4] ss:$24 sps:$4 sm:$0xff]  }
  0x2e   : > { %589 = vmatpush1.bf16.msra.mxu0 %v7194_v31  ;;  %662 = vmatpush1.bf16.msra.mxu1 %v7197_v32  ;;  %v7254_v35 = vld [vmem:[%s10636_s2 + $0x164] ss:$24 sps:$4 sm:$0xff]  }
  0x2f   : > { %590 = vmatprep.subr.bf16.mxu0 %v7198_v33  ;;  %663 = vmatprep.subr.bf16.mxu1 %v7201_v34  ;;  %v7246_v33 = vld [vmem:[%s10636_s2 + $0x130] ss:$24 sps:$4 sm:$0xff]   ;;  %v7249_v34 = vld [vmem:[%s10636_s2 + $0x2a0] ss:$24 sps:$4 sm:$0xff]  }
  0x31   : > { %1058 = vperm.xlu1 %7155, %v8343_v10   ;;  %1062 = vperm.xlu0 %7154, %v8354_v13  }
  0x32   : > { %591 = vmatpush1.bf16.msra.mxu0 %v7200_v36  ;;  %664 = vmatpush1.bf16.msra.mxu1 %v7203_v37  ;;  %v7257_v36 = vld [vmem:[%s10636_s2 + $0x2d4] ss:$24 sps:$4 sm:$0xff]  }
  0x33   : > { %592 = vmatprep.subr.bf16.mxu0 %v7204_v38  ;;  %665 = vmatprep.subr.bf16.mxu1 %v7207_v39 }
  0x35   : > { %1066 = vperm.xlu1 %7155, %v8369_v18   ;;  %1070 = vperm.xlu0 %7154, %v8366_v17  }
  0x36   : > { %593 = vmatpush1.bf16.msra.mxu0 %v7206_v40  ;;  %666 = vmatpush1.bf16.msra.mxu1 %v7209_v41  ;;  %v7252_v40 = vld [vmem:[%s10636_s2 + $0x160] ss:$24 sps:$4 sm:$0xff]   ;;  %v7255_v41 = vld [vmem:[%s10636_s2 + $0x2d0] ss:$24 sps:$4 sm:$0xff]  }
  0x37   : > { %724 = vmatprep.subr.bf16.mxu0 %v7212_v42  ;;  %1382 = vmatprep.subr.bf16.mxu1 %v7215_v43 }
  0x39   : > { %1074 = vperm.xlu1 %7155, %v236_v26   ;;  %1078 = vperm.xlu0 %7154, %v8389_v24  }
  0x3d   : > { %7156 = vset.pattern.permute.xlu1 %v8221_v44  ;;  %7157 = vset.pattern.permute.xlu0 %v8221_v44  ;;  %v7260_v44 = vld [vmem:[%s10636_s2 + $0x18c] ss:$24 sps:$4 sm:$0xff]  }
  0x3e   : > { %2403 = vperm.xlu1 %7156, %v8346_v11   ;;  %2407 = vperm.xlu0 %7157, %v8357_v14   ;;  %v7236_v14 = vld [vmem:[%s10636_s2 + $0xd4] ss:$24 sps:$4 sm:$0xff]  }
  0x42   : > { %2411 = vperm.xlu1 %7156, %v8343_v10   ;;  %2419 = vperm.xlu0 %7157, %v8369_v18   ;;  %v7234_v18 = vld [vmem:[%s10636_s2 + $0xd0] ss:$24 sps:$4 sm:$0xff]  }
  0x46   : > { %2415 = vperm.xlu1 %7156, %v8354_v13   ;;  %2427 = vperm.xlu0 %7157, %v236_v26   ;;  %v7231_v13 = vld [vmem:[%s10636_s2 + $0x210] ss:$24 sps:$4 sm:$0xff]  }
  0x4a   : > { %2423 = vperm.xlu1 %7156, %v8366_v17  }
  0x4e   : > { %2431 = vperm.xlu1 %7156, %v8389_v24  }
  0x9b   : > { %v241_v45 = vpop.permute.xlu0 %240  ;;  %v251_v48 = vpop.permute.xlu1 %250 }
  0x9c   : > { %v278_v52 = vmul.f32 %v241_v45, %v8468_v46  ;;  %v280_v1 = vmul.f32 %v251_v48, %v8488_v56  ;;  %v7263_v45 = vld [vmem:[%s10636_s2 + $0x194] ss:$24 sps:$4 sm:$0xff]  }
  0x9f   : > { %v246_v49 = vpop.permute.xlu0 %245  ;;  %v256_v63 = vpop.permute.xlu1 %255 }
  0xa0   : > { %v279_v53 = vmul.f32 %v246_v49, %v8471_v47  ;;  %v281_v2 = vmul.f32 %v256_v63, %v8491_v57  ;;  %v7266_v49 = vld [vmem:[%s10636_s2 + $0x1bc] ss:$24 sps:$4 sm:$0xff]  }
  0xa2   : > { %v8493_v58 = vpack.c.bf16 %v279_v53, %v278_v52  ;;  %v8531_v9 = vpack.c.bf16 %v281_v2, %v280_v1  ;;  %v7267_v52 = vld [vmem:[%s10636_s2 + $0x1c0] ss:$24 sps:$4 sm:$0xff]   ;;  %v7272_v53 = vld [vmem:[%s10636_s2 + $0x1ec] ss:$24 sps:$4 sm:$0xff]  }
  0xa3   : > { %v266_v10 = vpop.permute.xlu1 %265  ;;  %v261_v11 = vpop.permute.xlu0 %260  ;;  %v7276_v1 = vld [vmem:[%s10636_s2 + $0x218] ss:$24 sps:$4 sm:$0xff]  }
  0xa4   : > { %611 = vmatmul.mubr.bf16.vlgmr.msra.gmra.mrb[0].mxu0 %v8493_v58  ;;  %684 = vmatmul.mubr.bf16.vlgmr.msra.gmra.mrb[0].mxu1 %v8493_v58  ;;  %v283_v16 = vmul.f32 %v266_v10, %v8526_v7  ;;  %v282_v17 = vmul.f32 %v261_v11, %v8529_v8  ;;  %v7279_v2 = vld [vmem:[%s10636_s2 + $0x220] ss:$24 sps:$4 sm:$0xff]  }
  0xa5   : > { %725 = vmatpush1.bf16.msra.mxu0 %v7210_v50  ;;  %1383 = vmatpush1.bf16.msra.mxu1 %v7213_v51  ;;  %v7269_v50 = vld [vmem:[%s10636_s2 + $0x1c4] ss:$24 sps:$4 sm:$0xff]   ;;  %v7264_v51 = vld [vmem:[%s10636_s2 + $0x1b8] ss:$24 sps:$4 sm:$0xff]  }
  0xa6   : > { %726 = vmatprep.subr.bf16.mxu0 %v7218_v54  ;;  %1384 = vmatprep.subr.bf16.mxu1 %v7221_v55  ;;  %v8569_v24 = vpack.c.bf16 %v283_v16, %v282_v17  ;;  %v7275_v54 = vld [vmem:[%s10636_s2 + $0x1f4] ss:$24 sps:$4 sm:$0xff]   ;;  %v7288_v16 = vld [vmem:[%s10636_s2 + $0x278] ss:$24 sps:$4 sm:$0xff]  }
  0xa7   : > { %620 = vmatprep.mubr.bf16.mxu0 %v10639_v0  ;;  %693 = vmatprep.mubr.bf16.mxu1 %v10639_v0  ;;  %v276_v25 = vpop.permute.xlu1 %275  ;;  %v271_v26 = vpop.permute.xlu0 %270  ;;  %v7291_v17 = vld [vmem:[%s10636_s2 + $0x280] ss:$24 sps:$4 sm:$0xff]  }
  0xa8   : > { %v285_v31 = vmul.f32 %v276_v25, %v8564_v22  ;;  %v284_v32 = vmul.f32 %v271_v26, %v8567_v23  ;;  %v7297_v25 = vld [vmem:[%s10636_s2 + $0x2b0] ss:$24 sps:$4 sm:$0xff]  }
  0xa9   : > { %727 = vmatpush1.bf16.msra.mxu0 %v7216_v59  ;;  %1385 = vmatpush1.bf16.msra.mxu1 %v7219_v60 }
  0xaa   : > { %728 = vmatprep.subr.bf16.mxu0 %v7224_v61  ;;  %1386 = vmatprep.subr.bf16.mxu1 %v7227_v62  ;;  %v8601_v37 = vpack.c.bf16 %v285_v31, %v284_v32  ;;  %v7273_v62 = vld [vmem:[%s10636_s2 + $0x1f0] ss:$24 sps:$4 sm:$0xff]  }
  0xab   : > { %v7308_v31 = vld [vmem:[%s10637_s3 + $0x108] sm:$0xff]  }
  0xac   : > { %621 = vmatmul.mubr.bf16.gmra.mrb[4].mxu0 %v8531_v9  ;;  %694 = vmatmul.mubr.bf16.gmra.mrb[4].mxu1 %v8531_v9  ;;  %v1055_v38 = vpop.permute.xlu1 %1054  ;;  %v1051_v39 = vpop.permute.xlu0 %1050  ;;  %v7309_v32 = vld [vmem:[%s10637_s3 + $0xc8] sm:$0xff]  }
  0xad   : > { %729 = vmatpush1.bf16.msra.mxu0 %v7222_v3  ;;  %1387 = vmatpush1.bf16.msra.mxu1 %v7225_v4  ;;  %v1082_v42 = vmul.f32 %v1055_v38, %v8471_v47  ;;  %v1081_v43 = vmul.f32 %v1051_v39, %v8468_v46  ;;  %v7258_v46 = vld [vmem:[%s10636_s2 + $0x188] ss:$24 sps:$4 sm:$0xff]   ;;  %v7284_v3 = vld [vmem:[%s10636_s2 + $0x24c] ss:$24 sps:$4 sm:$0xff]  }
  0xae   : > { %730 = vmatprep.subr.bf16.mxu0 %v7230_v5  ;;  %1388 = vmatprep.subr.bf16.mxu1 %v7233_v6  ;;  %v7261_v47 = vld [vmem:[%s10636_s2 + $0x190] ss:$24 sps:$4 sm:$0xff]   ;;  %v7287_v4 = vld [vmem:[%s10636_s2 + $0x254] ss:$24 sps:$4 sm:$0xff]   ;;  %v7315_v38 = vld [vmem:[%s10637_s3 + $0xe0] sm:$0xff]  }
  0xaf   : > { %630 = vmatprep.mubr.bf16.mxu0 %v10639_v0  ;;  %703 = vmatprep.mubr.bf16.mxu1 %v10639_v0  ;;  %v8627_v48 = vpack.c.bf16 %v1082_v42, %v1081_v43  ;;  %v7316_v39 = vld [vmem:[%s10637_s3 + $0x128] sm:$0xff]   ;;  %v7319_v42 = vld [vmem:[%s10637_s3 + $0xf0] sm:$0xff]   ;;  %v7320_v43 = vld [vmem:[%s10637_s3 + $0x138] sm:$0xff]  }
  0xb0   : > { %v1059_v55 = vpop.permute.xlu1 %1058  ;;  %v1063_v59 = vpop.permute.xlu0 %1062 }
  0xb1   : > { %731 = vmatpush1.bf16.msra.mxu0 %v7228_v12  ;;  %1389 = vmatpush1.bf16.msra.mxu1 %v7231_v13  ;;  %v1083_v60 = vmul.f32 %v1059_v55, %v8488_v56  ;;  %v1084_v61 = vmul.f32 %v1063_v59, %v8491_v57  ;;  %v7278_v56 = vld [vmem:[%s10636_s2 + $0x21c] ss:$24 sps:$4 sm:$0xff]   ;;  %v7285_v12 = vld [vmem:[%s10636_s2 + $0x250] ss:$24 sps:$4 sm:$0xff]  }
  0xb2   : > { %732 = vmatprep.subr.bf16.mxu0 %v7236_v14  ;;  %1390 = vmatprep.subr.bf16.mxu1 %v7239_v15  ;;  %v7281_v57 = vld [vmem:[%s10636_s2 + $0x224] ss:$24 sps:$4 sm:$0xff]  }
  0xb3   : > { %v8665_v63 = vpack.c.bf16 %v1084_v61, %v1083_v60 }
  0xb4   : > { %631 = vmatmul.mubr.bf16.gmra.mrb[8].mxu0 %v8569_v24  ;;  %704 = vmatmul.mubr.bf16.gmra.mrb[8].mxu1 %v8569_v24  ;;  %v1067_v5 = vpop.permute.xlu1 %1066  ;;  %v1071_v6 = vpop.permute.xlu0 %1070 }
  0xb5   : > { %733 = vmatpush1.bf16.msra.mxu0 %v7234_v18  ;;  %1391 = vmatpush1.bf16.msra.mxu1 %v7237_v19  ;;  %v1085_v10 = vmul.f32 %v1067_v5, %v8529_v8  ;;  %v1086_v11 = vmul.f32 %v1071_v6, %v8526_v7  ;;  %v7290_v8 = vld [vmem:[%s10636_s2 + $0x27c] ss:$24 sps:$4 sm:$0xff]   ;;  %v7296_v18 = vld [vmem:[%s10636_s2 + $0x2ac] ss:$24 sps:$4 sm:$0xff]  }
  0xb6   : > { %734 = vmatprep.subr.bf16.mxu0 %v7242_v20  ;;  %1392 = vmatprep.subr.bf16.mxu1 %v7245_v21  ;;  %v7293_v7 = vld [vmem:[%s10636_s2 + $0x284] ss:$24 sps:$4 sm:$0xff]   ;;  %v7299_v19 = vld [vmem:[%s10636_s2 + $0x2b4] ss:$24 sps:$4 sm:$0xff]  }
  0xb7   : > { %640 = vmatprep.mubr.bf16.mxu0 %v10639_v0  ;;  %713 = vmatprep.mubr.bf16.mxu1 %v10639_v0  ;;  %v1091_v13 = vpack.c.bf16 %v1086_v11, %v1085_v10 }
  0xb8   : > { %v1075_v14 = vpop.permute.xlu1 %1074  ;;  %v1079_v15 = vpop.permute.xlu0 %1078 }
  0xb9   : > { %735 = vmatpush1.bf16.msra.mxu0 %v7240_v27  ;;  %1393 = vmatpush1.bf16.msra.mxu1 %v7243_v28  ;;  %v1087_v20 = vmul.f32 %v1075_v14, %v8567_v23  ;;  %v1088_v21 = vmul.f32 %v1079_v15, %v8564_v22  ;;  %v7302_v22 = vld [vmem:[%s10636_s2 + $0x2dc] ss:$24 sps:$4 sm:$0xff]   ;;  %v7300_v27 = vld [vmem:[%s10636_s2 + $0x2d8] ss:$24 sps:$4 sm:$0xff]  }
  0xba   : > { %736 = vmatprep.subr.bf16.mxu0 %v7248_v29  ;;  %1394 = vmatprep.subr.bf16.mxu1 %v7251_v30  ;;  %v7305_v23 = vld [vmem:[%s10636_s2 + $0x2e4] ss:$24 sps:$4 sm:$0xff]   ;;  %v7303_v28 = vld [vmem:[%s10636_s2 + $0x2e0] ss:$24 sps:$4 sm:$0xff]  }
  0xbb   : > { %v1092_v26 = vpack.c.bf16 %v1088_v21, %v1087_v20  ;;  %v7306_v29 = vld [vmem:[%s10637_s3 + $0x100] sm:$0xff]  }
  0xbc   : > { %641 = vmatmul.mubr.bf16.gmra.mrb[12].mxu0 %v8601_v37  ;;  %714 = vmatmul.mubr.bf16.gmra.mrb[12].mxu1 %v8601_v37  ;;  %v7307_v30 = vld [vmem:[%s10637_s3 + $0xc0] sm:$0xff]  }
  0xbd   : > { %737 = vmatpush1.bf16.msra.mxu0 %v7246_v33  ;;  %1395 = vmatpush1.bf16.msra.mxu1 %v7249_v34  ;;  %v7310_v33 = vld [vmem:[%s10637_s3 + $0x110] sm:$0xff]  }
  0xbe   : > { %738 = vmatprep.subr.bf16.mxu0 %v7254_v35  ;;  %1396 = vmatprep.subr.bf16.mxu1 %v7257_v36  ;;  %v7311_v34 = vld [vmem:[%s10637_s3 + $0xd0] sm:$0xff]   ;;  %v7312_v35 = vld [vmem:[%s10637_s3 + $0x118] sm:$0xff]  }
  0xbf   : > { %756 = vmatprep.mubr.bf16.mxu0 %v10639_v0  ;;  %1414 = vmatprep.mubr.bf16.mxu1 %v10639_v0  ;;  %v7313_v36 = vld [vmem:[%s10637_s3 + $0xd8] sm:$0xff]  }
  0xc1   : > { %739 = vmatpush1.bf16.msra.mxu0 %v7252_v40  ;;  %1397 = vmatpush1.bf16.msra.mxu1 %v7255_v41  ;;  %v7317_v40 = vld [vmem:[%s10637_s3 + $0xe8] sm:$0xff]   ;;  %v7318_v41 = vld [vmem:[%s10637_s3 + $0x130] sm:$0xff]  }
  0xc2   : > { %1455 = vmatprep.subr.bf16.mxu0 %v7260_v44  ;;  %1528 = vmatprep.subr.bf16.mxu1 %v7263_v45  ;;  %v7321_v44 = vld [vmem:[%s10637_s3 + $0xf8] sm:$0xff]   ;;  %v7322_v45 = vld [vmem:[%s10637_s3 + $0x40] sm:$0xff]  }
  0xc4   : > { %757 = vmatmul.mubr.bf16.vlgmr.msra.gmra.mrb[16].mxu0 %v8493_v58  ;;  %1415 = vmatmul.mubr.bf16.vlgmr.msra.gmra.mrb[16].mxu1 %v8627_v48  ;;  %v7270_v58 = vld [vmem:[%s10636_s2 + $0x1e8] ss:$24 sps:$4 sm:$0xff]  }
  0xc5   : > { %1456 = vmatpush1.bf16.msra.mxu0 %v7258_v46  ;;  %1529 = vmatpush1.bf16.msra.mxu1 %v7261_v47  ;;  %v7324_v46 = vld [vmem:[%s10637_s3 + $0x140] sm:$0xff]   ;;  %v7327_v47 = vld [vmem:[%s10637_s3 + $0x148] sm:$0xff]  }
  0xc6   : > { %1457 = vmatprep.subr.bf16.mxu0 %v7266_v49  ;;  %1530 = vmatprep.subr.bf16.mxu1 %v7269_v50  ;;  %v7333_v49 = vld [vmem:[%s10637_s3 + $0x158] sm:$0xff]   ;;  %v7336_v50 = vld [vmem:[%s10637_s3 + $0x160] sm:$0xff]  }
  0xc7   : > { %766 = vmatprep.mubr.bf16.mxu0 %v10639_v0  ;;  %1424 = vmatprep.mubr.bf16.mxu1 %v10639_v0 }
  0xc9   : > { %1458 = vmatpush1.bf16.msra.mxu0 %v7264_v51  ;;  %1531 = vmatpush1.bf16.msra.mxu1 %v7267_v52  ;;  %v7339_v51 = vld [vmem:[%s10637_s3 + $0x168] sm:$0xff]   ;;  %v7342_v52 = vld [vmem:[%s10637_s3 + $0x170] sm:$0xff]  }
  0xca   : > { %1459 = vmatprep.subr.bf16.mxu0 %v7272_v53  ;;  %1532 = vmatprep.subr.bf16.mxu1 %v7275_v54  ;;  %v7345_v53 = vld [vmem:[%s10637_s3 + $0x178] sm:$0xff]   ;;  %v7349_v54 = vld [vmem:[%s10637_s3 + $0x80] sm:$0xff]  }
  0xcc   : > { %767 = vmatmul.mubr.bf16.gmra.mrb[20].mxu0 %v8531_v9  ;;  %1425 = vmatmul.mubr.bf16.gmra.mrb[20].mxu1 %v8665_v63  ;;  %v7282_v9 = vld [vmem:[%s10636_s2 + $0x248] ss:$24 sps:$4 sm:$0xff]  }
  0xcd   : > { %1460 = vmatpush1.bf16.msra.mxu0 %v7270_v58  ;;  %1533 = vmatpush1.bf16.msra.mxu1 %v7273_v62 }
  0xce   : > { %1461 = vmatprep.subr.bf16.mxu0 %v7278_v56  ;;  %1534 = vmatprep.subr.bf16.mxu1 %v7281_v57 }
  0xcf   : > { %776 = vmatprep.mubr.bf16.mxu0 %v10639_v0  ;;  %1434 = vmatprep.mubr.bf16.mxu1 %v10639_v0 }
  0xd1   : > { %1462 = vmatpush1.bf16.msra.mxu0 %v7276_v1  ;;  %1535 = vmatpush1.bf16.msra.mxu1 %v7279_v2 }
  0xd2   : > { %1463 = vmatprep.subr.bf16.mxu0 %v7284_v3  ;;  %1536 = vmatprep.subr.bf16.mxu1 %v7287_v4 }
  0xd4   : > { %777 = vmatmul.mubr.bf16.gmra.mrb[24].mxu0 %v8569_v24  ;;  %1435 = vmatmul.mubr.bf16.gmra.mrb[24].mxu1 %v1091_v13  ;;  %v7294_v24 = vld [vmem:[%s10636_s2 + $0x2a8] ss:$24 sps:$4 sm:$0xff]  }
  0xd5   : > { %1464 = vmatpush1.bf16.msra.mxu0 %v7282_v9  ;;  %1537 = vmatpush1.bf16.msra.mxu1 %v7285_v12 }
  0xd6   : > { %1465 = vmatprep.subr.bf16.mxu0 %v7290_v8  ;;  %1538 = vmatprep.subr.bf16.mxu1 %v7293_v7 }
  0xd7   : > { %786 = vmatprep.mubr.bf16.mxu0 %v10639_v0  ;;  %1444 = vmatprep.mubr.bf16.mxu1 %v10639_v0 }
  0xd9   : > { %1466 = vmatpush1.bf16.msra.mxu0 %v7288_v16  ;;  %1539 = vmatpush1.bf16.msra.mxu1 %v7291_v17 }
  0xda   : > { %1467 = vmatprep.subr.bf16.mxu0 %v7296_v18  ;;  %1540 = vmatprep.subr.bf16.mxu1 %v7299_v19 }
  0xdc   : > { %787 = vmatmul.mubr.bf16.gmra.mrb[28].mxu0 %v8601_v37  ;;  %1445 = vmatmul.mubr.bf16.gmra.mrb[28].mxu1 %v1092_v26  ;;  %v7314_v37 = vld [vmem:[%s10637_s3 + $0x120] sm:$0xff]  }
  0xdd   : > { %1468 = vmatpush1.bf16.msra.mxu0 %v7294_v24  ;;  %1541 = vmatpush1.bf16.msra.mxu1 %v7297_v25 }
  0xde   : > { %1469 = vmatprep.subr.bf16.mxu0 %v7302_v22  ;;  %1542 = vmatprep.subr.bf16.mxu1 %v7305_v23 }
  0xdf   : > { %1487 = vmatprep.mubr.bf16.mxu0 %v10639_v0  ;;  %1560 = vmatprep.mubr.bf16.mxu1 %v10639_v0 }
  0xe1   : > { %1470 = vmatpush1.bf16.msra.mxu0 %v7300_v27  ;;  %1543 = vmatpush1.bf16.msra.mxu1 %v7303_v28 }
  0xe2   : > { %6638 = vmatprep.subr.bf16.mxu0 %v7306_v29  ;;  %6898 = vmatprep.subr.bf16.mxu1 %v7324_v46 }
  0xe4   : > { %1488 = vmatmul.mubr.bf16.vlgmr.msra.gmra.mrb[32].mxu0 %v8627_v48  ;;  %1561 = vmatmul.mubr.bf16.vlgmr.msra.gmra.mrb[32].mxu1 %v8627_v48  ;;  %v7330_v48 = vld [vmem:[%s10637_s3 + $0x150] sm:$0xff]  }
  0xe5   : > { %1497 = vmatprep.mubr.bf16.mxu0 %v10639_v0  ;;  %1570 = vmatprep.mubr.bf16.mxu1 %v10639_v0 }
  0xe6   : > { %6639 = vmatpush3.bf16.msra.mxu0 %v7307_v30  ;;  %6899 = vmatpush3.bf16.msra.mxu1 %v7324_v46 }
  0xe7   : > { %6640 = vmatprep.subr.bf16.mxu0 %v7308_v31  ;;  %6900 = vmatprep.subr.bf16.mxu1 %v7327_v47 }
  0xea   : > { %6641 = vmatpush3.bf16.msra.mxu0 %v7309_v32  ;;  %6901 = vmatpush3.bf16.msra.mxu1 %v7327_v47 }
  0xeb   : > { %6642 = vmatprep.subr.bf16.mxu0 %v7310_v33  ;;  %6902 = vmatprep.subr.bf16.mxu1 %v7330_v48 }
  0xec   : > { %1498 = vmatmul.mubr.bf16.gmra.mrb[36].mxu0 %v8665_v63  ;;  %1571 = vmatmul.mubr.bf16.gmra.mrb[36].mxu1 %v8665_v63 }
  0xed   : > { %1507 = vmatprep.mubr.bf16.mxu0 %v10639_v0  ;;  %1580 = vmatprep.mubr.bf16.mxu1 %v10639_v0 }
  0xee   : > { %6643 = vmatpush3.bf16.msra.mxu0 %v7311_v34  ;;  %6903 = vmatpush3.bf16.msra.mxu1 %v7330_v48 }
  0xef   : > { %6644 = vmatprep.subr.bf16.mxu0 %v7312_v35  ;;  %6904 = vmatprep.subr.bf16.mxu1 %v7333_v49 }
  0xf2   : > { %6645 = vmatpush3.bf16.msra.mxu0 %v7313_v36  ;;  %6905 = vmatpush3.bf16.msra.mxu1 %v7333_v49 }
  0xf3   : > { %6646 = vmatprep.subr.bf16.mxu0 %v7314_v37  ;;  %6906 = vmatprep.subr.bf16.mxu1 %v7336_v50 }
  0xf4   : > { %1508 = vmatmul.mubr.bf16.gmra.mrb[40].mxu0 %v1091_v13  ;;  %1581 = vmatmul.mubr.bf16.gmra.mrb[40].mxu1 %v1091_v13 }
  0xf5   : > { %1517 = vmatprep.mubr.bf16.mxu0 %v10639_v0  ;;  %1590 = vmatprep.mubr.bf16.mxu1 %v10639_v0 }
  0xf6   : > { %6647 = vmatpush3.bf16.msra.mxu0 %v7315_v38  ;;  %6907 = vmatpush3.bf16.msra.mxu1 %v7336_v50 }
  0xf7   : > { %6648 = vmatprep.subr.bf16.mxu0 %v7316_v39  ;;  %6908 = vmatprep.subr.bf16.mxu1 %v7339_v51 }
  0xfa   : > { %6649 = vmatpush3.bf16.msra.mxu0 %v7317_v40  ;;  %6909 = vmatpush3.bf16.msra.mxu1 %v7339_v51 }
  0xfb   : > { %6650 = vmatprep.subr.bf16.mxu0 %v7318_v41  ;;  %6910 = vmatprep.subr.bf16.mxu1 %v7342_v52 }
  0xfc   : > { %1518 = vmatmul.mubr.bf16.gmra.mrb[44].mxu0 %v1092_v26  ;;  %1591 = vmatmul.mubr.bf16.gmra.mrb[44].mxu1 %v1092_v26 }
  0xfe   : > { %6651 = vmatpush3.bf16.msra.mxu0 %v7319_v42  ;;  %6911 = vmatpush3.bf16.msra.mxu1 %v7342_v52 }
  0xff   : > { %6652 = vmatprep.subr.bf16.mxu0 %v7320_v43  ;;  %6912 = vmatprep.subr.bf16.mxu1 %v7345_v53 }
 0x102   : > { %6653 = vmatpush3.bf16.msra.mxu0 %v7321_v44  ;;  %6913 = vmatpush3.bf16.msra.mxu1 %v7345_v53 }
 0x103   : > { %6690 = vmatprep.subr.bf16.mxu0 %v7322_v45  ;;  %6922 = vmatprep.subr.bf16.mxu1 %v7349_v54 }
 0x177   : > { %v8823_v55 = vpop.f32.mrb[0].mxu0  ;;  %v8825_v59 = vpop.f32.mrb[0].mxu1 }
 0x178   : > { %v5816_v60 = vmul.f32 -1.442695, %v8823_v55  ;;  %v5818_v61 = vmul.f32 -1.442695, %v8825_v59  ;;  %v8829_v58 = vpop.f32.mrb[1].mxu0  ;;  %v8831_v62 = vpop.f32.mrb[1].mxu1 }
 0x179   : > { %v5817_v56 = vmul.f32 -1.442695, %v8829_v58  ;;  %v8834_v57 = vpop.f32.mrb[2].mxu0  ;;  %v8836_v63 = vpop.f32.mrb[2].mxu1 }
 0x17a   : > { %7642 = vpow2.f32 %v5816_v60  ;;  %v5819_v1 = vmul.f32 -1.442695, %v8834_v57  ;;  %v5821_v2 = vmul.f32 -1.442695, %v8836_v63  ;;  %v8840_v3 = vpop.f32.mrb[3].mxu0  ;;  %v8842_v4 = vpop.f32.mrb[3].mxu1 }
 0x17b   : > { %7644 = vpow2.f32 %v5818_v61  ;;  %v5820_v5 = vmul.f32 -1.442695, %v8840_v3 }
 0x17c   : > { %7646 = vpow2.f32 %v5817_v56 }
 0x17d   : > { %7648 = vpow2.f32 %v5819_v1 }
 0x17e   : > { %7650 = vpow2.f32 %v5821_v2 }
 0x17f   : > { %7652 = vpow2.f32 %v5820_v5  ;;  %v8845_v6 = vpop.f32.mrb[4].mxu0  ;;  %v8847_v10 = vpop.f32.mrb[4].mxu1 }
 0x180   : > { %v5822_v11 = vmul.f32 -1.442695, %v8845_v6  ;;  %v5824_v9 = vmul.f32 -1.442695, %v8847_v10  ;;  %v8851_v12 = vpop.f32.mrb[5].mxu0  ;;  %v8853_v8 = vpop.f32.mrb[5].mxu1 }
 0x181   : > { %v5823_v7 = vmul.f32 -1.442695, %v8851_v12  ;;  %v8856_v13 = vpop.f32.mrb[6].mxu0  ;;  %v8858_v14 = vpop.f32.mrb[6].mxu1 }
 0x182   : > { %7654 = vpow2.f32 %v5822_v11  ;;  %v5825_v15 = vmul.f32 -1.442695, %v8856_v13  ;;  %v5827_v16 = vmul.f32 -1.442695, %v8858_v14  ;;  %v8862_v17 = vpop.f32.mrb[7].mxu0  ;;  %v8864_v18 = vpop.f32.mrb[7].mxu1 }
 0x183   : > { %7656 = vpow2.f32 %v5824_v9  ;;  %v5826_v33 = vmul.f32 -1.442695, %v8862_v17 }
 0x184   : > { %v7643_v19 = vpop.eup %7642  ;;  %7658 = vpow2.f32 %v5823_v7 }
 0x185   : > { %v7645_v20 = vpop.eup %7644  ;;  %v869_v21 = vadd.f32 1.0, %v7643_v19  ;;  %7660 = vpow2.f32 %v5825_v15 }
 0x186   : > { %v7647_v24 = vpop.eup %7646  ;;  %v871_v25 = vadd.f32 1.0, %v7645_v20  ;;  %7662 = vpow2.f32 %v5827_v16 }
 0x187   : > { %v7649_v26 = vpop.eup %7648  ;;  %7664 = vrcp.f32 %v869_v21  ;;  %v870_v22 = vadd.f32 1.0, %v7647_v24  ;;  %v8866_v23 = vpop.f32.mrb[8].mxu0 }
 0x188   : > { %v8868_v27 = vpop.f32.mrb[8].mxu1  ;;  %v7651_v28 = vpop.eup %7650  ;;  %7666 = vrcp.f32 %v871_v25  ;;  %v872_v29 = vadd.f32 1.0, %v7649_v26  ;;  %v5828_v37 = vmul.f32 -1.442695, %v8866_v23 }
 0x189   : > { %v8870_v30 = vpop.f32.mrb[9].mxu0  ;;  %v7653_v31 = vpop.eup %7652  ;;  %7668 = vrcp.f32 %v870_v22  ;;  %v874_v32 = vadd.f32 1.0, %v7651_v28  ;;  %v5830_v52 = vmul.f32 -1.442695, %v8868_v27 }
 0x18a   : > { %v8873_v34 = vpop.f32.mrb[9].mxu1  ;;  %v8875_v35 = vpop.f32.mrb[10].mxu0  ;;  %7670 = vrcp.f32 %v872_v29  ;;  %v873_v36 = vadd.f32 1.0, %v7653_v31  ;;  %v5829_v61 = vmul.f32 -1.442695, %v8870_v30 }
 0x18b   : > { %v8878_v38 = vpop.f32.mrb[10].mxu1  ;;  %v8880_v39 = vpop.f32.mrb[11].mxu0  ;;  %7672 = vrcp.f32 %v874_v32  ;;  %v5831_v11 = vmul.f32 -1.442695, %v8875_v35 }
 0x18c   : > { %v8882_v40 = vpop.f32.mrb[11].mxu1  ;;  %v7655_v41 = vpop.eup %7654  ;;  %7674 = vrcp.f32 %v873_v36  ;;  %v5833_v16 = vmul.f32 -1.442695, %v8878_v38 }
 0x18d   : > { %v7657_v42 = vpop.eup %7656  ;;  %v875_v43 = vadd.f32 1.0, %v7655_v41  ;;  %7676 = vpow2.f32 %v5826_v33 }
 0x18e   : > { %v7659_v44 = vpop.eup %7658  ;;  %v877_v45 = vadd.f32 1.0, %v7657_v42  ;;  %7678 = vpow2.f32 %v5828_v37 }
 0x18f   : > { %v7661_v46 = vpop.eup %7660  ;;  %7680 = vrcp.f32 %v875_v43  ;;  %v876_v47 = vadd.f32 1.0, %v7659_v44  ;;  %v8884_v48 = vpop.f32.mrb[12].mxu0 }
 0x190   : > { %v8886_v49 = vpop.f32.mrb[12].mxu1  ;;  %v7663_v50 = vpop.eup %7662  ;;  %7682 = vrcp.f32 %v877_v45  ;;  %v878_v51 = vadd.f32 1.0, %v7661_v46  ;;  %v5834_v26 = vmul.f32 -1.442695, %v8884_v48 }
 0x191   : > { %v8889_v53 = vpop.f32.mrb[13].mxu0  ;;  %v7665_v54 = vpop.eup %7664  ;;  %7684 = vrcp.f32 %v876_v47  ;;  %v880_v60 = vadd.f32 1.0, %v7663_v50  ;;  %v5836_v29 = vmul.f32 -1.442695, %v8886_v49 }
 0x192   : > { %v8892_v56 = vpop.f32.mrb[13].mxu1  ;;  %v8894_v1 = vpop.f32.mrb[14].mxu0  ;;  %v941_v5 = vmul.f32 %v7665_v54, %v8823_v55  ;;  %7686 = vrcp.f32 %v878_v51  ;;  %v5832_v55 = vmul.f32 -1.442695, %v8880_v39  ;;  %v5835_v31 = vmul.f32 -1.442695, %v8889_v53 }
 0x193   : > { %v7667_v2 = vpop.eup %7666  ;;  %v8898_v9 = vpop.f32.mrb[14].mxu1  ;;  %7688 = vrcp.f32 %v880_v60 }
 0x194   : > { %v8900_v7 = vpop.f32.mrb[15].mxu0  ;;  %v7669_v15 = vpop.eup %7668  ;;  %v8906_v21 = vmul.f32 %v941_v5, %v8831_v62  ;;  %7690 = vpow2.f32 %v5830_v52  ;;  %v943_v62 = vmul.f32 %v7667_v2, %v8825_v59  ;;  %v5837_v52 = vmul.f32 -1.442695, %v8894_v1 }
 0x195   : > { %v8903_v19 = vpop.f32.mrb[15].mxu1  ;;  %v7671_v20 = vpop.eup %7670  ;;  %7692 = vpow2.f32 %v5829_v61  ;;  %v942_v28 = vmul.f32 %v7669_v15, %v8829_v58  ;;  %v5839_v5 = vmul.f32 -1.442695, %v8898_v9 }
 0x196   : > { %v7673_v24 = vpop.eup %7672  ;;  %v944_v25 = vmul.f32 %v7671_v20, %v8834_v57  ;;  %7694 = vpow2.f32 %v5831_v11 }
 0x197   : > { %v7675_v22 = vpop.eup %7674  ;;  %v946_v33 = vmul.f32 %v7673_v24, %v8836_v63  ;;  %7696 = vpow2.f32 %v5833_v16  ;;  %v758_v57 = vpop.f32.mrb[16].mxu0 }
 0x198   : > { %v7677_v32 = vpop.eup %7676  ;;  %v8917_v36 = vmul.f32 %v944_v25, %v8842_v4  ;;  %v8919_v37 = vpop.f32.mrb[16].mxu1  ;;  %v945_v58 = vmul.f32 %v7675_v22, %v8840_v3  ;;  %7698 = vpow2.f32 %v5832_v55  ;;  %v8922_v43 = vmul.f32 %v942_v28, %v758_v57 }
 0x199   : > { %v7679_v41 = vpop.eup %7678  ;;  %v879_v42 = vadd.f32 1.0, %v7677_v32  ;;  %v760_v44 = vpop.f32.mrb[17].mxu0  ;;  %7700 = vpow2.f32 %v5834_v26 }
 0x19a   : > { %v8924_v45 = vpop.f32.mrb[17].mxu1  ;;  %v7681_v59 = vpop.eup %7680  ;;  %v881_v4 = vadd.f32 1.0, %v7679_v41  ;;  %v8928_v46 = vmul.f32 %v943_v62, %v760_v44 }
 0x19b   : > { %v762_v47 = vpop.f32.mrb[18].mxu0  ;;  %v8930_v50 = vpop.f32.mrb[18].mxu1  ;;  %v947_v3 = vmul.f32 %v7681_v59, %v8845_v6  ;;  %7702 = vrcp.f32 %v879_v42  ;;  %v5838_v6 = vmul.f32 -1.442695, %v8900_v7 }
 0x19c   : > { %v7683_v51 = vpop.eup %7682  ;;  %v8934_v54 = vmul.f32 %v945_v58, %v762_v47  ;;  %v764_v60 = vpop.f32.mrb[19].mxu0  ;;  %7704 = vrcp.f32 %v881_v4 }
 0x19d   : > { %v8936_v61 = vpop.f32.mrb[19].mxu1  ;;  %v7685_v2 = vpop.eup %7684  ;;  %v8939_v11 = vmul.f32 %v946_v33, %v764_v60  ;;  %v8942_v16 = vmul.f32 %v947_v3, %v8853_v8  ;;  %7706 = vpow2.f32 %v5836_v29  ;;  %v949_v8 = vmul.f32 %v7683_v51, %v8847_v10 }
 0x19e   : > { %v7687_v15 = vpop.eup %7686  ;;  %7708 = vpow2.f32 %v5835_v31  ;;  %v948_v22 = vmul.f32 %v7685_v2, %v8851_v12  ;;  %v5936_v60 = vmul.f32 -1.442695, %v8919_v37 }
 0x19f   : > { %v7689_v55 = vpop.eup %7688  ;;  %v950_v24 = vmul.f32 %v7687_v15, %v8856_v13  ;;  %7710 = vpow2.f32 %v5837_v52  ;;  %v768_v62 = vpop.f32.mrb[20].mxu0 }
 0x1a0   : > { %v7691_v26 = vpop.eup %7690  ;;  %7712 = vpow2.f32 %v5839_v5  ;;  %v8955_v33 = vpop.f32.mrb[20].mxu1  ;;  %v952_v31 = vmul.f32 %v7689_v55, %v8858_v14  ;;  %v8958_v41 = vmul.f32 %v948_v22, %v768_v62  ;;  %v5937_v55 = vmul.f32 -1.442695, %v8924_v45 }
 0x1a1   : > { %v7693_v28 = vpop.eup %7692  ;;  %v8953_v29 = vmul.f32 %v950_v24, %v8864_v18  ;;  %v883_v32 = vadd.f32 1.0, %v7691_v26  ;;  %7714 = vpow2.f32 %v5838_v6  ;;  %v770_v12 = vpop.f32.mrb[21].mxu0 }
 0x1a2   : > { %v7695_v13 = vpop.eup %7694  ;;  %v882_v57 = vadd.f32 1.0, %v7693_v28  ;;  %v8960_v58 = vpop.f32.mrb[21].mxu1  ;;  %v8964_v44 = vmul.f32 %v949_v8, %v770_v12 }
 0x1a3   : > { %v7697_v42 = vpop.eup %7696  ;;  %7716 = vrcp.f32 %v883_v32  ;;  %v884_v18 = vadd.f32 1.0, %v7695_v13  ;;  %v772_v59 = vpop.f32.mrb[22].mxu0 }
 0x1a4   : > { %10652 = vst [vmem:[#allocation5_spill] sm:$0xff] %v8964_v44  ;;  %v8966_v4 = vpop.f32.mrb[22].mxu1  ;;  %v7699_v47 = vpop.eup %7698  ;;  %7718 = vrcp.f32 %v882_v57  ;;  %v886_v14 = vadd.f32 1.0, %v7697_v42 }
 0x1a5   : > { %v774_v51 = vpop.f32.mrb[23].mxu0  ;;  %v7701_v3 = vpop.eup %7700  ;;  %7720 = vrcp.f32 %v884_v18  ;;  %v885_v52 = vadd.f32 1.0, %v7699_v47 }
 0x1a6   : > { %v8969_v2 = vmul.f32 %v952_v31, %v774_v51  ;;  %v8971_v5 = vpop.f32.mrb[23].mxu1  ;;  %v7703_v15 = vpop.eup %7702  ;;  %7722 = vrcp.f32 %v886_v14  ;;  %v887_v6 = vadd.f32 1.0, %v7701_v3 }
 0x1a7   : > { %v7705_v24 = vpop.eup %7704  ;;  %v951_v26 = vmul.f32 %v7703_v15, %v8862_v17  ;;  %7724 = vrcp.f32 %v885_v52  ;;  %v778_v31 = vpop.f32.mrb[24].mxu0 }
 0x1a8   : > { %10653 = vst [vmem:[#allocation6_spill] sm:$0xff] %v8969_v2  ;;  %v7707_v28 = vpop.eup %7706  ;;  %v953_v8 = vmul.f32 %v7705_v24, %v8866_v23  ;;  %7726 = vrcp.f32 %v887_v6  ;;  %v8980_v57 = vpop.f32.mrb[24].mxu1 }
 0x1a9   : > { %v7709_v32 = vpop.eup %7708  ;;  %v889_v62 = vadd.f32 1.0, %v7707_v28  ;;  %7728 = vpow2.f32 %v5936_v60  ;;  %v8978_v13 = vmul.f32 %v951_v26, %v772_v59  ;;  %v780_v18 = vpop.f32.mrb[25].mxu0  ;;  %v5940_v26 = vmul.f32 -1.442695, %v8936_v61 }
 0x1aa   : > { %v7711_v12 = vpop.eup %7710  ;;  %v8983_v42 = vmul.f32 %v953_v8, %v8873_v34  ;;  %v888_v17 = vadd.f32 1.0, %v7709_v32  ;;  %7730 = vpow2.f32 %v5937_v55  ;;  %v8985_v47 = vpop.f32.mrb[25].mxu1  ;;  %v5939_v34 = vmul.f32 -1.442695, %v8930_v50 }
 0x1ab   : > { %v7713_v14 = vpop.eup %7712  ;;  %7732 = vrcp.f32 %v889_v62  ;;  %v890_v23 = vadd.f32 1.0, %v7711_v12  ;;  %v782_v59 = vpop.f32.mrb[26].mxu0  ;;  %v5942_v32 = vmul.f32 -1.442695, %v8955_v33 }
 0x1ac   : > { %v8989_v3 = vpop.f32.mrb[26].mxu1  ;;  %v7715_v52 = vpop.eup %7714  ;;  %7734 = vrcp.f32 %v888_v17  ;;  %v892_v60 = vadd.f32 1.0, %v7713_v14  ;;  %v5943_v17 = vmul.f32 -1.442695, %v8960_v58 }
 0x1ad   : > { %v784_v15 = vpop.f32.mrb[27].mxu0  ;;  %v8992_v6 = vpop.f32.mrb[27].mxu1  ;;  %7736 = vrcp.f32 %v890_v23  ;;  %v891_v24 = vadd.f32 1.0, %v7715_v52  ;;  %v5945_v23 = vmul.f32 -1.442695, %v8966_v4 }
 0x1ae   : > { %v7717_v55 = vpop.eup %7716  ;;  %7738 = vrcp.f32 %v892_v60  ;;  %v5946_v60 = vmul.f32 -1.442695, %v8971_v5 }
 0x1af   : > { %v7719_v28 = vpop.eup %7718  ;;  %v955_v8 = vmul.f32 %v7717_v55, %v8868_v27  ;;  %7740 = vrcp.f32 %v891_v24  ;;  %v9007_v24 = vpop.f32.mrb[28].mxu1 }
 0x1b0   : > { %v7721_v62 = vpop.eup %7720  ;;  %v954_v12 = vmul.f32 %v7719_v28, %v8870_v30  ;;  %7742 = vpow2.f32 %v5939_v34  ;;  %v788_v30 = vpop.f32.mrb[28].mxu0 }
 0x1b1   : > { %v7723_v14 = vpop.eup %7722  ;;  %v956_v22 = vmul.f32 %v7721_v62, %v8875_v35  ;;  %v9001_v52 = vmul.f32 %v955_v8, %v780_v18  ;;  %7744 = vpow2.f32 %v5940_v26  ;;  %v5948_v18 = vmul.f32 -1.442695, %v8980_v57  ;;  %v790_v34 = vpop.f32.mrb[29].mxu0 }
 0x1b2   : > { %v7725_v0 = vpop.eup %7724  ;;  %v958_v27 = vmul.f32 %v7723_v14, %v8878_v38  ;;  %v9005_v55 = vmul.f32 %v954_v12, %v778_v31  ;;  %7746 = vpow2.f32 %v5942_v32  ;;  %v9014_v8 = vpop.f32.mrb[29].mxu1  ;;  %v5949_v31 = vmul.f32 -1.442695, %v8985_v47 }
 0x1b3   : > { %10654 = vst [vmem:[#allocation7_spill] sm:$0xff] %v9001_v52  ;;  %v7727_v28 = vpop.eup %7726  ;;  %v957_v10 = vmul.f32 %v7725_v0, %v8880_v39  ;;  %v9011_v35 = vmul.f32 %v956_v22, %v8882_v40  ;;  %7748 = vpow2.f32 %v5943_v17  ;;  %v792_v12 = vpop.f32.mrb[30].mxu0 }
 0x1b4   : > { %v7729_v38 = vpop.eup %7728  ;;  %v959_v26 = vmul.f32 %v7727_v28, %v8884_v48  ;;  %v9018_v62 = vmul.f32 %v958_v27, %v784_v15  ;;  %v9020_v14 = vpop.f32.mrb[30].mxu1  ;;  %7750 = vpow2.f32 %v5945_v23 }
 0x1b5   : > { %v7731_v0 = vpop.eup %7730  ;;  %v1673_v40 = vadd.f32 1.0, %v7729_v38  ;;  %v9024_v22 = vmul.f32 %v957_v10, %v782_v59  ;;  %v794_v32 = vpop.f32.mrb[31].mxu0  ;;  %7752 = vpow2.f32 %v5946_v60  ;;  %v5951_v59 = vmul.f32 -1.442695, %v8989_v3 }
 0x1b6   : > { %10655 = vst [vmem:[#allocation8_spill] sm:$0xff] %v9018_v62  ;;  %v9026_v25 = vpop.f32.mrb[31].mxu1  ;;  %v7733_v48 = vpop.eup %7732  ;;  %v9029_v17 = vmul.f32 %v959_v26, %v8892_v56  ;;  %v1674_v15 = vadd.f32 1.0, %v7731_v0  ;;  %v5952_v56 = vmul.f32 -1.442695, %v8992_v6 }
 0x1b7   : > { %v7735_v28 = vpop.eup %7734  ;;  %v961_v51 = vmul.f32 %v7733_v48, %v8886_v49  ;;  %7754 = vrcp.f32 %v1673_v40  ;;  %v5954_v0 = vmul.f32 -1.442695, %v9007_v24  ;;  %v9046_v39 = vpop.f32.mrb[32].mxu0 }
 0x1b8   : > { %10656 = vst [vmem:[#allocation9_spill] sm:$0xff] %v9029_v17  ;;  %v7737_v23 = vpop.eup %7736  ;;  %v960_v38 = vmul.f32 %v7735_v28, %v8889_v53  ;;  %7756 = vrcp.f32 %v1674_v15  ;;  %v1562_v53 = vpop.f32.mrb[32].mxu1 }
 0x1b9   : > { %v7739_v26 = vpop.eup %7738  ;;  %v962_v60 = vmul.f32 %v7737_v23, %v8894_v1  ;;  %7758 = vpow2.f32 %v5948_v18  ;;  %v9041_v27 = vmul.f32 %v961_v51, %v790_v34  ;;  %v1491_v1 = vpop.f32.mrb[33].mxu0 }
 0x1ba   : > { %v7741_v49 = vpop.eup %7740  ;;  %v964_v40 = vmul.f32 %v7739_v26, %v8898_v9  ;;  %7760 = vpow2.f32 %v5949_v31  ;;  %v9044_v48 = vmul.f32 %v960_v38, %v788_v30  ;;  %v9052_v18 = vpop.f32.mrb[33].mxu1 }
 0x1bb   : > { %10657 = vst [vmem:[#allocation10_spill] sm:$0xff] %v9041_v27  ;;  %v7743_v15 = vpop.eup %7742  ;;  %v963_v28 = vmul.f32 %v7741_v49, %v8900_v7  ;;  %v9050_v10 = vmul.f32 %v962_v60, %v8903_v19  ;;  %7762 = vpow2.f32 %v5951_v59  ;;  %v9056_v30 = vpop.f32.mrb[34].mxu0  ;;  %v8122_v27 = vld [vmem:[%s8337_s5 + $0x8] sm:$0xff] }
 0x1bc   : > { %10658 = vst [vmem:[#allocation11_spill] sm:$0xff] %v9044_v48  ;;  %v7745_v51 = vpop.eup %7744  ;;  %v1676_v34 = vadd.f32 1.0, %v7743_v15  ;;  %7764 = vpow2.f32 %v5952_v56  ;;  %v9054_v9 = vmul.f32 %v964_v40, %v794_v32  ;;  %v9058_v31 = vpop.f32.mrb[34].mxu1 }
 0x1bd   : > { %10659 = vst [vmem:[#allocation12_spill] sm:$0xff] %v9050_v10  ;;  %v7747_v23 = vpop.eup %7746  ;;  %v1677_v38 = vadd.f32 1.0, %v7745_v51  ;;  %7766 = vpow2.f32 %v5954_v0  ;;  %v9062_v19 = vmul.f32 %v963_v28, %v792_v12  ;;  %v9064_v59 = vpop.f32.mrb[35].mxu0  ;;  %v5955_v0 = vmul.f32 -1.442695, %v9014_v8 }
 0x1be   : > { %10660 = vst [vmem:[#allocation13_spill] sm:$0xff] %v9054_v9  ;;  %v9066_v26 = vpop.f32.mrb[35].mxu1  ;;  %v7749_v60 = vpop.eup %7748  ;;  %7768 = vrcp.f32 %v1676_v34  ;;  %v1679_v32 = vadd.f32 1.0, %v7747_v23  ;;  %v5957_v34 = vmul.f32 -1.442695, %v9020_v14 }
 0x1bf   : > { %v7751_v49 = vpop.eup %7750  ;;  %7770 = vrcp.f32 %v1677_v38  ;;  %v1680_v40 = vadd.f32 1.0, %v7749_v60  ;;  %v9075_v56 = vpop.f32.mrb[36].mxu0 }
 0x1c0   : > { %v7753_v51 = vpop.eup %7752  ;;  %7772 = vrcp.f32 %v1679_v32  ;;  %v1682_v12 = vadd.f32 1.0, %v7751_v49  ;;  %v9077_v38 = vpop.f32.mrb[36].mxu1 }
 0x1c1   : > { %v7755_v28 = vpop.eup %7754  ;;  %7774 = vrcp.f32 %v1680_v40  ;;  %v1683_v7 = vadd.f32 1.0, %v7753_v51  ;;  %v9080_v49 = vpop.f32.mrb[37].mxu0  ;;  %v8222_v51 = vmov 3  }
 0x1c2   : > { %v7757_v23 = vpop.eup %7756  ;;  %v1745_v63 = vmul.f32 %v7755_v28, %v8919_v37  ;;  %7776 = vrcp.f32 %v1682_v12  ;;  %v9082_v40 = vpop.f32.mrb[37].mxu1  ;;  %7159 = vset.pattern.permute.xlu1 %v8222_v51  ;;  %7158 = vset.pattern.permute.xlu0 %v8222_v51 }
 0x1c3   : > { %v7759_v60 = vpop.eup %7758  ;;  %v1746_v32 = vmul.f32 %v7757_v23, %v8924_v45  ;;  %7778 = vrcp.f32 %v1683_v7  ;;  %v9086_v28 = vpop.f32.mrb[38].mxu0  ;;  %3494 = vperm.xlu1 %7159, %v8122_v27   ;;  %v8123_v45 = vld [vmem:[%s8337_s5] sm:$0xff]  ;;  %v5958_v27 = vmul.f32 -1.442695, %v9026_v25 }
 0x1c4   : > { %v7761_v15 = vpop.eup %7760  ;;  %v1685_v37 = vadd.f32 1.0, %v7759_v60  ;;  %7780 = vpow2.f32 %v5955_v0  ;;  %v9084_v12 = vmul.f32 %v1745_v63, %v1491_v1  ;;  %v9088_v20 = vpop.f32.mrb[38].mxu1  ;;  %3490 = vperm.xlu0 %7158, %v8123_v45  }
 0x1c5   : > { %v7763_v7 = vpop.eup %7762  ;;  %v1686_v23 = vadd.f32 1.0, %v7761_v15  ;;  %7782 = vpow2.f32 %v5957_v34  ;;  %v9092_v9 = vmul.f32 %v1746_v32, %v1562_v53  ;;  %v1505_v51 = vpop.f32.mrb[39].mxu0  ;;  %v5938_v15 = vmul.f32 -1.442695, %v9046_v39  ;;  %v8124_v34 = vld [vmem:[%s8337_s5 + $0x10] sm:$0xff]  ;;  %v8125_v53 = vld [vmem:[%s8337_s5 + $0x18] sm:$0xff] }
 0x1c6   : > { %v9094_v60 = vpop.f32.mrb[39].mxu1  ;;  %v7765_v63 = vpop.eup %7764  ;;  %7784 = vrcp.f32 %v1685_v37  ;;  %v1688_v1 = vadd.f32 1.0, %v7763_v7  ;;  %v5941_v37 = vmul.f32 -1.442695, %v9056_v30 }
 0x1c7   : > { %v7767_v0 = vpop.eup %7766  ;;  %7786 = vrcp.f32 %v1686_v23  ;;  %v1689_v52 = vadd.f32 1.0, %v7765_v63  ;;  %3498 = vperm.xlu1 %7159, %v8124_v34   ;;  %v5944_v63 = vmul.f32 -1.442695, %v9075_v56 }
 0x1c8   : > { %v7769_v62 = vpop.eup %7768  ;;  %7788 = vrcp.f32 %v1688_v1  ;;  %v1691_v45 = vadd.f32 1.0, %v7767_v0  ;;  %3502 = vperm.xlu0 %7158, %v8125_v53   ;;  %v9104_v1 = vpop.f32.mrb[40].mxu0 }
 0x1c9   : > { %v7771_v32 = vpop.eup %7770  ;;  %v1748_v44 = vmul.f32 %v7769_v62, %v8930_v50  ;;  %7790 = vrcp.f32 %v1689_v52  ;;  %v9106_v0 = vpop.f32.mrb[40].mxu1  ;;  %v5947_v52 = vmul.f32 -1.442695, %v9086_v28  ;;  %v5950_v17 = vmul.f32 -1.442695, %v9104_v1 }
 0x1ca   : > { %v7773_v7 = vpop.eup %7772  ;;  %v1749_v23 = vmul.f32 %v7771_v32, %v8936_v61  ;;  %7792 = vrcp.f32 %v1691_v45  ;;  %v1511_v62 = vpop.f32.mrb[41].mxu0 }
 0x1cb   : > { %v7775_v34 = vpop.eup %7774  ;;  %v1751_v53 = vmul.f32 %v7773_v7, %v8955_v33  ;;  %7794 = vpow2.f32 %v5958_v27  ;;  %v1772_v50 = vmul.f32 %v1748_v44, %v9064_v59  ;;  %v9111_v2 = vpop.f32.mrb[41].mxu1  ;;  %v8126_v33 = vld [vmem:[%s8337_s5 + $0x20] sm:$0xff]  ;;  %v8127_v44 = vld [vmem:[%s8337_s5 + $0x28] sm:$0xff] }
 0x1cc   : > { %v7777_v61 = vpop.eup %7776  ;;  %v1752_v45 = vmul.f32 %v7775_v34, %v8960_v58  ;;  %7796 = vpow2.f32 %v5938_v15  ;;  %v1773_v32 = vmul.f32 %v1749_v23, %v9058_v31  ;;  %v9116_v10 = vpop.f32.mrb[42].mxu0  ;;  %3506 = vperm.xlu1 %7159, %v8126_v33   ;;  %3510 = vperm.xlu0 %7158, %v8127_v44  }
 0x1cd   : > { %v9118_v48 = vpop.f32.mrb[42].mxu1  ;;  %v7779_v59 = vpop.eup %7778  ;;  %v1754_v27 = vmul.f32 %v7777_v61, %v8966_v4  ;;  %7798 = vpow2.f32 %v5941_v37  ;;  %v1793_v7 = vpack.c.bf16 %v1772_v50, %v9084_v12  ;;  %v9125_v58 = vmul.f32 %v1751_v53, %v9080_v49  ;;  %v7323_v4 = vld [vmem:[%s10637_s3] sm:$0xff]   ;;  %v8128_v50 = vld [vmem:[%s8337_s5 + $0x30] sm:$0xff] }
 0x1ce   : > { %v1515_v31 = vpop.f32.mrb[43].mxu0  ;;  %v9127_v15 = vpop.f32.mrb[43].mxu1  ;;  %v1755_v34 = vmul.f32 %v7779_v59, %v8971_v5  ;;  %v1794_v33 = vpack.c.bf16 %v1773_v32, %v9092_v9  ;;  %7800 = vpow2.f32 %v5944_v63  ;;  %v1776_v44 = vmul.f32 %v1752_v45, %v9077_v38  ;;  %v7325_v5 = vld [vmem:[%s10637_s3 + $0x48] sm:$0xff]   ;;  %v8129_v45 = vld [vmem:[%s8337_s5 + $0x38] sm:$0xff] }
 0x1cf   : > { %v7781_v23 = vpop.eup %7780  ;;  %7802 = vpow2.f32 %v5947_v52  ;;  %v9135_v49 = vmul.f32 %v1754_v27, %v1505_v51  ;;  %v5953_v53 = vmul.f32 -1.442695, %v9116_v10 }
 0x1d0   : > { %v7783_v12 = vpop.eup %7782  ;;  %v1692_v37 = vadd.f32 1.0, %v7781_v23  ;;  %2030 = vmatprep.mubr.bf16.mxu0 %v1794_v33  ;;  %v1779_v38 = vmul.f32 %v1755_v34, %v9088_v20  ;;  %7804 = vpow2.f32 %v5950_v17  ;;  %3514 = vperm.xlu1 %7159, %v8128_v50   ;;  %v7326_v20 = vld [vmem:[%s10637_s3 + $0x8] sm:$0xff]   ;;  %v9151_v17 = vpop.f32.mrb[44].mxu0 }
 0x1d1   : > { %v7785_v9 = vpop.eup %7784  ;;  %v1694_v63 = vadd.f32 1.0, %v7783_v12  ;;  %2031 = vmatmul.mubr.bf16.vlgmr.msra.gmra.mrb[48].mxu0 %v1793_v7  ;;  %v1796_v51 = vpack.c.bf16 %v9135_v49, %v9125_v58  ;;  %3518 = vperm.xlu0 %7158, %v8129_v45   ;;  %v7328_v58 = vld [vmem:[%s10637_s3 + $0x50] sm:$0xff]   ;;  %v1521_v33 = vpop.f32.mrb[45].mxu0 }
 0x1d2   : > { %v7787_v61 = vpop.eup %7786  ;;  %v1757_v52 = vmul.f32 %v7785_v9, %v8980_v57  ;;  %7806 = vrcp.f32 %v1692_v37  ;;  %6691 = vmatpush3.bf16.msra.mxu0 %v7323_v4  ;;  %v1797_v27 = vpack.c.bf16 %v1779_v38, %v1776_v44  ;;  %v1592_v57 = vpop.f32.mrb[44].mxu1 }
 0x1d3   : > { %v7789_v32 = vpop.eup %7788  ;;  %v1758_v59 = vmul.f32 %v7787_v61, %v8985_v47  ;;  %7808 = vrcp.f32 %v1694_v63  ;;  %6692 = vmatprep.subr.bf16.mxu0 %v7325_v5  ;;  %v5956_v47 = vmul.f32 -1.442695, %v9151_v17  ;;  %v9160_v44 = vpop.f32.mrb[45].mxu1 }
 0x1d4   : > { %v7791_v23 = vpop.eup %7790  ;;  %v1760_v7 = vmul.f32 %v7789_v32, %v8989_v3  ;;  %v9157_v34 = vmul.f32 %v1757_v52, %v1511_v62  ;;  %7810 = vpow2.f32 %v5953_v53  ;;  %2038 = vmatprep.mubr.bf16.mxu0 %v1797_v27  ;;  %v9164_v3 = vpop.f32.mrb[46].mxu0 }
 0x1d5   : > { %v7793_v4 = vpop.eup %7792  ;;  %v1761_v12 = vmul.f32 %v7791_v23, %v8992_v6  ;;  %v1782_v37 = vmul.f32 %v1758_v59, %v9106_v0  ;;  %v9166_v49 = vpop.f32.mrb[46].mxu1  ;;  %7812 = vpow2.f32 %v5956_v47  ;;  %v5959_v53 = vmul.f32 -1.442695, %v9164_v3  ;;  %v7329_v6 = vld [vmem:[%s10637_s3 + $0x10] sm:$0xff]  }
 0x1d6   : > { %v7795_v5 = vpop.eup %7794  ;;  %v1763_v62 = vmul.f32 %v7793_v4, %v9007_v24  ;;  %v1784_v9 = vmul.f32 %v1760_v7, %v1515_v31  ;;  %v1525_v63 = vpop.f32.mrb[47].mxu0  ;;  %6693 = vmatpush3.bf16.msra.mxu0 %v7326_v20  ;;  %v7331_v31 = vld [vmem:[%s10637_s3 + $0x58] sm:$0xff]   ;;  %v7334_v4 = vld [vmem:[%s10637_s3 + $0x60] sm:$0xff]  }
 0x1d7   : > { %v9170_v38 = vpop.f32.mrb[47].mxu1  ;;  %v7797_v50 = vpop.eup %7796  ;;  %v1695_v61 = vadd.f32 1.0, %v7795_v5  ;;  %v1785_v0 = vmul.f32 %v1761_v12, %v9118_v48  ;;  %6694 = vmatprep.subr.bf16.mxu0 %v7328_v58  ;;  %7814 = vpow2.f32 %v5959_v53  ;;  %v7335_v53 = vld [vmem:[%s10637_s3 + $0x20] sm:$0xff]  }
 0x1d8   : > { %v7799_v52 = vpop.eup %7798  ;;  %v1675_v45 = vadd.f32 1.0, %v7797_v50  ;;  %v1799_v24 = vpack.c.bf16 %v1784_v9, %v9157_v34  ;;  %v9180_v32 = vmul.f32 %v1763_v62, %v1521_v33  ;;  %v7332_v34 = vld [vmem:[%s10637_s3 + $0x18] sm:$0xff]  }
 0x1d9   : > { %v7801_v59 = vpop.eup %7800  ;;  %7816 = vrcp.f32 %v1695_v61  ;;  %v1678_v27 = vadd.f32 1.0, %v7799_v52  ;;  %v1800_v20 = vpack.c.bf16 %v1785_v0, %v1782_v37  ;;  %2039 = vmatmul.mubr.bf16.gmra.mrb[52].mxu0 %v1796_v51 }
 0x1da   : > { %v7803_v23 = vpop.eup %7802  ;;  %7818 = vrcp.f32 %v1675_v45  ;;  %v1681_v7 = vadd.f32 1.0, %v7801_v59  ;;  %6695 = vmatpush3.bf16.msra.mxu0 %v7329_v6  ;;  %v7337_v6 = vld [vmem:[%s10637_s3 + $0x68] sm:$0xff]   ;;  %v7340_v59 = vld [vmem:[%s10637_s3 + $0x70] sm:$0xff]  }
 0x1db   : > { %v7805_v48 = vpop.eup %7804  ;;  %7820 = vrcp.f32 %v1678_v27  ;;  %v1684_v58 = vadd.f32 1.0, %v7803_v23  ;;  %2046 = vmatprep.mubr.bf16.mxu0 %v1800_v20  ;;  %6696 = vmatprep.subr.bf16.mxu0 %v7331_v31  ;;  %v7338_v45 = vld [vmem:[%s10637_s3 + $0x28] sm:$0xff]  }
 0x1dc   : > { %v7807_v47 = vpop.eup %7806  ;;  %7822 = vrcp.f32 %v1681_v7  ;;  %v1687_v33 = vadd.f32 1.0, %v7805_v48 }
 0x1dd   : > { %v7809_v12 = vpop.eup %7808  ;;  %v1764_v51 = vmul.f32 %v7807_v47, %v9014_v8  ;;  %7824 = vrcp.f32 %v1684_v58 }
 0x1de   : > { %v7811_v37 = vpop.eup %7810  ;;  %v1766_v5 = vmul.f32 %v7809_v12, %v9020_v14  ;;  %7826 = vrcp.f32 %v1687_v33  ;;  %6697 = vmatpush3.bf16.msra.mxu0 %v7332_v34 }
 0x1df   : > { %v1690_v62 = vadd.f32 1.0, %v7811_v37  ;;  %v1788_v9 = vmul.f32 %v1764_v51, %v1592_v57  ;;  %v7813_v50 = vpop.eup %7812  ;;  %6698 = vmatprep.subr.bf16.mxu0 %v7334_v4 }
 0x1e0   : > { %v1790_v61 = vmul.f32 %v1766_v5, %v1525_v63  ;;  %v1693_v8 = vadd.f32 1.0, %v7813_v50  ;;  %v8130_v5 = vld [vmem:[%s10637_s3 + $0x80] sm:$0xff]  }
 0x1e1   : > { %7828 = vrcp.f32 %v1690_v62  ;;  %v7815_v0 = vpop.eup %7814  ;;  %2047 = vmatmul.mubr.bf16.gmra.mrb[56].mxu0 %v1799_v24  ;;  %v7346_v50 = vld [vmem:[%s10636_s2 + $0x300] ss:$24 sps:$4 sm:$0xff]  }
 0x1e2   : > { %v1802_v14 = vpack.c.bf16 %v1790_v61, %v9180_v32  ;;  %7830 = vrcp.f32 %v1693_v8  ;;  %6699 = vmatpush3.bf16.msra.mxu0 %v7335_v53  ;;  %v1696_v57 = vadd.f32 1.0, %v7815_v0  ;;  %v7350_v8 = vld [vmem:[%s10636_s2 + $0x330] ss:$24 sps:$4 sm:$0xff]   ;;  %v7365_v0 = vld [vmem:[%s10637_s3 + $0xa0] sm:$0xff]  }
 0x1e3   : > { %v7817_v52 = vpop.eup %7816  ;;  %6700 = vmatprep.subr.bf16.mxu0 %v7337_v6  ;;  %v10663_v6 = vpack.c.bf16 %v8978_v13, %v8958_v41  ;;  %v7354_v41 = vld [vmem:[%s10636_s2 + $0x360] ss:$24 sps:$4 sm:$0xff]   ;;  %v7360_v13 = vld [vmem:[%s10636_s2 + $0x394] ss:$24 sps:$4 sm:$0xff]  }
 0x1e4   : > { %v7819_v31 = vpop.eup %7818  ;;  %v1767_v63 = vmul.f32 %v7817_v52, %v9026_v25  ;;  %7832 = vrcp.f32 %v1696_v57  ;;  %v7369_v52 = vld [vmem:[%s10637_s3 + $0xa8] sm:$0xff]   ;;  %v10667_v57 = vpack.c.bf16 %v9011_v35, %v8983_v42  ;;  %v7372_v42 = vld [vmem:[%s10636_s2 + $0x424] ss:$24 sps:$4 sm:$0xff]   ;;  %v2404_v35 = vpop.permute.xlu1 %2403 }
 0x1e5   : > { %v7821_v27 = vpop.eup %7820  ;;  %v1747_v24 = vmul.f32 %v7819_v31, %v9046_v39  ;;  %v7341_v39 = vld [vmem:[%s10637_s3 + $0x30] sm:$0xff]  }
 0x1e6   : > { %v7823_v32 = vpop.eup %7822  ;;  %v1750_v20 = vmul.f32 %v7821_v27, %v9056_v30  ;;  %v1791_v23 = vmul.f32 %v1767_v63, %v9166_v49  ;;  %6701 = vmatpush3.bf16.msra.mxu0 %v7338_v45  ;;  %v10668_v45 = vld [vmem:[#allocation11_spill] sm:$0xff] }
 0x1e7   : > { %v7825_v7 = vpop.eup %7824  ;;  %v1771_v48 = vmul.f32 %v1747_v24, %v9052_v18  ;;  %v1753_v58 = vmul.f32 %v7823_v32, %v9075_v56  ;;  %6702 = vmatprep.subr.bf16.mxu0 %v7340_v59  ;;  %v7343_v18 = vld [vmem:[%s10637_s3 + $0x78] sm:$0xff]   ;;  %v10669_v31 = vpack.c.bf16 %v9062_v19, %v10668_v45  ;;  %v7366_v63 = vld [vmem:[%s10636_s2 + $0x3f0] ss:$24 sps:$4 sm:$0xff]   ;;  %v7376_v27 = vld [vmem:[%s10636_s2 + $0x454] ss:$24 sps:$4 sm:$0xff]   ;;  %v2408_v32 = vpop.permute.xlu0 %2407 }
 0x1e8   : > { %v7827_v25 = vpop.eup %7826  ;;  %v1774_v34 = vmul.f32 %v1750_v20, %v9066_v26  ;;  %v1756_v47 = vmul.f32 %v7825_v7, %v9086_v28  ;;  %v1803_v33 = vpack.c.bf16 %v1791_v23, %v1788_v9  ;;  %v7377_v59 = vld [vmem:[%s10637_s3 + $0xb8] sm:$0xff]   ;;  %v7383_v24 = vld [vmem:[%s10636_s2 + $0x30c] ss:$24 sps:$4 sm:$0xff]  }
 0x1e9   : > { %v1777_v30 = vmul.f32 %v1753_v58, %v9082_v40  ;;  %v1759_v49 = vmul.f32 %v7827_v25, %v9104_v1  ;;  %v10661_v40 = vpack.c.bf16 %v8934_v54, %v8922_v43  ;;  %v7344_v1 = vld [vmem:[%s10637_s3 + $0x38] sm:$0xff]   ;;  %v9327_v20 = vld [vmem:[%s8465_s29] sm:$0xff]  ;;  %v9331_v7 = vld [vmem:[%s8465_s29 + $0x8] sm:$0xff] }
 0x1ea   : > { %v1795_v56 = vpack.c.bf16 %v1774_v34, %v1771_v48  ;;  %v1780_v4 = vmul.f32 %v1756_v47, %v9094_v60  ;;  %2054 = vmatprep.mubr.bf16.mxu0 %v1803_v33  ;;  %6703 = vmatpush3.bf16.msra.mxu0 %v7341_v39  ;;  %v7353_v60 = vld [vmem:[%s10637_s3 + $0x88] sm:$0xff]   ;;  %v7370_v19 = vld [vmem:[%s10636_s2 + $0x420] ss:$24 sps:$4 sm:$0xff]   ;;  %v2434_v23 = vmul.f32 %v9327_v20, %v2404_v35  ;;  %v10673_v39 = vmov 0   ;;  %v7410_v45 = vld [vmem:[%s10636_s2 + $0x404] ss:$24 sps:$4 sm:$0xff]  }
 0x1eb   : > { %v7829_v26 = vpop.eup %7828  ;;  %v1783_v28 = vmul.f32 %v1759_v49, %v9111_v2  ;;  %2055 = vmatmul.mubr.bf16.gmra.mrb[60].mxu0 %v1802_v14  ;;  %6704 = vmatprep.subr.bf16.mxu0 %v7343_v18  ;;  %v7348_v2 = vld [vmem:[%s10636_s2 + $0x304] ss:$24 sps:$4 sm:$0xff]   ;;  %v10665_v14 = vpack.c.bf16 %v8953_v29, %v8942_v16  ;;  %v7362_v29 = vld [vmem:[%s10636_s2 + $0x3c0] ss:$24 sps:$4 sm:$0xff]   ;;  %v2435_v48 = vmul.f32 %v9331_v7, %v2408_v32  ;;  %v7374_v33 = vld [vmem:[%s10636_s2 + $0x450] ss:$24 sps:$4 sm:$0xff]   ;;  %v2412_v18 = vpop.permute.xlu1 %2411 }
 0x1ec   : > { %v1798_v12 = vpack.c.bf16 %v1780_v4, %v1777_v30  ;;  %v1762_v51 = vmul.f32 %v7829_v26, %v9116_v10  ;;  %2304 = vmatprep.mubr.bf16.mxu0 %v10661_v40  ;;  %v7831_v37 = vpop.eup %7830  ;;  %6914 = vmatprep.mubr.bf16.mxu1 %v1795_v56  ;;  %v7364_v16 = vld [vmem:[%s10636_s2 + $0x3c4] ss:$24 sps:$4 sm:$0xff]   ;;  %v7381_v47 = vld [vmem:[%s10636_s2 + $0x308] ss:$24 sps:$4 sm:$0xff]   ;;  %v7380_v49 = vld [vmem:[%s10636_s2 + $0x314] ss:$24 sps:$4 sm:$0xff]  }
 0x1ed   : > { %v1765_v43 = vmul.f32 %v7831_v37, %v9151_v17  ;;  %v7357_v17 = vld [vmem:[%s10637_s3 + $0x90] sm:$0xff]   ;;  %v10670_v58 = vld [vmem:[#allocation12_spill] sm:$0xff]  ;;  %v10671_v25 = vld [vmem:[#allocation9_spill] sm:$0xff] }
 0x1ee   : > { %v1786_v10 = vmul.f32 %v1762_v51, %v9127_v15  ;;  %6915 = vmatmul.mubr.bf16.vlgmr.msra.gmra.mrb[48].mxu1 %v1798_v12  ;;  %v7833_v54 = vpop.eup %7832  ;;  %6705 = vmatpush3.bf16.msra.mxu0 %v7344_v1  ;;  %v7352_v15 = vld [vmem:[%s10636_s2 + $0x334] ss:$24 sps:$4 sm:$0xff]   ;;  %v10672_v34 = vpack.c.bf16 %v10670_v58, %v10671_v25  ;;  %v10675_v4 = vld [vmem:[#allocation5_spill] sm:$0xff]  ;;  %v10677_v12 = vld [vmem:[#allocation8_spill] sm:$0xff] }
 0x1ef   : > { %6923 = vmatpush3.bf16.msra.mxu1 %v8130_v5  ;;  %v1789_v9 = vmul.f32 %v1765_v43, %v9160_v44  ;;  %v1768_v53 = vmul.f32 %v7833_v54, %v9164_v3  ;;  %2735 = vmatprep.subr.bf16.mxu0 %v7348_v2  ;;  %v10662_v44 = vpack.c.bf16 %v8917_v36, %v8906_v21  ;;  %v7356_v21 = vld [vmem:[%s10636_s2 + $0x364] ss:$24 sps:$4 sm:$0xff]   ;;  %v10674_v56 = vld [vmem:[#allocation6_spill] sm:$0xff]  ;;  %v10678_v51 = vld [vmem:[#allocation7_spill] sm:$0xff]  ;;  %v2416_v43 = vpop.permute.xlu1 %2415 }
 0x1f0   : > { %v1801_v62 = vpack.c.bf16 %v1786_v10, %v1783_v28  ;;  %6924 = vmatprep.subr.bf16.mxu1 %v7353_v60  ;;  %v10664_v36 = vpack.c.bf16 %v8939_v11, %v8928_v46  ;;  %v10666_v46 = vpack.c.bf16 %v9024_v22, %v9005_v55  ;;  %v7358_v11 = vld [vmem:[%s10636_s2 + $0x390] ss:$24 sps:$4 sm:$0xff]   ;;  %v7368_v55 = vld [vmem:[%s10636_s2 + $0x3f4] ss:$24 sps:$4 sm:$0xff]   ;;  %v10676_v26 = vpack.c.bf16 %v10674_v56, %v10675_v4  ;;  %v7386_v37 = vld [vmem:[%s10636_s2 + $0x344] ss:$24 sps:$4 sm:$0xff]  }
 0x1f1   : > { %v1792_v61 = vmul.f32 %v1768_v53, %v9170_v38  ;;  %v7361_v38 = vld [vmem:[%s10637_s3 + $0x98] sm:$0xff]   ;;  %v7373_v22 = vld [vmem:[%s10637_s3 + $0xb0] sm:$0xff]   ;;  %v9353_v28 = vpack.c.bf16 %v2435_v48, %v2434_v23  ;;  %v10679_v40 = vpack.c.bf16 %v10677_v12, %v10678_v51  ;;  %v7395_v2 = vld [vmem:[%s10636_s2 + $0x36c] ss:$24 sps:$4 sm:$0xff]  }
 0x1f2   : > { %6918 = vmatprep.mubr.bf16.mxu1 %v1801_v62  ;;  %v7389_v30 = vld [vmem:[%s10636_s2 + $0x33c] ss:$24 sps:$4 sm:$0xff]   ;;  %v7387_v1 = vld [vmem:[%s10636_s2 + $0x338] ss:$24 sps:$4 sm:$0xff]   ;;  %v7393_v10 = vld [vmem:[%s10636_s2 + $0x368] ss:$24 sps:$4 sm:$0xff]  }
 0x1f3   : > { %2305 = vmatmul.mubr.bf16.vlgmr.msra.gmra.mrb[64].mxu0 %v10662_v44  ;;  %6925 = vmatpush3.bf16.msra.mxu1 %v7353_v60  ;;  %v1804_v3 = vpack.c.bf16 %v1792_v61, %v1789_v9  ;;  %v7378_v60 = vld [vmem:[%s10636_s2 + $0x310] ss:$24 sps:$4 sm:$0xff]   ;;  %v7384_v54 = vld [vmem:[%s10636_s2 + $0x340] ss:$24 sps:$4 sm:$0xff]   ;;  %v7401_v5 = vld [vmem:[%s10636_s2 + $0x39c] ss:$24 sps:$4 sm:$0xff]  }
 0x1f4   : > { %2312 = vmatprep.mubr.bf16.mxu0 %v10663_v6  ;;  %2736 = vmatpush1.bf16.msra.mxu0 %v7346_v50  ;;  %v9382_v62 = vld [vmem:[%s8465_s29 + $0x10] sm:$0xff]  ;;  %v9386_v53 = vld [vmem:[%s8465_s29 + $0x18] sm:$0xff]  ;;  %v10681_v61 = vld [vmem:[#allocation10_spill] sm:$0xff] }
 0x1f5   : > { %2737 = vmatprep.subr.bf16.mxu0 %v7352_v15  ;;  %6926 = vmatprep.subr.bf16.mxu1 %v7357_v17  ;;  %v2436_v9 = vmul.f32 %v9382_v62, %v2412_v18  ;;  %v2437_v50 = vmul.f32 %v9386_v53, %v2416_v43  ;;  %v7392_v15 = vld [vmem:[%s10636_s2 + $0x374] ss:$24 sps:$4 sm:$0xff]   ;;  %v7390_v6 = vld [vmem:[%s10636_s2 + $0x370] ss:$24 sps:$4 sm:$0xff]   ;;  %v7408_v35 = vld [vmem:[%s10636_s2 + $0x400] ss:$24 sps:$4 sm:$0xff]  }
 0x1f6   : > { %6919 = vmatmul.mubr.bf16.gmra.mrb[52].mxu1 %v1804_v3  ;;  %v7399_v3 = vld [vmem:[%s10636_s2 + $0x398] ss:$24 sps:$4 sm:$0xff]   ;;  %v7416_v48 = vld [vmem:[%s10636_s2 + $0x434] ss:$24 sps:$4 sm:$0xff]   ;;  %v7434_v4 = vld [vmem:[%s10636_s2 + $0x4e4] ss:$24 sps:$4 sm:$0xff]  }
 0x1f7   : > { %6927 = vmatpush3.bf16.msra.mxu1 %v7357_v17  ;;  %6938 = vmatprep.mubr.bf16.mxu1 %v10664_v36  ;;  %v10680_v17 = vld [vmem:[#allocation13_spill] sm:$0xff]  ;;  %v9462_v32 = vld [vmem:[%s8465_s29 + $0x30] sm:$0xff] }
 0x1f8   : > { %2738 = vmatpush1.bf16.msra.mxu0 %v7350_v8  ;;  %6928 = vmatprep.subr.bf16.mxu1 %v7361_v38  ;;  %v10682_v44 = vpack.c.bf16 %v10680_v17, %v10681_v61  ;;  %v9402_v8 = vpack.c.bf16 %v2437_v50, %v2436_v9  ;;  %v7405_v36 = vld [vmem:[%s10636_s2 + $0x3c8] ss:$24 sps:$4 sm:$0xff]   ;;  %v7423_v58 = vld [vmem:[%s10636_s2 + $0x458] ss:$24 sps:$4 sm:$0xff]   ;;  %v7431_v18 = vld [vmem:[%s10636_s2 + $0x4b4] ss:$24 sps:$4 sm:$0xff]  }
 0x1f9   : > { %2739 = vmatprep.subr.bf16.mxu0 %v7356_v21  ;;  %v7407_v21 = vld [vmem:[%s10636_s2 + $0x3cc] ss:$24 sps:$4 sm:$0xff]   ;;  %v7414_v25 = vld [vmem:[%s10636_s2 + $0x430] ss:$24 sps:$4 sm:$0xff]  }
 0x1fa   : > { %v7429_v56 = vld [vmem:[%s10636_s2 + $0x4b0] ss:$24 sps:$4 sm:$0xff]   ;;  %v7440_v51 = vld [vmem:[%s10636_s2 + $0x544] ss:$24 sps:$4 sm:$0xff]  }
 0x1fb   : > { %2313 = vmatmul.mubr.bf16.gmra.mrb[68].mxu0 %v10665_v14  ;;  %6929 = vmatpush3.bf16.msra.mxu1 %v7361_v38  ;;  %v7398_v38 = vld [vmem:[%s10636_s2 + $0x3a4] ss:$24 sps:$4 sm:$0xff]   ;;  %v7435_v12 = vld [vmem:[%s10636_s2 + $0x510] ss:$24 sps:$4 sm:$0xff]  }
 0x1fc   : > { %2320 = vmatprep.mubr.bf16.mxu0 %v10666_v46  ;;  %2740 = vmatpush1.bf16.msra.mxu0 %v7354_v41  ;;  %v2424_v41 = vpop.permute.xlu1 %2423  ;;  %v7413_v14 = vld [vmem:[%s10636_s2 + $0x3fc] ss:$24 sps:$4 sm:$0xff]   ;;  %v9422_v46 = vld [vmem:[%s8465_s29 + $0x28] sm:$0xff] }
 0x1fd   : > { %2741 = vmatprep.subr.bf16.mxu0 %v7360_v13  ;;  %6930 = vmatprep.subr.bf16.mxu1 %v7365_v0  ;;  %v2420_v13 = vpop.permute.xlu0 %2419  ;;  %v7447_v50 = vld [vmem:[%s10636_s2 + $0x5d0] ss:$24 sps:$4 sm:$0xff]  }
 0x1ff   : > { %6931 = vmatpush3.bf16.msra.mxu1 %v7365_v0  ;;  %v7396_v0 = vld [vmem:[%s10636_s2 + $0x3a0] ss:$24 sps:$4 sm:$0xff]  }
 0x200   : > { %2742 = vmatpush1.bf16.msra.mxu0 %v7358_v11  ;;  %6932 = vmatprep.subr.bf16.mxu1 %v7369_v52  ;;  %v2439_v11 = vmul.f32 %v9422_v46, %v2424_v41  ;;  %v7461_v41 = vld [vmem:[%s10636_s2 + $0x51c] ss:$24 sps:$4 sm:$0xff]  }
 0x201   : > { %2743 = vmatprep.subr.bf16.mxu0 %v7364_v16 }
 0x203   : > { %2321 = vmatmul.mubr.bf16.gmra.mrb[72].mxu0 %v10667_v57  ;;  %6933 = vmatpush3.bf16.msra.mxu1 %v7369_v52  ;;  %v9426_v52 = vld [vmem:[%s8465_s29 + $0x20] sm:$0xff] }
 0x204   : > { %2328 = vmatprep.mubr.bf16.mxu0 %v10669_v31  ;;  %2744 = vmatpush1.bf16.msra.mxu0 %v7362_v29  ;;  %v2438_v16 = vmul.f32 %v9426_v52, %v2420_v13  ;;  %v7404_v29 = vld [vmem:[%s10636_s2 + $0x3d4] ss:$24 sps:$4 sm:$0xff]  }
 0x205   : > { %2745 = vmatprep.subr.bf16.mxu0 %v7368_v55  ;;  %6934 = vmatprep.subr.bf16.mxu1 %v7373_v22  ;;  %v7411_v55 = vld [vmem:[%s10636_s2 + $0x3f8] ss:$24 sps:$4 sm:$0xff]   ;;  %v7419_v31 = vld [vmem:[%s10636_s2 + $0x42c] ss:$24 sps:$4 sm:$0xff]  }
 0x206   : > { %v9438_v57 = vpack.c.bf16 %v2439_v11, %v2438_v16  ;;  %v7464_v11 = vld [vmem:[%s10636_s2 + $0x54c] ss:$24 sps:$4 sm:$0xff]  }
 0x207   : > { %6935 = vmatpush3.bf16.msra.mxu1 %v7373_v22  ;;  %v7402_v22 = vld [vmem:[%s10636_s2 + $0x3d0] ss:$24 sps:$4 sm:$0xff]  }
 0x208   : > { %2746 = vmatpush1.bf16.msra.mxu0 %v7366_v63  ;;  %6936 = vmatprep.subr.bf16.mxu1 %v7377_v59  ;;  %v2432_v63 = vpop.permute.xlu1 %2431 }
 0x209   : > { %2747 = vmatprep.subr.bf16.mxu0 %v7372_v42  ;;  %v7417_v42 = vld [vmem:[%s10636_s2 + $0x428] ss:$24 sps:$4 sm:$0xff]  }
 0x20b   : > { %2329 = vmatmul.mubr.bf16.gmra.mrb[76].mxu0 %v10672_v34  ;;  %6937 = vmatpush3.bf16.msra.mxu1 %v7377_v59  ;;  %v2428_v59 = vpop.permute.xlu0 %2427 }
 0x20c   : > { %2748 = vmatpush1.bf16.msra.mxu0 %v7370_v19  ;;  %2767 = vmatprep.mubr.bf16.mxu0 %v10673_v39  ;;  %v7425_v19 = vld [vmem:[%s10636_s2 + $0x45c] ss:$24 sps:$4 sm:$0xff]   ;;  %v2440_v23 = vmul.f32 %v9462_v32, %v2428_v59  ;;  %v7468_v59 = vld [vmem:[%s10636_s2 + $0x5a8] ss:$24 sps:$4 sm:$0xff]  }
 0x20d   : > { %2749 = vmatprep.subr.bf16.mxu0 %v7376_v27  ;;  %2808 = vmatprep.subr.bf16.mxu1 %v7383_v24  ;;  %v9458_v27 = vld [vmem:[%s8465_s29 + $0x38] sm:$0xff] }
 0x20e   : > { %6939 = vmatmul.mubr.bf16.vlgmr.msra.gmra.mrb[48].mxu1 %v10676_v26  ;;  %v2441_v24 = vmul.f32 %v9458_v27, %v2432_v63  ;;  %v7432_v26 = vld [vmem:[%s10636_s2 + $0x4e0] ss:$24 sps:$4 sm:$0xff]  }
 0x20f   : > { %6942 = vmatprep.mubr.bf16.mxu1 %v10679_v40  ;;  %2809 = vmatpush1.bf16.msra.mxu1 %v7381_v47  ;;  %v7422_v47 = vld [vmem:[%s10636_s2 + $0x464] ss:$24 sps:$4 sm:$0xff]   ;;  %v7438_v40 = vld [vmem:[%s10636_s2 + $0x540] ss:$24 sps:$4 sm:$0xff]  }
 0x210   : > { %2750 = vmatpush1.bf16.msra.mxu0 %v7374_v33  ;;  %2810 = vmatprep.subr.bf16.mxu1 %v7389_v30  ;;  %v2445_v34 = vpack.c.bf16 %v2441_v24, %v2440_v23  ;;  %v7420_v33 = vld [vmem:[%s10636_s2 + $0x460] ss:$24 sps:$4 sm:$0xff]   ;;  %v7428_v30 = vld [vmem:[%s10636_s2 + $0x484] ss:$24 sps:$4 sm:$0xff]   ;;  %v7476_v24 = vld [vmem:[%s10637_s3 + $0x1c8] sm:$0xff]  }
 0x211   : > { %2881 = vmatprep.subr.bf16.mxu0 %v7380_v49  ;;  %v7426_v49 = vld [vmem:[%s10636_s2 + $0x480] ss:$24 sps:$4 sm:$0xff]   ;;  %v7478_v23 = vld [vmem:[%s10637_s3 + $0x1d0] sm:$0xff]  }
 0x213   : > { %2768 = vmatmul.mubr.bf16.vlgmr.msra.gmra.mrb[80].mxu0 %v9353_v28  ;;  %2811 = vmatpush1.bf16.msra.mxu1 %v7387_v1  ;;  %v7443_v1 = vld [vmem:[%s10636_s2 + $0x574] ss:$24 sps:$4 sm:$0xff]  }
 0x214   : > { %2882 = vmatpush1.bf16.msra.mxu0 %v7378_v60  ;;  %2777 = vmatprep.mubr.bf16.mxu0 %v10673_v39  ;;  %v7441_v60 = vld [vmem:[%s10636_s2 + $0x570] ss:$24 sps:$4 sm:$0xff]  }
 0x215   : > { %2883 = vmatprep.subr.bf16.mxu0 %v7386_v37  ;;  %2812 = vmatprep.subr.bf16.mxu1 %v7395_v2  ;;  %v7446_v37 = vld [vmem:[%s10636_s2 + $0x5a4] ss:$24 sps:$4 sm:$0xff]   ;;  %v7444_v2 = vld [vmem:[%s10636_s2 + $0x5a0] ss:$24 sps:$4 sm:$0xff]  }
 0x216   : > { %6943 = vmatmul.mubr.bf16.gmra.mrb[52].mxu1 %v10682_v44  ;;  %v7455_v44 = vld [vmem:[%s10636_s2 + $0x4bc] ss:$24 sps:$4 sm:$0xff]  }
 0x217   : > { %2813 = vmatpush1.bf16.msra.mxu1 %v7393_v10  ;;  %2840 = vmatprep.mubr.bf16.mxu1 %v10673_v39 }
 0x218   : > { %2884 = vmatpush1.bf16.msra.mxu0 %v7384_v54  ;;  %2814 = vmatprep.subr.bf16.mxu1 %v7401_v5  ;;  %v7449_v54 = vld [vmem:[%s10636_s2 + $0x5d4] ss:$24 sps:$4 sm:$0xff]  }
 0x219   : > { %2885 = vmatprep.subr.bf16.mxu0 %v7392_v15  ;;  %v7452_v15 = vld [vmem:[%s10636_s2 + $0x48c] ss:$24 sps:$4 sm:$0xff]  }
 0x21b   : > { %2778 = vmatmul.mubr.bf16.gmra.mrb[84].mxu0 %v9402_v8  ;;  %2815 = vmatpush1.bf16.msra.mxu1 %v7399_v3 }
 0x21c   : > { %2886 = vmatpush1.bf16.msra.mxu0 %v7390_v6  ;;  %2787 = vmatprep.mubr.bf16.mxu0 %v10673_v39 }
 0x21d   : > { %2887 = vmatprep.subr.bf16.mxu0 %v7398_v38  ;;  %2816 = vmatprep.subr.bf16.mxu1 %v7407_v21  ;;  %v7458_v38 = vld [vmem:[%s10636_s2 + $0x4ec] ss:$24 sps:$4 sm:$0xff]  }
 0x21f   : > { %2817 = vmatpush1.bf16.msra.mxu1 %v7405_v36 }
 0x220   : > { %2888 = vmatpush1.bf16.msra.mxu0 %v7396_v0  ;;  %2818 = vmatprep.subr.bf16.mxu1 %v7413_v14  ;;  %v7459_v14 = vld [vmem:[%s10636_s2 + $0x518] ss:$24 sps:$4 sm:$0xff]  }
 0x221   : > { %2889 = vmatprep.subr.bf16.mxu0 %v7404_v29 }
 0x223   : > { %2788 = vmatmul.mubr.bf16.gmra.mrb[88].mxu0 %v9438_v57  ;;  %2819 = vmatpush1.bf16.msra.mxu1 %v7411_v55  ;;  %v7467_v55 = vld [vmem:[%s10636_s2 + $0x57c] ss:$24 sps:$4 sm:$0xff]  }
 0x224   : > { %2890 = vmatpush1.bf16.msra.mxu0 %v7402_v22  ;;  %2797 = vmatprep.mubr.bf16.mxu0 %v10673_v39 }
 0x225   : > { %2891 = vmatprep.subr.bf16.mxu0 %v7410_v45  ;;  %2820 = vmatprep.subr.bf16.mxu1 %v7419_v31  ;;  %v7465_v45 = vld [vmem:[%s10636_s2 + $0x578] ss:$24 sps:$4 sm:$0xff]   ;;  %v7470_v31 = vld [vmem:[%s10636_s2 + $0x5ac] ss:$24 sps:$4 sm:$0xff]  }
 0x227   : > { %2821 = vmatpush1.bf16.msra.mxu1 %v7417_v42  ;;  %v7473_v42 = vld [vmem:[%s10636_s2 + $0x5dc] ss:$24 sps:$4 sm:$0xff]  }
 0x228   : > { %2892 = vmatpush1.bf16.msra.mxu0 %v7408_v35  ;;  %2822 = vmatprep.subr.bf16.mxu1 %v7425_v19  ;;  %v7471_v35 = vld [vmem:[%s10636_s2 + $0x5d8] ss:$24 sps:$4 sm:$0xff]   ;;  %v7474_v19 = vld [vmem:[%s10637_s3 + $0x1c0] sm:$0xff]  }
 0x229   : > { %2893 = vmatprep.subr.bf16.mxu0 %v7416_v48  ;;  %v7479_v48 = vld [vmem:[%s10637_s3 + $0x190] sm:$0xff]  }
 0x22b   : > { %2798 = vmatmul.mubr.bf16.gmra.mrb[92].mxu0 %v2445_v34  ;;  %2823 = vmatpush1.bf16.msra.mxu1 %v7423_v58  ;;  %v7480_v58 = vld [vmem:[%s10637_s3 + $0x1d8] sm:$0xff]  }
 0x22c   : > { %2894 = vmatpush1.bf16.msra.mxu0 %v7414_v25  ;;  %2913 = vmatprep.mubr.bf16.mxu0 %v10673_v39  ;;  %v7481_v25 = vld [vmem:[%s10637_s3 + $0x198] sm:$0xff]  }
 0x22d   : > { %2895 = vmatprep.subr.bf16.mxu0 %v7422_v47  ;;  %6742 = vmatprep.subr.bf16.mxu1 %v7474_v19  ;;  %v7483_v47 = vld [vmem:[%s10637_s3 + $0x1a0] sm:$0xff]  }
 0x22e   : > { %2841 = vmatmul.mubr.bf16.vlgmr.msra.gmra.mrb[56].mxu1 %v9353_v28 }
 0x22f   : > { %2850 = vmatprep.mubr.bf16.mxu1 %v10673_v39 }
 0x230   : > { %2896 = vmatpush1.bf16.msra.mxu0 %v7420_v33  ;;  %v7484_v33 = vld [vmem:[%s10637_s3 + $0x1e8] sm:$0xff]  }
 0x231   : > { %3822 = vmatprep.subr.bf16.mxu0 %v7428_v30  ;;  %v7485_v30 = vld [vmem:[%s10637_s3 + $0x1a8] sm:$0xff]  }
 0x233   : > { %2914 = vmatmul.mubr.bf16.vlgmr.msra.gmra.mrb[96].mxu0 %v9353_v28  ;;  %v7437_v28 = vld [vmem:[%s10636_s2 + $0x514] ss:$24 sps:$4 sm:$0xff]  }
 0x234   : > { %2923 = vmatprep.mubr.bf16.mxu0 %v10673_v39  ;;  %3823 = vmatpush1.bf16.msra.mxu0 %v7426_v49  ;;  %v7486_v49 = vld [vmem:[%s10637_s3 + $0x1f0] sm:$0xff]  }
 0x235   : > { %3824 = vmatprep.subr.bf16.mxu0 %v7431_v18  ;;  %v7487_v18 = vld [vmem:[%s10637_s3 + $0x1b0] sm:$0xff]  }
 0x236   : > { %2851 = vmatmul.mubr.bf16.gmra.mrb[60].mxu1 %v9402_v8 }
 0x237   : > { %2860 = vmatprep.mubr.bf16.mxu1 %v10673_v39 }
 0x238   : > { %3825 = vmatpush1.bf16.msra.mxu0 %v7429_v56  ;;  %v7488_v56 = vld [vmem:[%s10637_s3 + $0x1f8] sm:$0xff]  }
 0x239   : > { %3826 = vmatprep.subr.bf16.mxu0 %v7434_v4  ;;  %v7489_v4 = vld [vmem:[%s10637_s3 + $0x1b8] sm:$0xff]  }
 0x23b   : > { %2924 = vmatmul.mubr.bf16.gmra.mrb[100].mxu0 %v9402_v8  ;;  %v7453_v8 = vld [vmem:[%s10636_s2 + $0x4b8] ss:$24 sps:$4 sm:$0xff]  }
 0x23c   : > { %2933 = vmatprep.mubr.bf16.mxu0 %v10673_v39  ;;  %3827 = vmatpush1.bf16.msra.mxu0 %v7432_v26  ;;  %v9672_v26 = vld [vmem:[%s10637_s3 + $0x200] sm:$0xff]  }
 0x23d   : > { %3828 = vmatprep.subr.bf16.mxu0 %v7437_v28 }
 0x23e   : > { %2861 = vmatmul.mubr.bf16.gmra.mrb[64].mxu1 %v9438_v57 }
 0x23f   : > { %2870 = vmatprep.mubr.bf16.mxu1 %v10673_v39 }
 0x240   : > { %3829 = vmatpush1.bf16.msra.mxu0 %v7435_v12 }
 0x241   : > { %3830 = vmatprep.subr.bf16.mxu0 %v7440_v51 }
 0x242   : > { %v3495_v10 = vpop.permute.xlu1 %3494 }
 0x243   : > { %2934 = vmatmul.mubr.bf16.gmra.mrb[104].mxu0 %v9438_v57  ;;  %v3491_v43 = vpop.permute.xlu0 %3490  ;;  %v3522_v5 = vmul.f32 %v9331_v7, %v3495_v10  ;;  %v7450_v7 = vld [vmem:[%s10636_s2 + $0x488] ss:$24 sps:$4 sm:$0xff]  }
 0x244   : > { %2943 = vmatprep.mubr.bf16.mxu0 %v10673_v39  ;;  %3831 = vmatpush1.bf16.msra.mxu0 %v7438_v40  ;;  %v3521_v9 = vmul.f32 %v9327_v20, %v3491_v43 }
 0x245   : > { %3832 = vmatprep.subr.bf16.mxu0 %v7443_v1 }
 0x246   : > { %2871 = vmatmul.mubr.bf16.gmra.mrb[68].mxu1 %v2445_v34  ;;  %v9547_v17 = vpack.c.bf16 %v3522_v5, %v3521_v9  ;;  %v3499_v20 = vpop.permute.xlu1 %3498 }
 0x247   : > { %v3503_v61 = vpop.permute.xlu0 %3502  ;;  %v3523_v3 = vmul.f32 %v9382_v62, %v3499_v20  ;;  %v7456_v62 = vld [vmem:[%s10636_s2 + $0x4e8] ss:$24 sps:$4 sm:$0xff]  }
 0x248   : > { %3833 = vmatpush1.bf16.msra.mxu0 %v7441_v60  ;;  %v3524_v6 = vmul.f32 %v9386_v53, %v3503_v61 }
 0x249   : > { %3834 = vmatprep.subr.bf16.mxu0 %v7446_v37 }
 0x24a   : > { %v9565_v21 = vpack.c.bf16 %v3524_v6, %v3523_v3 }
 0x24b   : > { %2944 = vmatmul.mubr.bf16.gmra.mrb[108].mxu0 %v2445_v34  ;;  %v3507_v53 = vpop.permute.xlu1 %3506  ;;  %v3511_v36 = vpop.permute.xlu0 %3510  ;;  %v7482_v34 = vld [vmem:[%s10637_s3 + $0x1e0] sm:$0xff]  }
 0x24c   : > { %3835 = vmatpush1.bf16.msra.mxu0 %v7444_v2  ;;  %3854 = vmatprep.mubr.bf16.mxu0 %v10673_v39  ;;  %v3525_v13 = vmul.f32 %v9426_v52, %v3507_v53  ;;  %v3526_v0 = vmul.f32 %v9422_v46, %v3511_v36  ;;  %v7462_v52 = vld [vmem:[%s10636_s2 + $0x548] ss:$24 sps:$4 sm:$0xff]  }
 0x24d   : > { %3836 = vmatprep.subr.bf16.mxu0 %v7449_v54 }
 0x24e   : > { %v9583_v16 = vpack.c.bf16 %v3526_v0, %v3525_v13 }
 0x24f   : > { %v3515_v46 = vpop.permute.xlu1 %3514 }
 0x250   : > { %3837 = vmatpush1.bf16.msra.mxu0 %v7447_v50  ;;  %v3519_v29 = vpop.permute.xlu0 %3518  ;;  %v3527_v22 = vmul.f32 %v9462_v32, %v3515_v46  ;;  %v7477_v32 = vld [vmem:[%s10637_s3 + $0x188] sm:$0xff]  }
 0x251   : > { %3895 = vmatprep.subr.bf16.mxu0 %v7452_v15  ;;  %v3528_v57 = vmul.f32 %v9458_v27, %v3519_v29  ;;  %v7475_v27 = vld [vmem:[%s10637_s3 + $0x180] sm:$0xff]  }
 0x252   : > { %6743 = vmatpush3.bf16.msra.mxu1 %v7475_v27 }
 0x253   : > { %3855 = vmatmul.mubr.bf16.vlgmr.msra.gmra.mrb[112].mxu0 %v9547_v17  ;;  %v9601_v63 = vpack.c.bf16 %v3528_v57, %v3527_v22  ;;  %6744 = vmatprep.subr.bf16.mxu1 %v7476_v24 }
 0x254   : > { %3896 = vmatpush1.bf16.msra.mxu0 %v7450_v7  ;;  %3864 = vmatprep.mubr.bf16.mxu0 %v10673_v39 }
 0x255   : > { %3897 = vmatprep.subr.bf16.mxu0 %v7455_v44 }
 0x256   : > { %6745 = vmatpush3.bf16.msra.mxu1 %v7477_v32 }
 0x257   : > { %6746 = vmatprep.subr.bf16.mxu1 %v7478_v23 }
 0x258   : > { %3898 = vmatpush1.bf16.msra.mxu0 %v7453_v8 }
 0x259   : > { %3899 = vmatprep.subr.bf16.mxu0 %v7458_v38 }
 0x25a   : > { %6747 = vmatpush3.bf16.msra.mxu1 %v7479_v48 }
 0x25b   : > { %3865 = vmatmul.mubr.bf16.gmra.mrb[116].mxu0 %v9565_v21  ;;  %6748 = vmatprep.subr.bf16.mxu1 %v7480_v58 }
 0x25c   : > { %3900 = vmatpush1.bf16.msra.mxu0 %v7456_v62  ;;  %3874 = vmatprep.mubr.bf16.mxu0 %v10673_v39 }
 0x25d   : > { %3901 = vmatprep.subr.bf16.mxu0 %v7461_v41 }
 0x25e   : > { %6749 = vmatpush3.bf16.msra.mxu1 %v7481_v25 }
 0x25f   : > { %6750 = vmatprep.subr.bf16.mxu1 %v7482_v34 }
 0x260   : > { %3902 = vmatpush1.bf16.msra.mxu0 %v7459_v14 }
 0x261   : > { %3903 = vmatprep.subr.bf16.mxu0 %v7464_v11 }
 0x262   : > { %6751 = vmatpush3.bf16.msra.mxu1 %v7483_v47 }
 0x263   : > { %3875 = vmatmul.mubr.bf16.gmra.mrb[120].mxu0 %v9583_v16  ;;  %6752 = vmatprep.subr.bf16.mxu1 %v7484_v33 }
 0x264   : > { %3904 = vmatpush1.bf16.msra.mxu0 %v7462_v52  ;;  %3884 = vmatprep.mubr.bf16.mxu0 %v10673_v39 }
 0x265   : > { %3905 = vmatprep.subr.bf16.mxu0 %v7467_v55 }
 0x266   : > { %6753 = vmatpush3.bf16.msra.mxu1 %v7485_v30 }
 0x267   : > { %6754 = vmatprep.subr.bf16.mxu1 %v7486_v49 }
 0x268   : > { %3906 = vmatpush1.bf16.msra.mxu0 %v7465_v45 }
 0x269   : > { %3907 = vmatprep.subr.bf16.mxu0 %v7470_v31 }
 0x26a   : > { %6755 = vmatpush3.bf16.msra.mxu1 %v7487_v18 }
 0x26b   : > { %3885 = vmatmul.mubr.bf16.gmra.mrb[124].mxu0 %v9601_v63  ;;  %6756 = vmatprep.subr.bf16.mxu1 %v7488_v56 }
 0x26c   : > { %3908 = vmatpush1.bf16.msra.mxu0 %v7468_v59  ;;  %3927 = vmatprep.mubr.bf16.mxu0 %v10673_v39 }
 0x26d   : > { %3909 = vmatprep.subr.bf16.mxu0 %v7473_v42 }
 0x26e   : > { %6757 = vmatpush3.bf16.msra.mxu1 %v7489_v4 }
 0x26f   : > { %6946 = vmatprep.subr.bf16.mxu1 %v9672_v26 }
 0x270   : > { %3910 = vmatpush1.bf16.msra.mxu0 %v7471_v35 }
 0x273   : > { %3928 = vmatmul.mubr.bf16.vlgmr.msra.gmra.mrb[128].mxu0 %v9547_v17 }
 0x274   : > { %3937 = vmatprep.mubr.bf16.mxu0 %v10673_v39 }
 0x27b   : > { %3938 = vmatmul.mubr.bf16.gmra.mrb[132].mxu0 %v9565_v21 }
 0x27c   : > { %3947 = vmatprep.mubr.bf16.mxu0 %v10673_v39 }
 0x283   : > { %3948 = vmatmul.mubr.bf16.gmra.mrb[136].mxu0 %v9583_v16 }
 0x284   : > { %3957 = vmatprep.mubr.bf16.mxu0 %v10673_v39 }
 0x28b   : > { %3958 = vmatmul.mubr.bf16.gmra.mrb[140].mxu0 %v9601_v63 }
 0x2a4   : > { %v6654_v28 = vpop.f32.mrb[48].mxu0 }
 0x2a5   : > { %v6655_v12 = vpop.f32.mrb[49].mxu0 }
 0x2a6   : > { %v6656_v51 = vadd.f32 %v6655_v12, %v6654_v28  ;;  %v6657_v40 = vpop.f32.mrb[50].mxu0  ;;  %v8223_v12 = vmov 4  }
 0x2a7   : > { %v6658_v1 = vpop.f32.mrb[51].mxu0  ;;  %7160 = vset.pattern.permute.xlu1 %v8223_v12  ;;  %7161 = vset.pattern.permute.xlu0 %v8223_v12 }
 0x2a8   : > { %v6659_v60 = vadd.f32 %v6658_v1, %v6657_v40  ;;  %v8139_v1 = vld [vmem:[%s8337_s5] sm:$0xff] }
 0x2a9   : > { %4577 = vperm.xlu1 %7160, %v8139_v1  }
 0x2ac   : > { %v6660_v37 = vpop.f32.mrb[52].mxu0 }
 0x2ad   : > { %v6661_v2 = vpop.f32.mrb[53].mxu0 }
 0x2ae   : > { %v6662_v10 = vadd.f32 %v6661_v2, %v6660_v37  ;;  %v6663_v43 = vpop.f32.mrb[54].mxu0 }
 0x2af   : > { %v6664_v54 = vpop.f32.mrb[55].mxu0 }
 0x2b0   : > { %v6665_v5 = vadd.f32 %v6664_v54, %v6663_v43  ;;  %v8141_v43 = vld [vmem:[%s8337_s5 + $0x10] sm:$0xff]  ;;  %v8142_v54 = vld [vmem:[%s8337_s5 + $0x20] sm:$0xff] }
 0x2b1   : > { %4585 = vperm.xlu1 %7160, %v8141_v43  }
 0x2b4   : > { %v6666_v9 = vpop.f32.mrb[56].mxu0 }
 0x2b5   : > { %v6667_v50 = vpop.f32.mrb[57].mxu0 }
 0x2b6   : > { %v6668_v15 = vadd.f32 %v6667_v50, %v6666_v9  ;;  %v6669_v7 = vpop.f32.mrb[58].mxu0 }
 0x2b7   : > { %v6670_v20 = vpop.f32.mrb[59].mxu0 }
 0x2b8   : > { %v6671_v61 = vadd.f32 %v6670_v20, %v6669_v7  ;;  %v8143_v20 = vld [vmem:[%s8337_s5 + $0x18] sm:$0xff] }
 0x2b9   : > { %4589 = vperm.xlu1 %7160, %v8143_v20  }
 0x2be   : > { %v6672_v44 = vpop.f32.mrb[60].mxu0 }
 0x2bf   : > { %v6673_v3 = vpop.f32.mrb[61].mxu0 }
 0x2c0   : > { %v6674_v6 = vadd.f32 %v6673_v3, %v6672_v44  ;;  %v6675_v8 = vpop.f32.mrb[62].mxu0 }
 0x2c1   : > { %v6676_v38 = vpop.f32.mrb[63].mxu0 }
 0x2c2   : > { %v6677_v62 = vadd.f32 %v6676_v38, %v6675_v8 }
 0x2c6   : > { %v6706_v53 = vpop.f32.mrb[64].mxu0 }
 0x2c7   : > { %v6707_v36 = vpop.f32.mrb[65].mxu0 }
 0x2c8   : > { %v6708_v41 = vadd.f32 %v6707_v36, %v6706_v53  ;;  %v6709_v13 = vpop.f32.mrb[66].mxu0  ;;  %v8145_v53 = vld [vmem:[%s8337_s5 + $0x28] sm:$0xff] }
 0x2c9   : > { %v6710_v0 = vpop.f32.mrb[67].mxu0  ;;  %4597 = vperm.xlu1 %7160, %v8145_v53  }
 0x2ca   : > { %v9675_v14 = vadd.f32 %v6708_v41, %v6656_v51  ;;  %v6711_v11 = vadd.f32 %v6710_v0, %v6709_v13 }
 0x2cc   : > { %v9677_v52 = vadd.f32 %v6711_v11, %v6659_v60  ;;  %v8140_v60 = vld [vmem:[%s8337_s5 + $0x8] sm:$0xff] }
 0x2cd   : > { %4581 = vperm.xlu0 %7161, %v8140_v60  }
 0x2ce   : > { %v6712_v46 = vpop.f32.mrb[68].mxu0 }
 0x2cf   : > { %v6713_v29 = vpop.f32.mrb[69].mxu0 }
 0x2d0   : > { %v6714_v55 = vadd.f32 %v6713_v29, %v6712_v46  ;;  %v6715_v22 = vpop.f32.mrb[70].mxu0 }
 0x2d1   : > { %v6716_v57 = vpop.f32.mrb[71].mxu0  ;;  %4593 = vperm.xlu0 %7161, %v8142_v54  }
 0x2d2   : > { %v9679_v45 = vadd.f32 %v6714_v55, %v6662_v10  ;;  %v6717_v31 = vadd.f32 %v6716_v57, %v6715_v22 }
 0x2d4   : > { %v9681_v59 = vadd.f32 %v6717_v31, %v6665_v5  ;;  %v8146_v31 = vld [vmem:[%s8337_s5 + $0x38] sm:$0xff] }
 0x2d5   : > { %4605 = vperm.xlu1 %7160, %v8146_v31  }
 0x2d6   : > { %v6718_v42 = vpop.f32.mrb[72].mxu0 }
 0x2d7   : > { %v6719_v35 = vpop.f32.mrb[73].mxu0 }
 0x2d8   : > { %v6720_v19 = vadd.f32 %v6719_v35, %v6718_v42  ;;  %v6721_v27 = vpop.f32.mrb[74].mxu0 }
 0x2d9   : > { %v6722_v24 = vpop.f32.mrb[75].mxu0 }
 0x2da   : > { %v9683_v32 = vadd.f32 %v6720_v19, %v6668_v15  ;;  %v6723_v23 = vadd.f32 %v6722_v24, %v6721_v27 }
 0x2dc   : > { %v9685_v48 = vadd.f32 %v6723_v23, %v6671_v61  ;;  %v8144_v61 = vld [vmem:[%s8337_s5 + $0x30] sm:$0xff] }
 0x2dd   : > { %4601 = vperm.xlu0 %7161, %v8144_v61  }
 0x2de   : > { %v6724_v58 = vpop.f32.mrb[76].mxu0 }
 0x2df   : > { %v6725_v25 = vpop.f32.mrb[77].mxu0 }
 0x2e0   : > { %v6726_v34 = vadd.f32 %v6725_v25, %v6724_v58  ;;  %v6727_v47 = vpop.f32.mrb[78].mxu0 }
 0x2e1   : > { %v6728_v33 = vpop.f32.mrb[79].mxu0 }
 0x2e2   : > { %v9687_v30 = vadd.f32 %v6726_v34, %v6674_v6  ;;  %v6729_v49 = vadd.f32 %v6728_v33, %v6727_v47 }
 0x2e4   : > { %v9689_v18 = vadd.f32 %v6729_v49, %v6677_v62 }
 0x2e6   : > { %v9691_v56 = vpop.f32.mrb[80].mxu0 }
 0x2e7   : > { %v6152_v4 = vmul.f32 -1.442695, %v9691_v56  ;;  %v9694_v28 = vpop.f32.mrb[81].mxu0 }
 0x2e8   : > { %v6153_v51 = vmul.f32 -1.442695, %v9694_v28  ;;  %v9697_v40 = vpop.f32.mrb[82].mxu0 }
 0x2e9   : > { %7834 = vpow2.f32 %v6152_v4  ;;  %v6155_v37 = vmul.f32 -1.442695, %v9697_v40  ;;  %v9702_v2 = vpop.f32.mrb[83].mxu0 }
 0x2ea   : > { %7836 = vpow2.f32 %v6153_v51  ;;  %v6156_v10 = vmul.f32 -1.442695, %v9702_v2 }
 0x2eb   : > { %7838 = vpow2.f32 %v6155_v37 }
 0x2ec   : > { %7840 = vpow2.f32 %v6156_v10 }
 0x2ee   : > { %v9707_v5 = vpop.f32.mrb[84].mxu0 }
 0x2ef   : > { %v6158_v9 = vmul.f32 -1.442695, %v9707_v5  ;;  %v9710_v50 = vpop.f32.mrb[85].mxu0 }
 0x2f0   : > { %v6159_v15 = vmul.f32 -1.442695, %v9710_v50  ;;  %v9713_v7 = vpop.f32.mrb[86].mxu0 }
 0x2f1   : > { %7842 = vpow2.f32 %v6158_v9  ;;  %v6161_v44 = vmul.f32 -1.442695, %v9713_v7  ;;  %v9718_v3 = vpop.f32.mrb[87].mxu0 }
 0x2f2   : > { %7844 = vpow2.f32 %v6159_v15  ;;  %v6162_v6 = vmul.f32 -1.442695, %v9718_v3 }
 0x2f3   : > { %v7835_v8 = vpop.eup %7834  ;;  %7846 = vpow2.f32 %v6161_v44 }
 0x2f4   : > { %v7837_v38 = vpop.eup %7836  ;;  %v3026_v62 = vadd.f32 1.0, %v7835_v8  ;;  %7848 = vpow2.f32 %v6162_v6 }
 0x2f5   : > { %v7839_v36 = vpop.eup %7838  ;;  %v3027_v41 = vadd.f32 1.0, %v7837_v38 }
 0x2f6   : > { %v7841_v13 = vpop.eup %7840  ;;  %7850 = vrcp.f32 %v3026_v62  ;;  %v3029_v0 = vadd.f32 1.0, %v7839_v36  ;;  %v9722_v11 = vpop.f32.mrb[88].mxu0 }
 0x2f7   : > { %7852 = vrcp.f32 %v3027_v41  ;;  %v3030_v46 = vadd.f32 1.0, %v7841_v13  ;;  %v6164_v29 = vmul.f32 -1.442695, %v9722_v11  ;;  %v9725_v55 = vpop.f32.mrb[89].mxu0 }
 0x2f8   : > { %7854 = vrcp.f32 %v3029_v0  ;;  %v6165_v22 = vmul.f32 -1.442695, %v9725_v55  ;;  %v9728_v57 = vpop.f32.mrb[90].mxu0 }
 0x2f9   : > { %7856 = vrcp.f32 %v3030_v46  ;;  %v6167_v42 = vmul.f32 -1.442695, %v9728_v57  ;;  %v9732_v35 = vpop.f32.mrb[91].mxu0 }
 0x2fa   : > { %7858 = vpow2.f32 %v6164_v29  ;;  %v6168_v19 = vmul.f32 -1.442695, %v9732_v35 }
 0x2fb   : > { %v7843_v27 = vpop.eup %7842  ;;  %7860 = vpow2.f32 %v6165_v22 }
 0x2fc   : > { %v7845_v24 = vpop.eup %7844  ;;  %v3032_v23 = vadd.f32 1.0, %v7843_v27  ;;  %7862 = vpow2.f32 %v6167_v42 }
 0x2fd   : > { %v7847_v58 = vpop.eup %7846  ;;  %v3033_v25 = vadd.f32 1.0, %v7845_v24  ;;  %7864 = vpow2.f32 %v6168_v19 }
 0x2fe   : > { %v7849_v34 = vpop.eup %7848  ;;  %7866 = vrcp.f32 %v3032_v23  ;;  %v3035_v47 = vadd.f32 1.0, %v7847_v58  ;;  %v9735_v33 = vpop.f32.mrb[92].mxu0 }
 0x2ff   : > { %7868 = vrcp.f32 %v3033_v25  ;;  %v3036_v49 = vadd.f32 1.0, %v7849_v34  ;;  %v6170_v4 = vmul.f32 -1.442695, %v9735_v33  ;;  %v9738_v12 = vpop.f32.mrb[93].mxu0 }
 0x300   : > { %v7851_v51 = vpop.eup %7850  ;;  %7870 = vrcp.f32 %v3035_v47  ;;  %v6171_v1 = vmul.f32 -1.442695, %v9738_v12  ;;  %v9741_v60 = vpop.f32.mrb[94].mxu0 }
 0x301   : > { %v7853_v37 = vpop.eup %7852  ;;  %v3098_v10 = vmul.f32 %v7851_v51, %v9691_v56  ;;  %7872 = vrcp.f32 %v3036_v49  ;;  %v6173_v43 = vmul.f32 -1.442695, %v9741_v60  ;;  %v9745_v54 = vpop.f32.mrb[95].mxu0 }
 0x302   : > { %v9747_v9 = vpop.f32.mrb[56].mxu1  ;;  %v7855_v15 = vpop.eup %7854  ;;  %7874 = vpow2.f32 %v6170_v4  ;;  %v6174_v20 = vmul.f32 -1.442695, %v9745_v54  ;;  %v3099_v41 = vmul.f32 %v7853_v37, %v9694_v28 }
 0x303   : > { %v6154_v61 = vmul.f32 -1.442695, %v9747_v9  ;;  %v2844_v44 = vpop.f32.mrb[57].mxu1  ;;  %v7857_v6 = vpop.eup %7856  ;;  %v3101_v8 = vmul.f32 %v7855_v15, %v9697_v40  ;;  %7876 = vpow2.f32 %v6171_v1 }
 0x304   : > { %v3122_v38 = vmul.f32 %v3098_v10, %v2844_v44  ;;  %v9752_v56 = vpop.f32.mrb[58].mxu1  ;;  %v7859_v62 = vpop.eup %7858  ;;  %7878 = vpow2.f32 %v6173_v43  ;;  %v3102_v29 = vmul.f32 %v7857_v6, %v9702_v2 }
 0x305   : > { %v2848_v53 = vpop.f32.mrb[59].mxu1  ;;  %v7861_v36 = vpop.eup %7860  ;;  %v3038_v13 = vadd.f32 1.0, %v7859_v62  ;;  %7880 = vpow2.f32 %v6174_v20  ;;  %v6157_v40 = vmul.f32 -1.442695, %v9752_v56 }
 0x306   : > { %v3125_v0 = vmul.f32 %v3101_v8, %v2848_v53  ;;  %v7863_v46 = vpop.eup %7862  ;;  %v3039_v22 = vadd.f32 1.0, %v7861_v36  ;;  %v2915_v31 = vpop.f32.mrb[96].mxu0  ;;  %7882 = vpow2.f32 %v6154_v61  ;;  %v7491_v8 = vld [vmem:[%s10637_s3 + $0x208] sm:$0xff]  }
 0x307   : > { %v7865_v42 = vpop.eup %7864  ;;  %7884 = vrcp.f32 %v3038_v13  ;;  %v3041_v19 = vadd.f32 1.0, %v7863_v46  ;;  %v3123_v27 = vmul.f32 %v3099_v41, %v2915_v31  ;;  %v9757_v24 = vpop.f32.mrb[97].mxu0 }
 0x308   : > { %v3146_v23 = vpack.c.bf16 %v3125_v0, %v3122_v38  ;;  %v7867_v58 = vpop.eup %7866  ;;  %7886 = vrcp.f32 %v3039_v22  ;;  %v3042_v28 = vadd.f32 1.0, %v7865_v42  ;;  %v2919_v25 = vpop.f32.mrb[98].mxu0 }
 0x309   : > { %v7869_v34 = vpop.eup %7868  ;;  %v3104_v47 = vmul.f32 %v7867_v58, %v9707_v5  ;;  %7888 = vrcp.f32 %v3041_v19  ;;  %v3126_v2 = vmul.f32 %v3102_v29, %v2919_v25  ;;  %v9760_v49 = vpop.f32.mrb[99].mxu0 }
 0x30a   : > { %v9762_v4 = vpop.f32.mrb[60].mxu1  ;;  %v7871_v51 = vpop.eup %7870  ;;  %7890 = vrcp.f32 %v3042_v28  ;;  %v3105_v62 = vmul.f32 %v7869_v34, %v9710_v50 }
 0x30b   : > { %v6160_v1 = vmul.f32 -1.442695, %v9762_v4  ;;  %v2854_v37 = vpop.f32.mrb[61].mxu1  ;;  %v7873_v10 = vpop.eup %7872  ;;  %v3107_v43 = vmul.f32 %v7871_v51, %v9713_v7  ;;  %v3147_v15 = vpack.c.bf16 %v3126_v2, %v3123_v27  ;;  %7892 = vpow2.f32 %v6157_v40 }
 0x30c   : > { %v3128_v20 = vmul.f32 %v3104_v47, %v2854_v37  ;;  %v9766_v61 = vpop.f32.mrb[62].mxu1  ;;  %v7875_v5 = vpop.eup %7874  ;;  %v3108_v41 = vmul.f32 %v7873_v10, %v9718_v3  ;;  %v7492_v3 = vld [vmem:[%s10637_s3 + $0x210] sm:$0xff]  }
 0x30d   : > { %7894 = vpow2.f32 %v6160_v1  ;;  %v6163_v44 = vmul.f32 -1.442695, %v9766_v61  ;;  %v2858_v6 = vpop.f32.mrb[63].mxu1  ;;  %v7877_v38 = vpop.eup %7876  ;;  %v3044_v53 = vadd.f32 1.0, %v7875_v5  ;;  %3383 = vmatprep.mubr.bf16.mxu1 %v3147_v15 }
 0x30e   : > { %v3131_v7 = vmul.f32 %v3107_v43, %v2858_v6  ;;  %v7879_v36 = vpop.eup %7878  ;;  %v3045_v13 = vadd.f32 1.0, %v7877_v38  ;;  %v2925_v0 = vpop.f32.mrb[100].mxu0  ;;  %3384 = vmatmul.mubr.bf16.vlgmr.msra.gmra.mrb[72].mxu1 %v3146_v23 }
 0x30f   : > { %7896 = vpow2.f32 %v6163_v44  ;;  %v7881_v46 = vpop.eup %7880  ;;  %v3047_v29 = vadd.f32 1.0, %v7879_v36  ;;  %v3129_v22 = vmul.f32 %v3105_v62, %v2925_v0  ;;  %v9774_v31 = vpop.f32.mrb[101].mxu0  ;;  %6947 = vmatpush3.bf16.msra.mxu1 %v9672_v26 }
 0x310   : > { %7898 = vrcp.f32 %v3044_v53  ;;  %v3149_v40 = vpack.c.bf16 %v3131_v7, %v3128_v20  ;;  %v7883_v50 = vpop.eup %7882  ;;  %v3048_v42 = vadd.f32 1.0, %v7881_v46  ;;  %v2929_v19 = vpop.f32.mrb[102].mxu0  ;;  %6948 = vmatprep.subr.bf16.mxu1 %v7491_v8 }
 0x311   : > { %7900 = vrcp.f32 %v3045_v13  ;;  %v7885_v27 = vpop.eup %7884  ;;  %v3028_v23 = vadd.f32 1.0, %v7883_v50  ;;  %v3132_v58 = vmul.f32 %v3108_v41, %v2929_v19  ;;  %v9780_v28 = vpop.f32.mrb[103].mxu0 }
 0x312   : > { %7902 = vrcp.f32 %v3047_v29  ;;  %v9782_v25 = vpop.f32.mrb[64].mxu1  ;;  %v7887_v34 = vpop.eup %7886  ;;  %v3110_v26 = vmul.f32 %v7885_v27, %v9722_v11  ;;  %v7493_v11 = vld [vmem:[%s10637_s3 + $0x218] sm:$0xff]  }
 0x313   : > { %7904 = vrcp.f32 %v3048_v42  ;;  %v6166_v47 = vmul.f32 -1.442695, %v9782_v25  ;;  %v2864_v2 = vpop.f32.mrb[65].mxu1  ;;  %v7889_v51 = vpop.eup %7888  ;;  %v3150_v1 = vpack.c.bf16 %v3132_v58, %v3129_v22  ;;  %6949 = vmatpush3.bf16.msra.mxu1 %v7491_v8  ;;  %v3111_v6 = vmul.f32 %v7887_v34, %v9725_v55  ;;  %v7494_v55 = vld [vmem:[%s10637_s3 + $0x220] sm:$0xff]  }
 0x314   : > { %7906 = vrcp.f32 %v3028_v23  ;;  %v9786_v37 = vpop.f32.mrb[66].mxu1  ;;  %v7891_v10 = vpop.eup %7890  ;;  %v3113_v43 = vmul.f32 %v7889_v51, %v9728_v57  ;;  %v3134_v15 = vmul.f32 %v3110_v26, %v2864_v2  ;;  %6950 = vmatprep.subr.bf16.mxu1 %v7492_v3 }
 0x315   : > { %7908 = vpow2.f32 %v6166_v47  ;;  %v6169_v20 = vmul.f32 -1.442695, %v9786_v37  ;;  %v2868_v5 = vpop.f32.mrb[67].mxu1  ;;  %v7893_v44 = vpop.eup %7892  ;;  %3391 = vmatprep.mubr.bf16.mxu1 %v3150_v1  ;;  %v3114_v53 = vmul.f32 %v7891_v10, %v9732_v35 }
 0x316   : > { %v3031_v38 = vadd.f32 1.0, %v7893_v44  ;;  %v2935_v62 = vpop.f32.mrb[104].mxu0  ;;  %3392 = vmatmul.mubr.bf16.gmra.mrb[76].mxu1 %v3149_v40  ;;  %v3137_v57 = vmul.f32 %v3113_v43, %v2868_v5 }
 0x317   : > { %v7895_v8 = vpop.eup %7894  ;;  %7910 = vpow2.f32 %v6169_v20  ;;  %v3135_v36 = vmul.f32 %v3111_v6, %v2935_v62  ;;  %v9795_v41 = vpop.f32.mrb[105].mxu0  ;;  %6951 = vmatpush3.bf16.msra.mxu1 %v7492_v3 }
 0x318   : > { %v3034_v7 = vadd.f32 1.0, %v7895_v8  ;;  %7912 = vrcp.f32 %v3031_v38  ;;  %v2939_v0 = vpop.f32.mrb[106].mxu0  ;;  %v3152_v46 = vpack.c.bf16 %v3137_v57, %v3134_v15  ;;  %6952 = vmatprep.subr.bf16.mxu1 %v7493_v11 }
 0x319   : > { %v7897_v13 = vpop.eup %7896  ;;  %v3138_v40 = vmul.f32 %v3114_v53, %v2939_v0  ;;  %v9800_v50 = vpop.f32.mrb[107].mxu0 }
 0x31a   : > { %v7899_v29 = vpop.eup %7898  ;;  %7914 = vrcp.f32 %v3034_v7  ;;  %v3037_v22 = vadd.f32 1.0, %v7897_v13  ;;  %v9802_v35 = vpop.f32.mrb[68].mxu1 }
 0x31b   : > { %v7901_v42 = vpop.eup %7900  ;;  %v3116_v19 = vmul.f32 %v7899_v29, %v9735_v33  ;;  %v6172_v3 = vmul.f32 -1.442695, %v9802_v35  ;;  %v2874_v27 = vpop.f32.mrb[69].mxu1  ;;  %v3153_v58 = vpack.c.bf16 %v3138_v40, %v3135_v36  ;;  %6953 = vmatpush3.bf16.msra.mxu1 %v7493_v11  ;;  %v7495_v33 = vld [vmem:[%s10637_s3 + $0x228] sm:$0xff]  }
 0x31c   : > { %v7903_v23 = vpop.eup %7902  ;;  %7916 = vrcp.f32 %v3037_v22  ;;  %v9806_v34 = vpop.f32.mrb[70].mxu1  ;;  %6954 = vmatprep.subr.bf16.mxu1 %v7494_v55  ;;  %v3117_v43 = vmul.f32 %v7901_v42, %v9738_v12 }
 0x31d   : > { %v7905_v26 = vpop.eup %7904  ;;  %v3119_v47 = vmul.f32 %v7903_v23, %v9741_v60  ;;  %7918 = vpow2.f32 %v6172_v3  ;;  %v3140_v2 = vmul.f32 %v3116_v19, %v2874_v27  ;;  %v6175_v51 = vmul.f32 -1.442695, %v9806_v34  ;;  %v2878_v1 = vpop.f32.mrb[71].mxu1  ;;  %3399 = vmatprep.mubr.bf16.mxu1 %v3153_v58 }
 0x31e   : > { %v7907_v10 = vpop.eup %7906  ;;  %v2945_v5 = vpop.f32.mrb[108].mxu0  ;;  %3400 = vmatmul.mubr.bf16.gmra.mrb[80].mxu1 %v3152_v46  ;;  %v3120_v11 = vmul.f32 %v7905_v26, %v9745_v54 }
 0x31f   : > { %v7909_v15 = vpop.eup %7908  ;;  %v3100_v20 = vmul.f32 %v7907_v10, %v9747_v9  ;;  %7920 = vpow2.f32 %v6175_v51  ;;  %v3143_v60 = vmul.f32 %v3119_v47, %v2878_v1  ;;  %v3141_v6 = vmul.f32 %v3117_v43, %v2945_v5  ;;  %v9816_v8 = vpop.f32.mrb[109].mxu0  ;;  %6955 = vmatpush3.bf16.msra.mxu1 %v7494_v55  ;;  %v7496_v9 = vld [vmem:[%s10637_s3 + $0x230] sm:$0xff]   ;;  %v7497_v55 = vld [vmem:[%s10637_s3 + $0x238] sm:$0xff]  }
 0x320   : > { %v3040_v44 = vadd.f32 1.0, %v7909_v15  ;;  %v2949_v57 = vpop.f32.mrb[110].mxu0  ;;  %6956 = vmatprep.subr.bf16.mxu1 %v7495_v33  ;;  %v7503_v10 = vld [vmem:[%s10636_s2 + $0x4c4] ss:$24 sps:$4 sm:$0xff]  }
 0x321   : > { %v7911_v38 = vpop.eup %7910  ;;  %v3124_v62 = vmul.f32 %v3100_v20, %v9757_v24  ;;  %v3155_v12 = vpack.c.bf16 %v3143_v60, %v3140_v2  ;;  %v3144_v7 = vmul.f32 %v3120_v11, %v2949_v57  ;;  %v9822_v36 = vpop.f32.mrb[111].mxu0  ;;  %v7501_v60 = vld [vmem:[%s10636_s2 + $0x4c0] ss:$24 sps:$4 sm:$0xff]  }
 0x322   : > { %7922 = vrcp.f32 %v3040_v44  ;;  %v3043_v53 = vadd.f32 1.0, %v7911_v38  ;;  %v7913_v54 = vpop.eup %7912 }
 0x323   : > { %v3103_v0 = vmul.f32 %v7913_v54, %v9752_v56  ;;  %v3156_v46 = vpack.c.bf16 %v3144_v7, %v3141_v6  ;;  %6957 = vmatpush3.bf16.msra.mxu1 %v7495_v33 }
 0x324   : > { %v7915_v13 = vpop.eup %7914  ;;  %7924 = vrcp.f32 %v3043_v53  ;;  %6958 = vmatprep.subr.bf16.mxu1 %v7496_v9  ;;  %v7509_v53 = vld [vmem:[%s10636_s2 + $0x524] ss:$24 sps:$4 sm:$0xff]  }
 0x325   : > { %v3106_v24 = vmul.f32 %v7915_v13, %v9762_v4  ;;  %v3127_v22 = vmul.f32 %v3103_v0, %v9760_v49  ;;  %3407 = vmatprep.mubr.bf16.mxu1 %v3156_v46  ;;  %v7500_v49 = vld [vmem:[%s10636_s2 + $0x494] ss:$24 sps:$4 sm:$0xff]  }
 0x326   : > { %v7917_v29 = vpop.eup %7916  ;;  %3408 = vmatmul.mubr.bf16.gmra.mrb[84].mxu1 %v3155_v12  ;;  %v9832_v56 = vpop.f32.mrb[112].mxu0  ;;  %v7504_v12 = vld [vmem:[%s10636_s2 + $0x4f0] ss:$24 sps:$4 sm:$0xff]  }
 0x327   : > { %v7919_v40 = vpop.eup %7918  ;;  %v3130_v42 = vmul.f32 %v3106_v24, %v9774_v31  ;;  %v3109_v19 = vmul.f32 %v7917_v29, %v9766_v61  ;;  %6959 = vmatpush3.bf16.msra.mxu1 %v7496_v9  ;;  %v3148_v4 = vpack.c.bf16 %v3127_v22, %v3124_v62  ;;  %v6344_v27 = vmul.f32 -1.442695, %v9832_v56  ;;  %v9835_v23 = vpop.f32.mrb[113].mxu0 }
 0x328   : > { %v3046_v3 = vadd.f32 1.0, %v7919_v40  ;;  %6960 = vmatprep.subr.bf16.mxu1 %v7497_v55  ;;  %v9841_v31 = vpop.f32.mrb[114].mxu0 }
 0x329   : > { %v7921_v58 = vpop.eup %7920  ;;  %v3133_v26 = vmul.f32 %v3109_v19, %v9780_v28  ;;  %6962 = vmatprep.mubr.bf16.mxu1 %v3148_v4  ;;  %v6347_v47 = vmul.f32 -1.442695, %v9841_v31  ;;  %v9844_v2 = vpop.f32.mrb[115].mxu0  ;;  %v7498_v28 = vld [vmem:[%s10636_s2 + $0x490] ss:$24 sps:$4 sm:$0xff]  }
 0x32a   : > { %7926 = vrcp.f32 %v3046_v3  ;;  %v3049_v61 = vadd.f32 1.0, %v7921_v58  ;;  %v7515_v4 = vld [vmem:[%s10636_s2 + $0x584] ss:$24 sps:$4 sm:$0xff]  }
 0x32b   : > { %v3151_v51 = vpack.c.bf16 %v3133_v26, %v3130_v42  ;;  %7928 = vpow2.f32 %v6344_v27  ;;  %6961 = vmatpush3.bf16.msra.mxu1 %v7497_v55 }
 0x32c   : > { %v7923_v1 = vpop.eup %7922  ;;  %7930 = vrcp.f32 %v3049_v61  ;;  %3968 = vmatprep.subr.bf16.mxu1 %v7500_v49 }
 0x32d   : > { %v3112_v33 = vmul.f32 %v7923_v1, %v9782_v25  ;;  %7932 = vpow2.f32 %v6347_v47  ;;  %v7513_v47 = vld [vmem:[%s10636_s2 + $0x580] ss:$24 sps:$4 sm:$0xff]   ;;  %v7518_v1 = vld [vmem:[%s10636_s2 + $0x5b4] ss:$24 sps:$4 sm:$0xff]  }
 0x32e   : > { %v7925_v43 = vpop.eup %7924  ;;  %6963 = vmatmul.mubr.bf16.vlgmr.msra.gmra.mrb[48].mxu1 %v3151_v51  ;;  %v9855_v5 = vpop.f32.mrb[116].mxu0 }
 0x32f   : > { %v3136_v15 = vmul.f32 %v3112_v33, %v9795_v41  ;;  %v3115_v20 = vmul.f32 %v7925_v43, %v9786_v37  ;;  %3969 = vmatpush1.bf16.msra.mxu1 %v7498_v28  ;;  %v6350_v25 = vmul.f32 -1.442695, %v9855_v5  ;;  %v9861_v11 = vpop.f32.mrb[117].mxu0  ;;  %v7506_v41 = vld [vmem:[%s10636_s2 + $0x4f4] ss:$24 sps:$4 sm:$0xff]  }
 0x330   : > { %3970 = vmatprep.subr.bf16.mxu1 %v7503_v10  ;;  %v9867_v37 = vpop.f32.mrb[118].mxu0 }
 0x331   : > { %v3139_v44 = vmul.f32 %v3115_v20, %v9800_v50  ;;  %7934 = vpow2.f32 %v6350_v25  ;;  %v6353_v6 = vmul.f32 -1.442695, %v9867_v37  ;;  %v9870_v38 = vpop.f32.mrb[119].mxu0 }
 0x333   : > { %v3154_v62 = vpack.c.bf16 %v3139_v44, %v3136_v15  ;;  %3971 = vmatpush1.bf16.msra.mxu1 %v7501_v60  ;;  %7936 = vpow2.f32 %v6353_v6  ;;  %v7516_v15 = vld [vmem:[%s10636_s2 + $0x5b0] ss:$24 sps:$4 sm:$0xff]   ;;  %v7521_v60 = vld [vmem:[%s10636_s2 + $0x5e4] ss:$24 sps:$4 sm:$0xff]  }
 0x334   : > { %v7927_v57 = vpop.eup %7926  ;;  %3972 = vmatprep.subr.bf16.mxu1 %v7506_v41 }
 0x335   : > { %v7929_v50 = vpop.eup %7928  ;;  %v3118_v9 = vmul.f32 %v7927_v57, %v9802_v35  ;;  %6966 = vmatprep.mubr.bf16.mxu1 %v3154_v62  ;;  %v7507_v35 = vld [vmem:[%s10636_s2 + $0x520] ss:$24 sps:$4 sm:$0xff]  }
 0x336   : > { %v7931_v7 = vpop.eup %7930  ;;  %v4113_v54 = vadd.f32 1.0, %v7929_v50  ;;  %v9881_v46 = vpop.f32.mrb[120].mxu0  ;;  %v7519_v62 = vld [vmem:[%s10636_s2 + $0x5e0] ss:$24 sps:$4 sm:$0xff]  }
 0x337   : > { %v3142_v13 = vmul.f32 %v3118_v9, %v9816_v8  ;;  %v3121_v0 = vmul.f32 %v7931_v7, %v9806_v34  ;;  %v7933_v24 = vpop.eup %7932  ;;  %3973 = vmatpush1.bf16.msra.mxu1 %v7504_v12  ;;  %v9886_v55 = vpop.f32.mrb[121].mxu0  ;;  %v7512_v8 = vld [vmem:[%s10636_s2 + $0x554] ss:$24 sps:$4 sm:$0xff]   ;;  %v6356_v34 = vmul.f32 -1.442695, %v9881_v46 }
 0x338   : > { %7938 = vrcp.f32 %v4113_v54  ;;  %3974 = vmatprep.subr.bf16.mxu1 %v7509_v53  ;;  %v4116_v22 = vadd.f32 1.0, %v7933_v24  ;;  %v9893_v40 = vpop.f32.mrb[122].mxu0 }
 0x339   : > { %v3145_v29 = vmul.f32 %v3121_v0, %v9822_v36  ;;  %v9895_v42 = vpop.f32.mrb[123].mxu0  ;;  %v7510_v36 = vld [vmem:[%s10636_s2 + $0x550] ss:$24 sps:$4 sm:$0xff]   ;;  %v6359_v49 = vmul.f32 -1.442695, %v9893_v40 }
 0x33a   : > { %7940 = vrcp.f32 %v4116_v22 }
 0x33b   : > { %v3157_v19 = vpack.c.bf16 %v3145_v29, %v3142_v13  ;;  %v7935_v3 = vpop.eup %7934  ;;  %3975 = vmatpush1.bf16.msra.mxu1 %v7507_v35  ;;  %7942 = vpow2.f32 %v6356_v34 }
 0x33c   : > { %3976 = vmatprep.subr.bf16.mxu1 %v7512_v8  ;;  %v4119_v27 = vadd.f32 1.0, %v7935_v3 }
 0x33d   : > { %6967 = vmatmul.mubr.bf16.gmra.mrb[52].mxu1 %v3157_v19  ;;  %v7937_v58 = vpop.eup %7936 }
 0x33e   : > { %4000 = vmatprep.mubr.bf16.mxu1 %v10673_v39  ;;  %v4122_v26 = vadd.f32 1.0, %v7937_v58  ;;  %v9905_v61 = vpop.f32.mrb[124].mxu0  ;;  %7944 = vrcp.f32 %v4119_v27 }
 0x33f   : > { %3977 = vmatpush1.bf16.msra.mxu1 %v7510_v36  ;;  %v9910_v51 = vpop.f32.mrb[125].mxu0  ;;  %v6362_v28 = vmul.f32 -1.442695, %v9905_v61 }
 0x340   : > { %3978 = vmatprep.subr.bf16.mxu1 %v7515_v4  ;;  %v9916_v33 = vpop.f32.mrb[126].mxu0  ;;  %7946 = vrcp.f32 %v4122_v26 }
 0x341   : > { %v9918_v43 = vpop.f32.mrb[127].mxu0  ;;  %7948 = vpow2.f32 %v6359_v49  ;;  %v6365_v7 = vmul.f32 -1.442695, %v9916_v33 }
 0x342   : > { %v7939_v10 = vpop.eup %7938  ;;  %7950 = vpow2.f32 %v6362_v28 }
 0x343   : > { %3979 = vmatpush1.bf16.msra.mxu1 %v7513_v47  ;;  %v4185_v25 = vmul.f32 %v7939_v10, %v9832_v56 }
 0x344   : > { %v7941_v20 = vpop.eup %7940  ;;  %3980 = vmatprep.subr.bf16.mxu1 %v7518_v1 }
 0x345   : > { %v7943_v44 = vpop.eup %7942  ;;  %v4188_v41 = vmul.f32 %v7941_v20, %v9841_v31 }
 0x346   : > { %v9928_v6 = vpop.f32.mrb[128].mxu0  ;;  %v4125_v57 = vadd.f32 1.0, %v7943_v44 }
 0x347   : > { %3981 = vmatpush1.bf16.msra.mxu1 %v7516_v15  ;;  %v3931_v12 = vpop.f32.mrb[129].mxu0 }
 0x348   : > { %3982 = vmatprep.subr.bf16.mxu1 %v7521_v60  ;;  %v9933_v50 = vmul.f32 %v4185_v25, %v3931_v12  ;;  %v9935_v9 = vpop.f32.mrb[130].mxu0  ;;  %v7945_v53 = vpop.eup %7944  ;;  %7952 = vrcp.f32 %v4125_v57 }
 0x349   : > { %v3935_v56 = vpop.f32.mrb[131].mxu0  ;;  %v4191_v0 = vmul.f32 %v7945_v53, %v9855_v5  ;;  %7954 = vpow2.f32 %v6365_v7  ;;  %v7523_v7 = vld [vmem:[%s10637_s3 + $0x240] sm:$0xff]  }
 0x34a   : > { %v9938_v31 = vmul.f32 %v4188_v41, %v3935_v56  ;;  %v7947_v54 = vpop.eup %7946  ;;  %v7522_v56 = vld [vmem:[%s10637_s3 + $0x280] sm:$0xff]  }
 0x34b   : > { %3983 = vmatpush1.bf16.msra.mxu1 %v7519_v62  ;;  %v7949_v13 = vpop.eup %7948  ;;  %v4194_v8 = vmul.f32 %v7947_v54, %v9867_v37  ;;  %6794 = vmatprep.subr.bf16.mxu0 %v7522_v56  ;;  %v7530_v54 = vld [vmem:[%s10637_s3 + $0x2c8] sm:$0xff]  }
 0x34c   : > { %v4233_v24 = vpack.c.bf16 %v9938_v31, %v9933_v50  ;;  %v4128_v35 = vadd.f32 1.0, %v7949_v13  ;;  %v7951_v29 = vpop.eup %7950  ;;  %6795 = vmatpush3.bf16.msra.mxu0 %v7523_v7  ;;  %v7525_v13 = vld [vmem:[%s10637_s3 + $0x248] sm:$0xff]   ;;  %v7554_v50 = vld [vmem:[%s10636_s2 + $0x664] ss:$24 sps:$4 sm:$0xff]  }
 0x34d   : > { %v4131_v34 = vadd.f32 1.0, %v7951_v29  ;;  %v7528_v29 = vld [vmem:[%s10637_s3 + $0x250] sm:$0xff]  }
 0x34e   : > { %4001 = vmatmul.mubr.bf16.vlgmr.msra.gmra.mrb[88].mxu1 %v9547_v17  ;;  %v9945_v22 = vpop.f32.mrb[132].mxu0  ;;  %7956 = vrcp.f32 %v4128_v35  ;;  %v7533_v35 = vld [vmem:[%s10637_s3 + $0x2d0] sm:$0xff]  }
 0x34f   : > { %4010 = vmatprep.mubr.bf16.mxu1 %v10673_v39  ;;  %v3941_v19 = vpop.f32.mrb[133].mxu0  ;;  %7958 = vrcp.f32 %v4131_v34  ;;  %v7536_v34 = vld [vmem:[%s10637_s3 + $0x2d8] sm:$0xff]  }
 0x350   : > { %v9948_v3 = vmul.f32 %v4191_v0, %v3941_v19  ;;  %v9950_v5 = vpop.f32.mrb[134].mxu0  ;;  %v7526_v0 = vld [vmem:[%s10637_s3 + $0x290] sm:$0xff]   ;;  %v7531_v19 = vld [vmem:[%s10637_s3 + $0x258] sm:$0xff]  }
 0x351   : > { %v3945_v36 = vpop.f32.mrb[135].mxu0 }
 0x352   : > { %v9952_v4 = vmul.f32 %v4194_v8, %v3945_v36  ;;  %v7953_v27 = vpop.eup %7952  ;;  %v7529_v8 = vld [vmem:[%s10637_s3 + $0x298] sm:$0xff]   ;;  %v7532_v36 = vld [vmem:[%s10637_s3 + $0x2a0] sm:$0xff]  }
 0x353   : > { %v4197_v17 = vmul.f32 %v7953_v27, %v9881_v46  ;;  %v7955_v49 = vpop.eup %7954  ;;  %v7539_v27 = vld [vmem:[%s10637_s3 + $0x2e0] sm:$0xff]  }
 0x354   : > { %v4236_v37 = vpack.c.bf16 %v9952_v4, %v9948_v3  ;;  %v4134_v20 = vadd.f32 1.0, %v7955_v49  ;;  %v7537_v49 = vld [vmem:[%s10637_s3 + $0x268] sm:$0xff]  }
 0x355   : > { %v7569_v4 = vld [vmem:[%s10636_s2 + $0x66c] ss:$24 sps:$4 sm:$0xff]  }
 0x356   : > { %4011 = vmatmul.mubr.bf16.gmra.mrb[92].mxu1 %v9565_v21  ;;  %v9958_v58 = vpop.f32.mrb[136].mxu0  ;;  %7960 = vrcp.f32 %v4134_v20  ;;  %v7543_v20 = vld [vmem:[%s10637_s3 + $0x278] sm:$0xff]  }
 0x357   : > { %4020 = vmatprep.mubr.bf16.mxu1 %v10673_v39  ;;  %v3951_v26 = vpop.f32.mrb[137].mxu0 }
 0x358   : > { %v9961_v47 = vmul.f32 %v4197_v17, %v3951_v26  ;;  %v9963_v1 = vpop.f32.mrb[138].mxu0  ;;  %v7957_v28 = vpop.eup %7956  ;;  %v7534_v17 = vld [vmem:[%s10637_s3 + $0x260] sm:$0xff]   ;;  %v7535_v26 = vld [vmem:[%s10637_s3 + $0x2a8] sm:$0xff]  }
 0x359   : > { %v3955_v10 = vpop.f32.mrb[139].mxu0  ;;  %v4200_v15 = vmul.f32 %v7957_v28, %v9893_v40  ;;  %v7959_v46 = vpop.eup %7958  ;;  %v7538_v28 = vld [vmem:[%s10637_s3 + $0x2b0] sm:$0xff]  }
 0x35a   : > { %v4203_v60 = vmul.f32 %v7959_v46, %v9905_v61  ;;  %v7542_v46 = vld [vmem:[%s10637_s3 + $0x2e8] sm:$0xff]  }
 0x35b   : > { %v9967_v25 = vmul.f32 %v4200_v15, %v3955_v10  ;;  %v7540_v10 = vld [vmem:[%s10637_s3 + $0x270] sm:$0xff]   ;;  %v7541_v15 = vld [vmem:[%s10637_s3 + $0x2b8] sm:$0xff]  }
 0x35d   : > { %v4239_v21 = vpack.c.bf16 %v9967_v25, %v9961_v47  ;;  %v7581_v25 = vld [vmem:[%s10636_s2 + $0x6cc] ss:$24 sps:$4 sm:$0xff]  }
 0x35e   : > { %4021 = vmatmul.mubr.bf16.gmra.mrb[96].mxu1 %v9583_v16  ;;  %v9972_v44 = vpop.f32.mrb[140].mxu0 }
 0x35f   : > { %4030 = vmatprep.mubr.bf16.mxu1 %v10673_v39  ;;  %v3961_v41 = vpop.f32.mrb[141].mxu0 }
 0x360   : > { %v9975_v62 = vmul.f32 %v4203_v60, %v3961_v41  ;;  %v9977_v40 = vpop.f32.mrb[142].mxu0  ;;  %v7961_v61 = vpop.eup %7960  ;;  %v7544_v60 = vld [vmem:[%s10637_s3 + $0x2f0] sm:$0xff]   ;;  %v7547_v41 = vld [vmem:[%s10636_s2 + $0x604] ss:$24 sps:$4 sm:$0xff]  }
 0x361   : > { %v4206_v57 = vmul.f32 %v7961_v61, %v9916_v33  ;;  %v3965_v12 = vpop.f32.mrb[143].mxu0  ;;  %v7527_v33 = vld [vmem:[%s10637_s3 + $0x2c0] sm:$0xff]   ;;  %v7548_v61 = vld [vmem:[%s10637_s3 + $0x2f8] sm:$0xff]  }
 0x362   : > { %6970 = vmatprep.subr.bf16.mxu1 %v7527_v33 }
 0x363   : > { %v9981_v16 = vmul.f32 %v4206_v57, %v3965_v12  ;;  %6971 = vmatpush3.bf16.msra.mxu1 %v7527_v33  ;;  %v7557_v57 = vld [vmem:[%s10636_s2 + $0x60c] ss:$24 sps:$4 sm:$0xff]  }
 0x364   : > { %6972 = vmatprep.subr.bf16.mxu1 %v7530_v54 }
 0x365   : > { %v4242_v53 = vpack.c.bf16 %v9981_v16, %v9975_v62  ;;  %v7593_v62 = vld [vmem:[%s10636_s2 + $0x614] ss:$24 sps:$4 sm:$0xff]  }
 0x366   : > { %4031 = vmatmul.mubr.bf16.gmra.mrb[100].mxu1 %v9601_v63  ;;  %v7524_v63 = vld [vmem:[%s10637_s3 + $0x288] sm:$0xff]  }
 0x367   : > { %6796 = vmatprep.subr.bf16.mxu0 %v7524_v63  ;;  %6973 = vmatpush3.bf16.msra.mxu1 %v7530_v54 }
 0x368   : > { %6797 = vmatpush3.bf16.msra.mxu0 %v7525_v13  ;;  %6974 = vmatprep.subr.bf16.mxu1 %v7533_v35 }
 0x369   : > { %6798 = vmatprep.subr.bf16.mxu0 %v7526_v0 }
 0x36b   : > { %6975 = vmatpush3.bf16.msra.mxu1 %v7533_v35 }
 0x36c   : > { %6799 = vmatpush3.bf16.msra.mxu0 %v7528_v29  ;;  %6976 = vmatprep.subr.bf16.mxu1 %v7536_v34 }
 0x36d   : > { %6800 = vmatprep.subr.bf16.mxu0 %v7529_v8 }
 0x36f   : > { %6977 = vmatpush3.bf16.msra.mxu1 %v7536_v34 }
 0x370   : > { %6801 = vmatpush3.bf16.msra.mxu0 %v7531_v19  ;;  %6978 = vmatprep.subr.bf16.mxu1 %v7539_v27 }
 0x371   : > { %6802 = vmatprep.subr.bf16.mxu0 %v7532_v36 }
 0x373   : > { %6979 = vmatpush3.bf16.msra.mxu1 %v7539_v27 }
 0x374   : > { %6803 = vmatpush3.bf16.msra.mxu0 %v7534_v17  ;;  %6980 = vmatprep.subr.bf16.mxu1 %v7542_v46 }
 0x375   : > { %6804 = vmatprep.subr.bf16.mxu0 %v7535_v26 }
 0x377   : > { %6981 = vmatpush3.bf16.msra.mxu1 %v7542_v46 }
 0x378   : > { %6805 = vmatpush3.bf16.msra.mxu0 %v7537_v49  ;;  %6982 = vmatprep.subr.bf16.mxu1 %v7544_v60 }
 0x379   : > { %6806 = vmatprep.subr.bf16.mxu0 %v7538_v28 }
 0x37b   : > { %6983 = vmatpush3.bf16.msra.mxu1 %v7544_v60 }
 0x37c   : > { %6807 = vmatpush3.bf16.msra.mxu0 %v7540_v10  ;;  %6984 = vmatprep.subr.bf16.mxu1 %v7548_v61 }
 0x37d   : > { %6808 = vmatprep.subr.bf16.mxu0 %v7541_v15 }
 0x37f   : > { %6985 = vmatpush3.bf16.msra.mxu1 %v7548_v61 }
 0x380   : > { %6809 = vmatpush3.bf16.msra.mxu0 %v7543_v20  ;;  %4982 = vmatprep.subr.bf16.mxu1 %v7557_v57 }
 0x381   : > { %4909 = vmatprep.subr.bf16.mxu0 %v7547_v41  ;;  %v6348_v41 = vmul.f32 -1.442695, %v9844_v2 }
 0x3e1   : > { %v6758_v12 = vpop.f32.mrb[72].mxu1 }
 0x3e2   : > { %v6759_v56 = vpop.f32.mrb[73].mxu1 }
 0x3e3   : > { %v6760_v7 = vadd.f32 %v6759_v56, %v6758_v12  ;;  %v6761_v63 = vpop.f32.mrb[74].mxu1 }
 0x3e4   : > { %v6762_v33 = vpop.f32.mrb[75].mxu1 }
 0x3e5   : > { %v10064_v54 = vadd.f32 %v9675_v14, %v6760_v7  ;;  %v6763_v13 = vadd.f32 %v6762_v33, %v6761_v63  ;;  %v6349_v7 = vmul.f32 -1.442695, %v9935_v9  ;;  %v6351_v63 = vmul.f32 -1.442695, %v9861_v11 }
 0x3e6   : > { %v6354_v33 = vmul.f32 -1.442695, %v9870_v38 }
 0x3e7   : > { %v10067_v0 = vadd.f32 %v9677_v52, %v6763_v13 }
 0x3e9   : > { %v6764_v35 = vpop.f32.mrb[76].mxu1 }
 0x3ea   : > { %v6765_v29 = vpop.f32.mrb[77].mxu1 }
 0x3eb   : > { %v6766_v8 = vadd.f32 %v6765_v29, %v6764_v35  ;;  %v6767_v34 = vpop.f32.mrb[78].mxu1  ;;  %v6355_v29 = vmul.f32 -1.442695, %v9950_v5 }
 0x3ec   : > { %v6768_v19 = vpop.f32.mrb[79].mxu1 }
 0x3ed   : > { %v10070_v36 = vadd.f32 %v9679_v45, %v6766_v8  ;;  %v6769_v27 = vadd.f32 %v6768_v19, %v6767_v34  ;;  %v6345_v45 = vmul.f32 -1.442695, %v9835_v23  ;;  %v6357_v19 = vmul.f32 -1.442695, %v9886_v55 }
 0x3ef   : > { %v10073_v17 = vadd.f32 %v9681_v59, %v6769_v27  ;;  %7962 = vpow2.f32 %v6345_v45  ;;  %v6360_v27 = vmul.f32 -1.442695, %v9895_v42 }
 0x3f0   : > { %7964 = vpow2.f32 %v6348_v41 }
 0x3f1   : > { %v6770_v26 = vpop.f32.mrb[80].mxu1 }
 0x3f2   : > { %v6771_v49 = vpop.f32.mrb[81].mxu1 }
 0x3f3   : > { %v6772_v14 = vadd.f32 %v6771_v49, %v6770_v26  ;;  %v6773_v28 = vpop.f32.mrb[82].mxu1  ;;  %v6358_v49 = vmul.f32 -1.442695, %v9958_v58 }
 0x3f4   : > { %v6774_v10 = vpop.f32.mrb[83].mxu1 }
 0x3f5   : > { %v10076_v52 = vadd.f32 %v9683_v32, %v6772_v14  ;;  %v6775_v15 = vadd.f32 %v6774_v10, %v6773_v28  ;;  %v6346_v32 = vmul.f32 -1.442695, %v9928_v6 }
 0x3f7   : > { %v10079_v46 = vadd.f32 %v9685_v48, %v6775_v15  ;;  %7966 = vpow2.f32 %v6346_v32  ;;  %v6361_v15 = vmul.f32 -1.442695, %v9963_v1 }
 0x3f8   : > { %7968 = vpow2.f32 %v6349_v7 }
 0x3f9   : > { %v6776_v20 = vpop.f32.mrb[84].mxu1  ;;  %7970 = vpow2.f32 %v6351_v63  ;;  %v7963_v13 = vpop.eup %7962  ;;  %v6367_v63 = vmul.f32 -1.442695, %v9977_v40 }
 0x3fa   : > { %v6777_v60 = vpop.f32.mrb[85].mxu1  ;;  %7972 = vpow2.f32 %v6354_v33  ;;  %v7965_v35 = vpop.eup %7964  ;;  %v4114_v8 = vadd.f32 1.0, %v7963_v13 }
 0x3fb   : > { %v6778_v59 = vadd.f32 %v6777_v60, %v6776_v20  ;;  %v6779_v61 = vpop.f32.mrb[86].mxu1 }
 0x3fc   : > { %v6780_v57 = vpop.f32.mrb[87].mxu1 }
 0x3fd   : > { %v10084_v12 = vadd.f32 %v9687_v30, %v6778_v59  ;;  %v6781_v56 = vadd.f32 %v6780_v57, %v6779_v61  ;;  %v6352_v30 = vmul.f32 -1.442695, %v9945_v22  ;;  %v6363_v59 = vmul.f32 -1.442695, %v9910_v51 }
 0x3fe   : > { %v6366_v61 = vmul.f32 -1.442695, %v9918_v43 }
 0x3ff   : > { %v10088_v48 = vadd.f32 %v9689_v18, %v6781_v56  ;;  %7974 = vpow2.f32 %v6352_v30  ;;  %v4117_v18 = vadd.f32 1.0, %v7965_v35  ;;  %v6364_v56 = vmul.f32 -1.442695, %v9972_v44 }
 0x400   : > { %7976 = vpow2.f32 %v6355_v29 }
 0x401   : > { %v7967_v34 = vpop.eup %7966  ;;  %7978 = vrcp.f32 %v4114_v8 }
 0x402   : > { %v7969_v26 = vpop.eup %7968  ;;  %7980 = vrcp.f32 %v4117_v18  ;;  %v4115_v28 = vadd.f32 1.0, %v7967_v34 }
 0x403   : > { %v7971_v14 = vpop.eup %7970  ;;  %7982 = vpow2.f32 %v6357_v19  ;;  %v4118_v20 = vadd.f32 1.0, %v7969_v26 }
 0x404   : > { %v7973_v10 = vpop.eup %7972  ;;  %7984 = vpow2.f32 %v6360_v27  ;;  %v4120_v45 = vadd.f32 1.0, %v7971_v14 }
 0x405   : > { %7986 = vpow2.f32 %v6358_v49  ;;  %v4123_v60 = vadd.f32 1.0, %v7973_v10 }
 0x406   : > { %7988 = vrcp.f32 %v4115_v28 }
 0x407   : > { %7990 = vpow2.f32 %v6361_v15 }
 0x408   : > { %7992 = vrcp.f32 %v4118_v20 }
 0x409   : > { %v7975_v41 = vpop.eup %7974  ;;  %7994 = vrcp.f32 %v4120_v45 }
 0x40a   : > { %v7977_v57 = vpop.eup %7976  ;;  %7996 = vrcp.f32 %v4123_v60  ;;  %v4121_v32 = vadd.f32 1.0, %v7975_v41 }
 0x40b   : > { %v7979_v7 = vpop.eup %7978  ;;  %7998 = vpow2.f32 %v6363_v59  ;;  %v4124_v30 = vadd.f32 1.0, %v7977_v57 }
 0x40c   : > { %v7981_v33 = vpop.eup %7980  ;;  %8000 = vpow2.f32 %v6366_v61  ;;  %v4186_v27 = vmul.f32 %v7979_v7, %v9835_v23 }
 0x40d   : > { %v7983_v13 = vpop.eup %7982  ;;  %8002 = vpow2.f32 %v6364_v56  ;;  %v4189_v20 = vmul.f32 %v7981_v33, %v9844_v2  ;;  %v7545_v2 = vld [vmem:[%s10636_s2 + $0x600] ss:$24 sps:$4 sm:$0xff]  }
 0x40e   : > { %v7985_v35 = vpop.eup %7984  ;;  %8004 = vrcp.f32 %v4121_v32  ;;  %v4126_v34 = vadd.f32 1.0, %v7983_v13 }
 0x40f   : > { %v7987_v29 = vpop.eup %7986  ;;  %8006 = vpow2.f32 %v6367_v63  ;;  %v4129_v14 = vadd.f32 1.0, %v7985_v35 }
 0x410   : > { %v7989_v8 = vpop.eup %7988  ;;  %8008 = vrcp.f32 %v4124_v30  ;;  %v4127_v26 = vadd.f32 1.0, %v7987_v29 }
 0x411   : > { %v7991_v18 = vpop.eup %7990  ;;  %v4187_v28 = vmul.f32 %v7989_v8, %v9928_v6  ;;  %8010 = vrcp.f32 %v4126_v34 }
 0x412   : > { %v7993_v19 = vpop.eup %7992  ;;  %v4130_v45 = vadd.f32 1.0, %v7991_v18  ;;  %8012 = vrcp.f32 %v4127_v26 }
 0x413   : > { %v7995_v49 = vpop.eup %7994  ;;  %v4190_v61 = vmul.f32 %v7993_v19, %v9935_v9  ;;  %8014 = vrcp.f32 %v4129_v14  ;;  %v7551_v9 = vld [vmem:[%s10636_s2 + $0x634] ss:$24 sps:$4 sm:$0xff]  }
 0x414   : > { %v7997_v15 = vpop.eup %7996  ;;  %8016 = vrcp.f32 %v4130_v45  ;;  %v4192_v18 = vmul.f32 %v7995_v49, %v9861_v11  ;;  %v7549_v11 = vld [vmem:[%s10636_s2 + $0x630] ss:$24 sps:$4 sm:$0xff]  }
 0x415   : > { %v7999_v59 = vpop.eup %7998  ;;  %v4195_v14 = vmul.f32 %v7997_v15, %v9870_v38 }
 0x416   : > { %v8001_v32 = vpop.eup %8000  ;;  %v4132_v35 = vadd.f32 1.0, %v7999_v59  ;;  %v7555_v59 = vld [vmem:[%s10636_s2 + $0x608] ss:$24 sps:$4 sm:$0xff]  }
 0x417   : > { %v8003_v63 = vpop.eup %8002  ;;  %v4135_v19 = vadd.f32 1.0, %v8001_v32  ;;  %v7563_v32 = vld [vmem:[%s10636_s2 + $0x63c] ss:$24 sps:$4 sm:$0xff]  }
 0x418   : > { %v8005_v30 = vpop.eup %8004  ;;  %v4133_v34 = vadd.f32 1.0, %v8003_v63  ;;  %8018 = vrcp.f32 %v4132_v35 }
 0x419   : > { %v8007_v33 = vpop.eup %8006 }
 0x41a   : > { %v8009_v8 = vpop.eup %8008  ;;  %8020 = vrcp.f32 %v4133_v34 }
 0x41b   : > { %v4196_v49 = vmul.f32 %v8009_v8, %v9950_v5  ;;  %8022 = vrcp.f32 %v4135_v19  ;;  %v7552_v5 = vld [vmem:[%s10636_s2 + $0x660] ss:$24 sps:$4 sm:$0xff]  }
 0x41c   : > { %v7567_v19 = vld [vmem:[%s10636_s2 + $0x668] ss:$24 sps:$4 sm:$0xff]  }
 0x421   : > { %v4002_v10 = vpop.f32.mrb[88].mxu1 }
 0x422   : > { %v4210_v60 = vmul.f32 %v4186_v27, %v4002_v10  ;;  %v4004_v41 = vpop.f32.mrb[89].mxu1  ;;  %v4193_v27 = vmul.f32 %v8005_v30, %v9945_v22 }
 0x423   : > { %v4211_v57 = vmul.f32 %v4187_v28, %v4004_v41  ;;  %v4006_v56 = vpop.f32.mrb[90].mxu1  ;;  %v4136_v28 = vadd.f32 1.0, %v8007_v33  ;;  %v7558_v33 = vld [vmem:[%s10636_s2 + $0x690] ss:$24 sps:$4 sm:$0xff]  }
 0x424   : > { %v4213_v23 = vmul.f32 %v4189_v20, %v4006_v56  ;;  %v4008_v7 = vpop.f32.mrb[91].mxu1  ;;  %v7560_v56 = vld [vmem:[%s10636_s2 + $0x694] ss:$24 sps:$4 sm:$0xff]  }
 0x425   : > { %v4214_v6 = vmul.f32 %v4190_v61, %v4008_v7  ;;  %8024 = vrcp.f32 %v4136_v28  ;;  %v7575_v28 = vld [vmem:[%s10636_s2 + $0x69c] ss:$24 sps:$4 sm:$0xff]  }
 0x426   : > { %v4234_v13 = vpack.c.bf16 %v4213_v23, %v4210_v60 }
 0x427   : > { %v4235_v29 = vpack.c.bf16 %v4214_v6, %v4211_v57 }
 0x428   : > { %4470 = vmatprep.mubr.bf16.mxu0 %v4234_v13 }
 0x429   : > { %v4012_v26 = vpop.f32.mrb[92].mxu1  ;;  %4471 = vmatmul.mubr.bf16.vlgmr.msra.gmra.mrb[144].mxu0 %v4233_v24  ;;  %6986 = vmatprep.mubr.bf16.mxu1 %v4235_v29  ;;  %v8011_v24 = vpop.eup %8010 }
 0x42a   : > { %v4216_v10 = vmul.f32 %v4192_v18, %v4012_v26  ;;  %4910 = vmatpush1.bf16.msra.mxu0 %v7545_v2  ;;  %v4014_v20 = vpop.f32.mrb[93].mxu1  ;;  %v8013_v60 = vpop.eup %8012  ;;  %v4198_v7 = vmul.f32 %v8011_v24, %v9886_v55  ;;  %v7561_v55 = vld [vmem:[%s10636_s2 + $0x638] ss:$24 sps:$4 sm:$0xff]  }
 0x42b   : > { %v4217_v22 = vmul.f32 %v4193_v27, %v4014_v20  ;;  %v4016_v45 = vpop.f32.mrb[94].mxu1  ;;  %4911 = vmatprep.subr.bf16.mxu0 %v7551_v9  ;;  %v8015_v61 = vpop.eup %8014  ;;  %v4199_v63 = vmul.f32 %v8013_v60, %v9958_v58 }
 0x42c   : > { %v4219_v38 = vmul.f32 %v4195_v14, %v4016_v45  ;;  %v4018_v31 = vpop.f32.mrb[95].mxu1  ;;  %v8017_v23 = vpop.eup %8016  ;;  %v4201_v30 = vmul.f32 %v8015_v61, %v9895_v42  ;;  %v7566_v42 = vld [vmem:[%s10636_s2 + $0x6c4] ss:$24 sps:$4 sm:$0xff]   ;;  %v7572_v14 = vld [vmem:[%s10636_s2 + $0x6f4] ss:$24 sps:$4 sm:$0xff]  }
 0x42d   : > { %v4220_v15 = vmul.f32 %v4196_v49, %v4018_v31  ;;  %v4202_v58 = vmul.f32 %v8017_v23, %v9963_v1  ;;  %v8019_v9 = vpop.eup %8018  ;;  %v7564_v1 = vld [vmem:[%s10636_s2 + $0x6c0] ss:$24 sps:$4 sm:$0xff]   ;;  %v4578_v60 = vpop.permute.xlu1 %4577  ;;  %v7584_v61 = vld [vmem:[%s10636_s2 + $0x754] ss:$24 sps:$4 sm:$0xff]  }
 0x42e   : > { %v4237_v41 = vpack.c.bf16 %v4219_v38, %v4216_v10  ;;  %4912 = vmatpush1.bf16.msra.mxu0 %v7549_v11  ;;  %v8021_v18 = vpop.eup %8020  ;;  %v4204_v20 = vmul.f32 %v8019_v9, %v9910_v51  ;;  %v7570_v38 = vld [vmem:[%s10636_s2 + $0x6f0] ss:$24 sps:$4 sm:$0xff]  }
 0x42f   : > { %v4238_v57 = vpack.c.bf16 %v4220_v15, %v4217_v22  ;;  %4913 = vmatprep.subr.bf16.mxu0 %v7554_v50  ;;  %v8023_v27 = vpop.eup %8022  ;;  %v4205_v11 = vmul.f32 %v8021_v18, %v9972_v44  ;;  %v7573_v51 = vld [vmem:[%s10636_s2 + $0x698] ss:$24 sps:$4 sm:$0xff]  }
 0x430   : > { %4478 = vmatprep.mubr.bf16.mxu0 %v4237_v41  ;;  %v8025_v10 = vpop.eup %8024  ;;  %v4207_v22 = vmul.f32 %v8023_v27, %v9918_v43  ;;  %v7578_v43 = vld [vmem:[%s10636_s2 + $0x724] ss:$24 sps:$4 sm:$0xff]   ;;  %v7600_v18 = vld [vmem:[%s10636_s2 + $0x670] ss:$24 sps:$4 sm:$0xff]  }
 0x431   : > { %v4022_v6 = vpop.f32.mrb[96].mxu1  ;;  %4479 = vmatmul.mubr.bf16.gmra.mrb[148].mxu0 %v4236_v37  ;;  %6987 = vmatmul.mubr.bf16.vlgmr.msra.gmra.mrb[48].mxu1 %v4238_v57  ;;  %v4208_v44 = vmul.f32 %v8025_v10, %v9977_v40  ;;  %v7576_v40 = vld [vmem:[%s10636_s2 + $0x720] ss:$24 sps:$4 sm:$0xff]   ;;  %v7587_v57 = vld [vmem:[%s10636_s2 + $0x6fc] ss:$24 sps:$4 sm:$0xff]   ;;  %v4586_v16 = vpop.permute.xlu1 %4585 }
 0x432   : > { %v4222_v13 = vmul.f32 %v4198_v7, %v4022_v6  ;;  %4914 = vmatpush1.bf16.msra.mxu0 %v7552_v5  ;;  %4983 = vmatpush1.bf16.msra.mxu1 %v7555_v59  ;;  %v4024_v2 = vpop.f32.mrb[97].mxu1  ;;  %v7579_v5 = vld [vmem:[%s10636_s2 + $0x6c8] ss:$24 sps:$4 sm:$0xff]  }
 0x433   : > { %v4223_v35 = vmul.f32 %v4199_v63, %v4024_v2  ;;  %v4026_v3 = vpop.f32.mrb[98].mxu1  ;;  %4915 = vmatprep.subr.bf16.mxu0 %v7560_v56  ;;  %4984 = vmatprep.subr.bf16.mxu1 %v7563_v32  ;;  %v4582_v56 = vpop.permute.xlu0 %4581  ;;  %v8147_v32 = vld [vmem:[%s8465_s29] sm:$0xff]  ;;  %v8148_v7 = vld [vmem:[%s8465_s29 + $0x8] sm:$0xff] }
 0x434   : > { %v4225_v37 = vmul.f32 %v4201_v30, %v4026_v3  ;;  %v4028_v29 = vpop.f32.mrb[99].mxu1  ;;  %v4608_v23 = vmul.f32 %v8147_v32, %v4578_v60  ;;  %v4609_v63 = vmul.f32 %v8148_v7, %v4582_v56  ;;  %v7582_v6 = vld [vmem:[%s10636_s2 + $0x750] ss:$24 sps:$4 sm:$0xff]   ;;  %v8152_v10 = vld [vmem:[%s8465_s29 + $0x20] sm:$0xff]  ;;  %v7625_v56 = vld [vmem:[%s10637_s3 + $0x358] sm:$0xff]  }
 0x435   : > { %v4226_v8 = vmul.f32 %v4202_v58, %v4028_v29  ;;  %v7585_v30 = vld [vmem:[%s10636_s2 + $0x6f8] ss:$24 sps:$4 sm:$0xff]   ;;  %v7588_v2 = vld [vmem:[%s10636_s2 + $0x728] ss:$24 sps:$4 sm:$0xff]   ;;  %v7599_v58 = vld [vmem:[%s10636_s2 + $0x644] ss:$24 sps:$4 sm:$0xff]  }
 0x436   : > { %v4240_v34 = vpack.c.bf16 %v4225_v37, %v4222_v13  ;;  %4916 = vmatpush1.bf16.msra.mxu0 %v7558_v33  ;;  %4985 = vmatpush1.bf16.msra.mxu1 %v7561_v55  ;;  %v7590_v13 = vld [vmem:[%s10636_s2 + $0x72c] ss:$24 sps:$4 sm:$0xff]   ;;  %v7591_v33 = vld [vmem:[%s10636_s2 + $0x610] ss:$24 sps:$4 sm:$0xff]   ;;  %v7596_v55 = vld [vmem:[%s10636_s2 + $0x75c] ss:$24 sps:$4 sm:$0xff]  }
 0x437   : > { %v4241_v26 = vpack.c.bf16 %v4226_v8, %v4223_v35  ;;  %4917 = vmatprep.subr.bf16.mxu0 %v7566_v42  ;;  %4986 = vmatprep.subr.bf16.mxu1 %v7569_v4  ;;  %v4590_v35 = vpop.permute.xlu1 %4589  ;;  %v7594_v3 = vld [vmem:[%s10636_s2 + $0x758] ss:$24 sps:$4 sm:$0xff]   ;;  %v7602_v8 = vld [vmem:[%s10636_s2 + $0x674] ss:$24 sps:$4 sm:$0xff]   ;;  %v4594_v27 = vpop.permute.xlu0 %4593  ;;  %v7628_v7 = vld [vmem:[%s10637_s3 + $0x360] sm:$0xff]  }
 0x438   : > { %4486 = vmatprep.mubr.bf16.mxu0 %v4240_v34  ;;  %v7597_v42 = vld [vmem:[%s10636_s2 + $0x640] ss:$24 sps:$4 sm:$0xff]   ;;  %v8149_v4 = vld [vmem:[%s8465_s29 + $0x10] sm:$0xff] }
 0x439   : > { %v4032_v49 = vpop.f32.mrb[100].mxu1  ;;  %4487 = vmatmul.mubr.bf16.gmra.mrb[152].mxu0 %v4239_v21  ;;  %6990 = vmatprep.mubr.bf16.mxu1 %v4241_v26  ;;  %v4610_v37 = vmul.f32 %v8149_v4, %v4586_v16  ;;  %v8150_v29 = vld [vmem:[%s8465_s29 + $0x18] sm:$0xff]  ;;  %v7634_v16 = vld [vmem:[%s10637_s3 + $0x370] sm:$0xff]  }
 0x43a   : > { %v4228_v45 = vmul.f32 %v4204_v20, %v4032_v49  ;;  %4918 = vmatpush1.bf16.msra.mxu0 %v7564_v1  ;;  %4987 = vmatpush1.bf16.msra.mxu1 %v7567_v19  ;;  %v4034_v50 = vpop.f32.mrb[101].mxu1  ;;  %v4611_v9 = vmul.f32 %v8150_v29, %v4590_v35  ;;  %v7605_v1 = vld [vmem:[%s10636_s2 + $0x6a4] ss:$24 sps:$4 sm:$0xff]   ;;  %v7603_v26 = vld [vmem:[%s10636_s2 + $0x6a0] ss:$24 sps:$4 sm:$0xff]   ;;  %v4612_v20 = vmul.f32 %v8152_v10, %v4594_v27  ;;  %v10388_v35 = vld [vmem:[%s10637_s3 + $0x3b0] sm:$0xff]  }
 0x43b   : > { %v4229_v31 = vmul.f32 %v4205_v11, %v4034_v50  ;;  %v4036_v47 = vpop.f32.mrb[102].mxu1  ;;  %4919 = vmatprep.subr.bf16.mxu0 %v7572_v14  ;;  %4988 = vmatprep.subr.bf16.mxu1 %v7575_v28  ;;  %v4598_v19 = vpop.permute.xlu1 %4597  ;;  %v8151_v14 = vld [vmem:[%s8465_s29 + $0x28] sm:$0xff]  ;;  %v7615_v60 = vld [vmem:[%s10636_s2 + $0x760] ss:$24 sps:$4 sm:$0xff]  }
 0x43c   : > { %v4231_v21 = vmul.f32 %v4207_v22, %v4036_v47  ;;  %v4038_v24 = vpop.f32.mrb[103].mxu1  ;;  %v4617_v34 = vpack.c.bf16 %v4611_v9, %v4610_v37  ;;  %v4613_v28 = vmul.f32 %v8151_v14, %v4598_v19  ;;  %v7608_v11 = vld [vmem:[%s10636_s2 + $0x6d4] ss:$24 sps:$4 sm:$0xff]   ;;  %v7606_v49 = vld [vmem:[%s10636_s2 + $0x6d0] ss:$24 sps:$4 sm:$0xff]   ;;  %v7626_v32 = vld [vmem:[%s10637_s3 + $0x318] sm:$0xff]  }
 0x43d   : > { %v4232_v15 = vmul.f32 %v4208_v44, %v4038_v24  ;;  %v8153_v44 = vld [vmem:[%s8465_s29 + $0x38] sm:$0xff]  ;;  %v8154_v47 = vld [vmem:[%s8465_s29 + $0x30] sm:$0xff]  ;;  %s5763_s29 = sshll.u32 %s205_s9, 6 }
 0x43e   : > { %v4243_v41 = vpack.c.bf16 %v4231_v21, %v4228_v45  ;;  %4920 = vmatpush1.bf16.msra.mxu0 %v7570_v38  ;;  %4989 = vmatpush1.bf16.msra.mxu1 %v7573_v51  ;;  %v4618_v22 = vpack.c.bf16 %v4613_v28, %v4612_v20  ;;  %v7611_v45 = vld [vmem:[%s10636_s2 + $0x704] ss:$24 sps:$4 sm:$0xff]   ;;  %v4602_v38 = vpop.permute.xlu0 %4601  ;;  %v7609_v51 = vld [vmem:[%s10636_s2 + $0x700] ss:$24 sps:$4 sm:$0xff]   ;;  %v7612_v21 = vld [vmem:[%s10636_s2 + $0x730] ss:$24 sps:$4 sm:$0xff]  }
 0x43f   : > { %v4244_v59 = vpack.c.bf16 %v4232_v15, %v4229_v31  ;;  %4921 = vmatprep.subr.bf16.mxu0 %v7578_v43  ;;  %4990 = vmatprep.subr.bf16.mxu1 %v7581_v25  ;;  %v4606_v50 = vpop.permute.xlu1 %4605  ;;  %v4614_v43 = vmul.f32 %v8154_v47, %v4602_v38  ;;  %v7614_v25 = vld [vmem:[%s10636_s2 + $0x734] ss:$24 sps:$4 sm:$0xff]   ;;  %v7617_v15 = vld [vmem:[%s10636_s2 + $0x764] ss:$24 sps:$4 sm:$0xff]   ;;  %s10568_s10 = scalar_lea.vmem [#allocation2], %s5763_s29 }
 0x440   : > { %4494 = vmatprep.mubr.bf16.mxu0 %v4243_v41  ;;  %v4615_v31 = vmul.f32 %v8153_v44, %v4606_v50  ;;  %v7618_v41 = vld [vmem:[%s10637_s3 + $0x340] sm:$0xff]   ;;  %s5685_s12 = sshll.u32 %s10568_s10, 4  ;;  %s10586_s12 = int_to_ptr.vmem [resolvable:$true] %s5685_s12 }
 0x441   : > { %4495 = vmatmul.mubr.bf16.gmra.mrb[156].mxu0 %v4242_v53  ;;  %6991 = vmatmul.mubr.bf16.gmra.mrb[52].mxu1 %v4244_v59  ;;  %v10219_v53 = vpack.c.bf16 %v4609_v63, %v4608_v23  ;;  %v7621_v59 = vld [vmem:[%s10637_s3 + $0x308] sm:$0xff]   ;;  %v7629_v63 = vld [vmem:[%s10637_s3 + $0x320] sm:$0xff]   ;;  %s8155_s20 = scalar_lea.vmem %s10586_s12, 1024  ;;  %p8162_p0 = scmp.lt.s32.totalorder %s10586_s12, %s8160_s28 }
 0x442   : > { %4922 = vmatpush1.bf16.msra.mxu0 %v7576_v40  ;;  %4991 = vmatpush1.bf16.msra.mxu1 %v7579_v5  ;;  %v4619_v24 = vpack.c.bf16 %v4615_v31, %v4614_v43  ;;  %v7619_v40 = vld [vmem:[%s10637_s3 + $0x300] sm:$0xff]   ;;  %v7620_v5 = vld [vmem:[%s10637_s3 + $0x348] sm:$0xff]   ;;  %p8156_p11 = scmp.ne.s32.totalorder %s10586_s12, %s8155_s20  ;;  %p8163_p1 = scmp.lt.s32.totalorder %s8161_s30, %s8155_s20 }
 0x443   : > { %4923 = vmatprep.subr.bf16.mxu0 %v7584_v61  ;;  %4992 = vmatprep.subr.bf16.mxu1 %v7587_v57  ;;  %v7623_v61 = vld [vmem:[%s10637_s3 + $0x310] sm:$0xff]   ;;  %v10315_v57 = vld [vmem:[%s10637_s3 + $0x380] sm:$0xff]   ;;  %v10328_v23 = vld [vmem:[%s10637_s3 + $0x388] sm:$0xff]  }
 0x444   : > { %4941 = vmatprep.mubr.bf16.mxu0 %v10673_v39  ;;  %5014 = vmatprep.mubr.bf16.mxu1 %v10673_v39  ;;  %p8157_p12 = pnand %p8156_p11, %p8290_p5  ;;  %p8164_p2 = por %p8163_p1, %p8162_p0 }
 0x446   : > { %4924 = vmatpush1.bf16.msra.mxu0 %v7582_v6  ;;  %4993 = vmatpush1.bf16.msra.mxu1 %v7585_v30  ;;  %v10341_v6 = vld [vmem:[%s10637_s3 + $0x390] sm:$0xff]   ;;  %v7631_v30 = vld [vmem:[%s10637_s3 + $0x368] sm:$0xff]   ;;  %p8158_p13 = pneg %p8157_p12 }
 0x447   : > { %4994 = vmatprep.subr.bf16.mxu1 %v7590_v13  ;;  %5055 = vmatprep.subr.bf16.mxu0 %v7593_v62  ;;  %v7632_v13 = vld [vmem:[%s10637_s3 + $0x328] sm:$0xff]   ;;  %v10354_v62 = vld [vmem:[%s10637_s3 + $0x398] sm:$0xff]  }
 0x448   : > { %p8165_p3 = pnand %p8164_p2, %p8158_p13 }
 0x449   : > { %4942 = vmatmul.mubr.bf16.vlgmr.msra.gmra.mrb[160].mxu0 %v10219_v53 }
 0x44a   : > { %4995 = vmatpush1.bf16.msra.mxu1 %v7588_v2  ;;  %5056 = vmatpush1.bf16.msra.mxu0 %v7591_v33  ;;  %v10367_v2 = vld [vmem:[%s10637_s3 + $0x3a0] sm:$0xff]   ;;  %v7637_v33 = vld [vmem:[%s10637_s3 + $0x378] sm:$0xff]  }
 0x44b   : > { %4996 = vmatprep.subr.bf16.mxu1 %v7596_v55  ;;  %5057 = vmatprep.subr.bf16.mxu0 %v7599_v58  ;;  %v7638_v55 = vld [vmem:[%s10637_s3 + $0x338] sm:$0xff]   ;;  %v10380_v58 = vld [vmem:[%s10637_s3 + $0x3a8] sm:$0xff]  }
 0x44c   : > { %4951 = vmatprep.mubr.bf16.mxu0 %v10673_v39 }
 0x44e   : > { %4997 = vmatpush1.bf16.msra.mxu1 %v7594_v3  ;;  %5058 = vmatpush1.bf16.msra.mxu0 %v7597_v42  ;;  %v10395_v3 = vld [vmem:[%s10637_s3 + $0x3b8] sm:$0xff]  }
 0x44f   : > { %5059 = vmatprep.subr.bf16.mxu0 %v7602_v8  ;;  %6846 = vmatprep.subr.bf16.mxu1 %v7618_v41 }
 0x451   : > { %5015 = vmatmul.mubr.bf16.vlgmr.msra.gmra.mrb[104].mxu1 %v10219_v53  ;;  %4952 = vmatmul.mubr.bf16.gmra.mrb[164].mxu0 %v4617_v34 }
 0x452   : > { %5060 = vmatpush1.bf16.msra.mxu0 %v7600_v18  ;;  %5024 = vmatprep.mubr.bf16.mxu1 %v10673_v39 }
 0x453   : > { %5061 = vmatprep.subr.bf16.mxu0 %v7605_v1  ;;  %4961 = vmatprep.mubr.bf16.mxu0 %v10673_v39 }
 0x454   : > { %6847 = vmatpush3.bf16.msra.mxu1 %v7619_v40 }
 0x455   : > { %6848 = vmatprep.subr.bf16.mxu1 %v7620_v5 }
 0x456   : > { %5062 = vmatpush1.bf16.msra.mxu0 %v7603_v26 }
 0x457   : > { %5063 = vmatprep.subr.bf16.mxu0 %v7608_v11 }
 0x458   : > { %6849 = vmatpush3.bf16.msra.mxu1 %v7621_v59 }
 0x459   : > { %5025 = vmatmul.mubr.bf16.gmra.mrb[108].mxu1 %v4617_v34  ;;  %4962 = vmatmul.mubr.bf16.gmra.mrb[168].mxu0 %v4618_v22 }
 0x45a   : > { %5064 = vmatpush1.bf16.msra.mxu0 %v7606_v49  ;;  %5034 = vmatprep.mubr.bf16.mxu1 %v10673_v39 }
 0x45b   : > { %5065 = vmatprep.subr.bf16.mxu0 %v7611_v45  ;;  %4971 = vmatprep.mubr.bf16.mxu0 %v10673_v39 }
 0x45e   : > { %5066 = vmatpush1.bf16.msra.mxu0 %v7609_v51 }
 0x45f   : > { %5067 = vmatprep.subr.bf16.mxu0 %v7614_v25 }
 0x461   : > { %5035 = vmatmul.mubr.bf16.gmra.mrb[112].mxu1 %v4618_v22  ;;  %4972 = vmatmul.mubr.bf16.gmra.mrb[172].mxu0 %v4619_v24 }
 0x462   : > { %5068 = vmatpush1.bf16.msra.mxu0 %v7612_v21  ;;  %5044 = vmatprep.mubr.bf16.mxu1 %v10673_v39 }
 0x463   : > { %5069 = vmatprep.subr.bf16.mxu0 %v7617_v15  ;;  %5087 = vmatprep.mubr.bf16.mxu0 %v10673_v39 }
 0x466   : > { %5070 = vmatpush1.bf16.msra.mxu0 %v7615_v60 }
 0x467   : > { %6994 = vmatprep.subr.bf16.mxu0 %v10315_v57 }
 0x469   : > { %5045 = vmatmul.mubr.bf16.gmra.mrb[116].mxu1 %v4619_v24  ;;  %5088 = vmatmul.mubr.bf16.vlgmr.msra.gmra.mrb[176].mxu0 %v10219_v53  ;;  %v7635_v53 = vld [vmem:[%s10637_s3 + $0x330] sm:$0xff]  }
 0x46a   : > { %5097 = vmatprep.mubr.bf16.mxu0 %v10673_v39  ;;  %6995 = vmatpush3.bf16.msra.mxu0 %v10315_v57 }
 0x46b   : > { %6996 = vmatprep.subr.bf16.mxu0 %v10328_v23 }
 0x46e   : > { %6997 = vmatpush3.bf16.msra.mxu0 %v10328_v23 }
 0x46f   : > { %6998 = vmatprep.subr.bf16.mxu0 %v10341_v6 }
 0x471   : > { %5098 = vmatmul.mubr.bf16.gmra.mrb[180].mxu0 %v4617_v34 }
 0x472   : > { %5107 = vmatprep.mubr.bf16.mxu0 %v10673_v39  ;;  %6999 = vmatpush3.bf16.msra.mxu0 %v10341_v6 }
 0x473   : > { %7000 = vmatprep.subr.bf16.mxu0 %v10354_v62 }
 0x476   : > { %7001 = vmatpush3.bf16.msra.mxu0 %v10354_v62 }
 0x477   : > { %7002 = vmatprep.subr.bf16.mxu0 %v10367_v2 }
 0x479   : > { %5108 = vmatmul.mubr.bf16.gmra.mrb[184].mxu0 %v4618_v22 }
 0x47a   : > { %5117 = vmatprep.mubr.bf16.mxu0 %v10673_v39  ;;  %v7622_v39 = vld [vmem:[%s10637_s3 + $0x350] sm:$0xff]   ;;  %7003 = vmatpush3.bf16.msra.mxu0 %v10367_v2 }
 0x47b   : > { %6850 = vmatprep.subr.bf16.mxu1 %v7622_v39  ;;  %7004 = vmatprep.subr.bf16.mxu0 %v10380_v58 }
 0x47c   : > { %6851 = vmatpush3.bf16.msra.mxu1 %v7623_v61 }
 0x47d   : > { %6852 = vmatprep.subr.bf16.mxu1 %v7625_v56 }
 0x47e   : > { %7005 = vmatpush3.bf16.msra.mxu0 %v10380_v58 }
 0x47f   : > { %7006 = vmatprep.subr.bf16.mxu0 %v10388_v35 }
 0x480   : > { %6853 = vmatpush3.bf16.msra.mxu1 %v7626_v32 }
 0x481   : > { %5118 = vmatmul.mubr.bf16.gmra.mrb[188].mxu0 %v4619_v24  ;;  %6854 = vmatprep.subr.bf16.mxu1 %v7628_v7 }
 0x482   : > { %7007 = vmatpush3.bf16.msra.mxu0 %v10388_v35 }
 0x483   : > { %7008 = vmatprep.subr.bf16.mxu0 %v10395_v3 }
 0x484   : > { %6855 = vmatpush3.bf16.msra.mxu1 %v7629_v63 }
 0x485   : > { %6856 = vmatprep.subr.bf16.mxu1 %v7631_v30 }
 0x486   : > { %7009 = vmatpush3.bf16.msra.mxu0 %v10395_v3 }
 0x488   : > { %6857 = vmatpush3.bf16.msra.mxu1 %v7632_v13 }
 0x489   : > { %6858 = vmatprep.subr.bf16.mxu1 %v7634_v16 }
 0x48c   : > { %6859 = vmatpush3.bf16.msra.mxu1 %v7635_v53 }
 0x48d   : > { %6860 = vmatprep.subr.bf16.mxu1 %v7637_v33 }
 0x490   : > { %6861 = vmatpush3.bf16.msra.mxu1 %v7638_v55 }
 0x491   : > { %7018 = vmatprep.subr.bf16.mxu1 %v10315_v57 }
 0x4fc   : > { %v6810_v42 = vpop.f32.mrb[144].mxu0 }
 0x4fd   : > { %v6811_v4 = vpop.f32.mrb[145].mxu0 }
 0x4fe   : > { %v6812_v37 = vadd.f32 %v6811_v4, %v6810_v42  ;;  %v6813_v29 = vpop.f32.mrb[146].mxu0 }
 0x4ff   : > { %v6814_v9 = vpop.f32.mrb[147].mxu0 }
 0x500   : > { %v6815_v8 = vadd.f32 %v6814_v9, %v6813_v29  ;;  %v7042_v18 = vadd.f32 %v10064_v54, %v6812_v37 }
 0x502   : > { %v7054_v34 = vadd.f32 %v10067_v0, %v6815_v8 }
 0x504   : > { %v6816_v1 = vpop.f32.mrb[148].mxu0  ;;  %v6988_v19 = vpop.f32.mrb[48].mxu1 }
 0x505   : > { %v6817_v27 = vpop.f32.mrb[149].mxu0  ;;  %v4537_v26 = vpop.f32.mrb[49].mxu1 }
 0x506   : > { %v6818_v14 = vadd.f32 %v6817_v27, %v6816_v1  ;;  %v10401_v28 = vadd.f32 %v7042_v18, %v4537_v26  ;;  %v6819_v10 = vpop.f32.mrb[150].mxu0  ;;  %v6989_v20 = vpop.f32.mrb[50].mxu1 }
 0x507   : > { %v6820_v11 = vpop.f32.mrb[151].mxu0  ;;  %v4540_v49 = vpop.f32.mrb[51].mxu1 }
 0x508   : > { %v7036_v22 = vadd.f32 %v10070_v36, %v6818_v14  ;;  %v6821_v45 = vadd.f32 %v6820_v11, %v6819_v10  ;;  %v10404_v50 = vadd.f32 %v7054_v34, %v4540_v49 }
 0x50a   : > { %v7048_v54 = vadd.f32 %v10073_v17, %v6821_v45  ;;  %v10407_v38 = vadd.f32 %v7036_v22, %v6988_v19 }
 0x50c   : > { %v6822_v0 = vpop.f32.mrb[152].mxu0  ;;  %v10409_v51 = vadd.f32 %v7048_v54, %v6989_v20 }
 0x50d   : > { %v6823_v44 = vpop.f32.mrb[153].mxu0 }
 0x50e   : > { %v6824_v31 = vadd.f32 %v6823_v44, %v6822_v0  ;;  %v6825_v47 = vpop.f32.mrb[154].mxu0 }
 0x50f   : > { %v6826_v43 = vpop.f32.mrb[155].mxu0 }
 0x510   : > { %v10412_v25 = vadd.f32 %v10076_v52, %v6824_v31  ;;  %v6827_v21 = vadd.f32 %v6826_v43, %v6825_v47 }
 0x512   : > { %v10415_v36 = vadd.f32 %v10079_v46, %v6827_v21 }
 0x514   : > { %v6828_v24 = vpop.f32.mrb[156].mxu0 }
 0x515   : > { %v6829_v15 = vpop.f32.mrb[157].mxu0 }
 0x516   : > { %v6830_v60 = vadd.f32 %v6829_v15, %v6828_v24  ;;  %v6831_v17 = vpop.f32.mrb[158].mxu0 }
 0x517   : > { %v6832_v41 = vpop.f32.mrb[159].mxu0 }
 0x518   : > { %v10418_v40 = vadd.f32 %v10084_v12, %v6830_v60  ;;  %v6833_v5 = vadd.f32 %v6832_v41, %v6831_v17 }
 0x51a   : > { %v10421_v59 = vadd.f32 %v10088_v48, %v6833_v5 }
 0x51c   : > { %v10423_v39 = vpop.f32.mrb[160].mxu0 }
 0x51d   : > { %v6536_v52 = vmul.f32 -1.442695, %v10423_v39  ;;  %v10426_v61 = vpop.f32.mrb[161].mxu0 }
 0x51e   : > { %v6537_v46 = vmul.f32 -1.442695, %v10426_v61  ;;  %v10429_v56 = vpop.f32.mrb[162].mxu0 }
 0x51f   : > { %8026 = vpow2.f32 %v6536_v52  ;;  %v6539_v32 = vmul.f32 -1.442695, %v10429_v56  ;;  %v10432_v7 = vpop.f32.mrb[163].mxu0 }
 0x520   : > { %8028 = vpow2.f32 %v6537_v46  ;;  %v6540_v12 = vmul.f32 -1.442695, %v10432_v7 }
 0x521   : > { %8030 = vpow2.f32 %v6539_v32 }
 0x522   : > { %8032 = vpow2.f32 %v6540_v12 }
 0x524   : > { %v10435_v48 = vpop.f32.mrb[104].mxu1  ;;  %v10437_v63 = vpop.f32.mrb[164].mxu0 }
 0x525   : > { %v6538_v30 = vmul.f32 -1.442695, %v10435_v48  ;;  %v6542_v13 = vmul.f32 -1.442695, %v10437_v63  ;;  %v10441_v16 = vpop.f32.mrb[105].mxu1  ;;  %v10443_v53 = vpop.f32.mrb[165].mxu0 }
 0x526   : > { %v6543_v33 = vmul.f32 -1.442695, %v10443_v53  ;;  %v10446_v55 = vpop.f32.mrb[106].mxu1  ;;  %v10448_v42 = vpop.f32.mrb[166].mxu0 }
 0x527   : > { %8034 = vpow2.f32 %v6538_v30  ;;  %v6541_v4 = vmul.f32 -1.442695, %v10446_v55  ;;  %v6545_v37 = vmul.f32 -1.442695, %v10448_v42  ;;  %v10452_v29 = vpop.f32.mrb[107].mxu1  ;;  %v10454_v9 = vpop.f32.mrb[167].mxu0 }
 0x528   : > { %8036 = vpow2.f32 %v6542_v13  ;;  %v6546_v14 = vmul.f32 -1.442695, %v10454_v9 }
 0x529   : > { %v8027_v8 = vpop.eup %8026  ;;  %8038 = vpow2.f32 %v6543_v33 }
 0x52a   : > { %v8029_v18 = vpop.eup %8028  ;;  %v5200_v34 = vadd.f32 1.0, %v8027_v8  ;;  %8040 = vpow2.f32 %v6541_v4 }
 0x52b   : > { %v8031_v1 = vpop.eup %8030  ;;  %v5201_v19 = vadd.f32 1.0, %v8029_v18  ;;  %8042 = vpow2.f32 %v6545_v37 }
 0x52c   : > { %v8033_v27 = vpop.eup %8032  ;;  %8044 = vrcp.f32 %v5200_v34  ;;  %v5203_v26 = vadd.f32 1.0, %v8031_v1  ;;  %v10457_v10 = vpop.f32.mrb[108].mxu1 }
 0x52d   : > { %v10459_v20 = vpop.f32.mrb[168].mxu0  ;;  %8046 = vrcp.f32 %v5201_v19  ;;  %v5204_v11 = vadd.f32 1.0, %v8033_v27  ;;  %v6544_v49 = vmul.f32 -1.442695, %v10457_v10  ;;  %v10462_v22 = vpop.f32.mrb[109].mxu1 }
 0x52e   : > { %8048 = vrcp.f32 %v5203_v26  ;;  %v6548_v45 = vmul.f32 -1.442695, %v10459_v20  ;;  %v10465_v54 = vpop.f32.mrb[169].mxu0  ;;  %v10467_v0 = vpop.f32.mrb[110].mxu1 }
 0x52f   : > { %8050 = vrcp.f32 %v5204_v11  ;;  %v6549_v44 = vmul.f32 -1.442695, %v10465_v54  ;;  %v10470_v31 = vpop.f32.mrb[170].mxu0  ;;  %v10472_v47 = vpop.f32.mrb[111].mxu1  ;;  %v6547_v30 = vmul.f32 -1.442695, %v10467_v0 }
 0x530   : > { %8052 = vpow2.f32 %v6546_v14  ;;  %v10474_v43 = vpop.f32.mrb[171].mxu0  ;;  %v6551_v37 = vmul.f32 -1.442695, %v10470_v31 }
 0x531   : > { %v8035_v21 = vpop.eup %8034  ;;  %8054 = vpow2.f32 %v6544_v49  ;;  %v6552_v19 = vmul.f32 -1.442695, %v10474_v43 }
 0x532   : > { %v8037_v24 = vpop.eup %8036  ;;  %v5202_v15 = vadd.f32 1.0, %v8035_v21  ;;  %8056 = vpow2.f32 %v6548_v45 }
 0x533   : > { %v8039_v60 = vpop.eup %8038  ;;  %v5206_v17 = vadd.f32 1.0, %v8037_v24  ;;  %8058 = vpow2.f32 %v6549_v44 }
 0x534   : > { %v8041_v41 = vpop.eup %8040  ;;  %8060 = vrcp.f32 %v5202_v15  ;;  %v5207_v5 = vadd.f32 1.0, %v8039_v60  ;;  %v10476_v52 = vpop.f32.mrb[112].mxu1 }
 0x535   : > { %v10478_v46 = vpop.f32.mrb[172].mxu0  ;;  %v8043_v32 = vpop.eup %8042  ;;  %8062 = vrcp.f32 %v5206_v17  ;;  %v5205_v12 = vadd.f32 1.0, %v8041_v41  ;;  %v6550_v11 = vmul.f32 -1.442695, %v10476_v52 }
 0x536   : > { %v10481_v13 = vpop.f32.mrb[113].mxu1  ;;  %v8045_v33 = vpop.eup %8044  ;;  %8064 = vrcp.f32 %v5207_v5  ;;  %v5209_v4 = vadd.f32 1.0, %v8043_v32  ;;  %v6554_v32 = vmul.f32 -1.442695, %v10478_v46 }
 0x537   : > { %v10484_v8 = vpop.f32.mrb[173].mxu0  ;;  %v10486_v18 = vpop.f32.mrb[114].mxu1  ;;  %v5272_v1 = vmul.f32 %v8045_v33, %v10423_v39  ;;  %8066 = vrcp.f32 %v5205_v12 }
 0x538   : > { %v8047_v34 = vpop.eup %8046  ;;  %v10490_v27 = vpop.f32.mrb[174].mxu0  ;;  %8068 = vrcp.f32 %v5209_v4 }
 0x539   : > { %v10492_v26 = vpop.f32.mrb[115].mxu1  ;;  %v8049_v14 = vpop.eup %8048  ;;  %v5296_v21 = vmul.f32 %v5272_v1, %v10441_v16  ;;  %8070 = vpow2.f32 %v6547_v30  ;;  %v5273_v41 = vmul.f32 %v8047_v34, %v10426_v61  ;;  %v6555_v61 = vmul.f32 -1.442695, %v10484_v8 }
 0x53a   : > { %v10495_v49 = vpop.f32.mrb[175].mxu0  ;;  %v8051_v45 = vpop.eup %8050  ;;  %v5275_v44 = vmul.f32 %v8049_v14, %v10429_v56  ;;  %8072 = vpow2.f32 %v6551_v37 }
 0x53b   : > { %v8053_v39 = vpop.eup %8052  ;;  %8074 = vpow2.f32 %v6552_v19  ;;  %v5276_v16 = vmul.f32 %v8051_v45, %v10432_v7  ;;  %v6553_v7 = vmul.f32 -1.442695, %v10486_v18 }
 0x53c   : > { %v8055_v24 = vpop.eup %8054  ;;  %v5299_v15 = vmul.f32 %v5275_v44, %v10452_v29  ;;  %v5210_v60 = vadd.f32 1.0, %v8053_v39  ;;  %8076 = vpow2.f32 %v6550_v11  ;;  %v10502_v12 = vpop.f32.mrb[116].mxu1 }
 0x53d   : > { %v8057_v17 = vpop.eup %8056  ;;  %v5208_v5 = vadd.f32 1.0, %v8055_v24  ;;  %v5089_v56 = vpop.f32.mrb[176].mxu0 }
 0x53e   : > { %v8059_v33 = vpop.eup %8058  ;;  %v5320_v30 = vpack.c.bf16 %v5299_v15, %v5296_v21  ;;  %8078 = vrcp.f32 %v5210_v60  ;;  %v5212_v4 = vadd.f32 1.0, %v8057_v17  ;;  %v10505_v37 = vpop.f32.mrb[117].mxu1  ;;  %v5297_v34 = vmul.f32 %v5273_v41, %v5089_v56 }
 0x53f   : > { %v5091_v29 = vpop.f32.mrb[177].mxu0  ;;  %v8061_v1 = vpop.eup %8060  ;;  %8080 = vrcp.f32 %v5208_v5  ;;  %v5213_v19 = vadd.f32 1.0, %v8059_v33  ;;  %v6557_v17 = vmul.f32 -1.442695, %v10490_v27  ;;  %v6558_v5 = vmul.f32 -1.442695, %v10495_v49 }
 0x540   : > { %v10508_v14 = vpop.f32.mrb[118].mxu1  ;;  %v5093_v11 = vpop.f32.mrb[178].mxu0  ;;  %v5274_v39 = vmul.f32 %v8061_v1, %v10435_v48  ;;  %8082 = vrcp.f32 %v5212_v4 }
 0x541   : > { %v8063_v44 = vpop.eup %8062  ;;  %v10512_v45 = vpop.f32.mrb[119].mxu1  ;;  %v5300_v21 = vmul.f32 %v5276_v16, %v5093_v11  ;;  %8084 = vrcp.f32 %v5213_v19 }
 0x542   : > { %v5095_v24 = vpop.f32.mrb[179].mxu0  ;;  %v8065_v15 = vpop.eup %8064  ;;  %v5278_v60 = vmul.f32 %v8063_v44, %v10437_v63  ;;  %8086 = vpow2.f32 %v6554_v32  ;;  %v5298_v56 = vmul.f32 %v5274_v39, %v5091_v29 }
 0x543   : > { %v8067_v41 = vpop.eup %8066  ;;  %v5321_v33 = vpack.c.bf16 %v5300_v21, %v5297_v34  ;;  %8088 = vpow2.f32 %v6555_v61  ;;  %v5279_v11 = vmul.f32 %v8065_v15, %v10443_v53 }
 0x544   : > { %v8069_v48 = vpop.eup %8068  ;;  %v5277_v4 = vmul.f32 %v8067_v41, %v10446_v55  ;;  %v10519_v1 = vmul.f32 %v5278_v60, %v10462_v22  ;;  %8090 = vpow2.f32 %v6553_v7  ;;  %v5099_v29 = vpop.f32.mrb[180].mxu0  ;;  %v6556_v7 = vmul.f32 -1.442695, %v10502_v12 }
 0x545   : > { %v8071_v16 = vpop.eup %8070  ;;  %v5281_v63 = vmul.f32 %v8069_v48, %v10448_v42  ;;  %5557 = vmatprep.mubr.bf16.mxu1 %v5321_v33  ;;  %8092 = vpow2.f32 %v6557_v17  ;;  %v5303_v22 = vmul.f32 %v5279_v11, %v5099_v29  ;;  %v5101_v61 = vpop.f32.mrb[181].mxu0 }
 0x546   : > { %v8073_v19 = vpop.eup %8072  ;;  %v5211_v32 = vadd.f32 1.0, %v8071_v16  ;;  %v5301_v44 = vmul.f32 %v5277_v4, %v5095_v24  ;;  %5558 = vmatmul.mubr.bf16.vlgmr.msra.gmra.mrb[120].mxu1 %v5320_v30  ;;  %8094 = vpow2.f32 %v6558_v5  ;;  %v5103_v15 = vpop.f32.mrb[182].mxu0 }
 0x547   : > { %v8075_v34 = vpop.eup %8074  ;;  %v5215_v39 = vadd.f32 1.0, %v8073_v19  ;;  %v5305_v55 = vmul.f32 %v5281_v63, %v10472_v47  ;;  %7026 = vmatpush3.bf16.msra.mxu1 %v10315_v57  ;;  %v6559_v47 = vmul.f32 -1.442695, %v10508_v14  ;;  %v5105_v17 = vpop.f32.mrb[183].mxu0 }
 0x548   : > { %v8077_v53 = vpop.eup %8076  ;;  %8096 = vrcp.f32 %v5211_v32  ;;  %v5216_v42 = vadd.f32 1.0, %v8075_v34  ;;  %v5322_v21 = vpack.c.bf16 %v5301_v44, %v5298_v56  ;;  %7019 = vmatprep.subr.bf16.mxu1 %v10328_v23 }
 0x549   : > { %v8079_v24 = vpop.eup %8078  ;;  %8098 = vrcp.f32 %v5215_v39  ;;  %v5323_v30 = vpack.c.bf16 %v5305_v55, %v10519_v1  ;;  %v5214_v60 = vadd.f32 1.0, %v8077_v53 }
 0x54a   : > { %v8081_v41 = vpop.eup %8080  ;;  %v5282_v57 = vmul.f32 %v8079_v24, %v10454_v9  ;;  %8100 = vrcp.f32 %v5216_v42  ;;  %7010 = vmatprep.mubr.bf16.mxu0 %v5322_v21 }
 0x54b   : > { %v8083_v5 = vpop.eup %8082  ;;  %v5280_v33 = vmul.f32 %v8081_v41, %v10457_v10  ;;  %8102 = vrcp.f32 %v5214_v60  ;;  %7027 = vmatpush3.bf16.msra.mxu1 %v10328_v23 }
 0x54c   : > { %v8085_v56 = vpop.eup %8084  ;;  %v5284_v48 = vmul.f32 %v8083_v5, %v10459_v20  ;;  %8104 = vpow2.f32 %v6556_v7  ;;  %v5306_v4 = vmul.f32 %v5282_v57, %v5103_v15  ;;  %7020 = vmatprep.subr.bf16.mxu1 %v10341_v6  ;;  %v5109_v32 = vpop.f32.mrb[184].mxu0 }
 0x54d   : > { %v8087_v1 = vpop.eup %8086  ;;  %v5285_v16 = vmul.f32 %v8085_v56, %v10465_v54  ;;  %8106 = vpow2.f32 %v6559_v47  ;;  %v5304_v9 = vmul.f32 %v5280_v33, %v5101_v61  ;;  %v5111_v20 = vpop.f32.mrb[185].mxu0 }
 0x54e   : > { %v8089_v11 = vpop.eup %8088  ;;  %v5218_v63 = vadd.f32 1.0, %v8087_v1  ;;  %v5308_v19 = vmul.f32 %v5284_v48, %v10481_v13  ;;  %v5324_v10 = vpack.c.bf16 %v5306_v4, %v5303_v22  ;;  %v5113_v55 = vpop.f32.mrb[186].mxu0 }
 0x54f   : > { %v8091_v44 = vpop.eup %8090  ;;  %v5219_v23 = vadd.f32 1.0, %v8089_v11  ;;  %v5309_v29 = vmul.f32 %v5285_v16, %v5109_v32  ;;  %7028 = vmatpush3.bf16.msra.mxu1 %v10341_v6  ;;  %v5115_v13 = vpop.f32.mrb[187].mxu0 }
 0x550   : > { %v8093_v34 = vpop.eup %8092  ;;  %8108 = vrcp.f32 %v5218_v63  ;;  %v5217_v39 = vadd.f32 1.0, %v8091_v44  ;;  %5565 = vmatprep.mubr.bf16.mxu1 %v5324_v10  ;;  %7021 = vmatprep.subr.bf16.mxu1 %v10354_v62 }
 0x551   : > { %v8095_v54 = vpop.eup %8094  ;;  %8110 = vrcp.f32 %v5219_v23  ;;  %v5221_v61 = vadd.f32 1.0, %v8093_v34  ;;  %5566 = vmatmul.mubr.bf16.gmra.mrb[124].mxu1 %v5323_v30 }
 0x552   : > { %v8097_v22 = vpop.eup %8096  ;;  %8112 = vrcp.f32 %v5217_v39  ;;  %v5222_v53 = vadd.f32 1.0, %v8095_v54 }
 0x553   : > { %v8099_v42 = vpop.eup %8098  ;;  %v5283_v7 = vmul.f32 %v8097_v22, %v10467_v0  ;;  %8114 = vrcp.f32 %v5221_v61  ;;  %7029 = vmatpush3.bf16.msra.mxu1 %v10354_v62 }
 0x554   : > { %v8101_v6 = vpop.eup %8100  ;;  %v5287_v21 = vmul.f32 %v8099_v42, %v10470_v31  ;;  %8116 = vrcp.f32 %v5222_v53  ;;  %7022 = vmatprep.subr.bf16.mxu1 %v10367_v2  ;;  %v5119_v57 = vpop.f32.mrb[188].mxu0 }
 0x555   : > { %v8103_v15 = vpop.eup %8102  ;;  %v5288_v24 = vmul.f32 %v8101_v6, %v10474_v43  ;;  %v5307_v30 = vmul.f32 %v5283_v7, %v5105_v17  ;;  %v5121_v31 = vpop.f32.mrb[189].mxu0 }
 0x556   : > { %v8105_v60 = vpop.eup %8104  ;;  %v5286_v47 = vmul.f32 %v8103_v15, %v10476_v52  ;;  %v5311_v41 = vmul.f32 %v5287_v21, %v10492_v26  ;;  %v5123_v1 = vpop.f32.mrb[190].mxu0 }
 0x557   : > { %v8107_v0 = vpop.eup %8106  ;;  %v5220_v5 = vadd.f32 1.0, %v8105_v60  ;;  %v5325_v33 = vpack.c.bf16 %v5307_v30, %v5304_v9  ;;  %v5312_v62 = vmul.f32 %v5288_v24, %v5113_v55  ;;  %7030 = vmatpush3.bf16.msra.mxu1 %v10367_v2  ;;  %v5125_v52 = vpop.f32.mrb[191].mxu0 }
 0x558   : > { %v5326_v56 = vpack.c.bf16 %v5311_v41, %v5308_v19  ;;  %v5223_v48 = vadd.f32 1.0, %v8107_v0  ;;  %v5310_v4 = vmul.f32 %v5286_v47, %v5111_v20  ;;  %7023 = vmatprep.subr.bf16.mxu1 %v10380_v58 }
 0x559   : > { %8118 = vrcp.f32 %v5220_v5  ;;  %v5327_v43 = vpack.c.bf16 %v5312_v62, %v5309_v29  ;;  %7011 = vmatmul.mubr.bf16.vlgmr.msra.gmra.mrb[192].mxu0 %v5325_v33 }
 0x55a   : > { %v8109_v17 = vpop.eup %8108  ;;  %8120 = vrcp.f32 %v5223_v48 }
 0x55b   : > { %v8111_v26 = vpop.eup %8110  ;;  %v5290_v16 = vmul.f32 %v8109_v17, %v10478_v46  ;;  %5573 = vmatprep.mubr.bf16.mxu1 %v5327_v43  ;;  %7031 = vmatpush3.bf16.msra.mxu1 %v10380_v58 }
 0x55c   : > { %v8113_v2 = vpop.eup %8112  ;;  %v5291_v9 = vmul.f32 %v8111_v26, %v10484_v8  ;;  %5574 = vmatmul.mubr.bf16.gmra.mrb[128].mxu1 %v5326_v56  ;;  %7024 = vmatprep.subr.bf16.mxu1 %v10388_v35 }
 0x55d   : > { %v8115_v11 = vpop.eup %8114  ;;  %v5289_v63 = vmul.f32 %v8113_v2, %v10486_v18  ;;  %v5314_v19 = vmul.f32 %v5290_v16, %v10505_v37 }
 0x55e   : > { %v8117_v10 = vpop.eup %8116  ;;  %v5293_v32 = vmul.f32 %v8115_v11, %v10490_v27  ;;  %v5315_v44 = vmul.f32 %v5291_v9, %v5119_v57 }
 0x55f   : > { %v5294_v46 = vmul.f32 %v8117_v10, %v10495_v49  ;;  %v5313_v23 = vmul.f32 %v5289_v63, %v5115_v13  ;;  %7032 = vmatpush3.bf16.msra.mxu1 %v10388_v35 }
 0x560   : > { %v5317_v58 = vmul.f32 %v5293_v32, %v10512_v45  ;;  %7025 = vmatprep.subr.bf16.mxu1 %v10395_v3 }
 0x561   : > { %v5328_v8 = vpack.c.bf16 %v5313_v23, %v5310_v4  ;;  %v5318_v29 = vmul.f32 %v5294_v46, %v5123_v1 }
 0x562   : > { %v5329_v20 = vpack.c.bf16 %v5317_v58, %v5314_v19 }
 0x563   : > { %v8119_v34 = vpop.eup %8118  ;;  %v5330_v18 = vpack.c.bf16 %v5318_v29, %v5315_v44  ;;  %7033 = vmatpush3.bf16.msra.mxu1 %v10395_v3 }
 0x564   : > { %v8121_v37 = vpop.eup %8120  ;;  %v5292_v27 = vmul.f32 %v8119_v34, %v10502_v12 }
 0x565   : > { %v5295_v39 = vmul.f32 %v8121_v37, %v10508_v14  ;;  %5581 = vmatprep.mubr.bf16.mxu1 %v5330_v18 }
 0x566   : > { %v5316_v49 = vmul.f32 %v5292_v27, %v5121_v31  ;;  %5582 = vmatmul.mubr.bf16.gmra.mrb[132].mxu1 %v5329_v20 }
 0x567   : > { %v5319_v35 = vmul.f32 %v5295_v39, %v5125_v52  ;;  %7014 = vmatprep.mubr.bf16.mxu1 %v5328_v8 }
 0x569   : > { %v5331_v45 = vpack.c.bf16 %v5319_v35, %v5316_v49 }
 0x56e   : > { %7015 = vmatmul.mubr.bf16.vlgmr.msra.gmra.mrb[52].mxu1 %v5331_v45 }
 0x619   : > { %v6862_v55 = vpop.f32.mrb[120].mxu1 }
 0x61a   : > { %v6863_v54 = vpop.f32.mrb[121].mxu1 }
 0x61b   : > { %v6864_v61 = vadd.f32 %v6863_v54, %v6862_v55  ;;  %v6865_v13 = vpop.f32.mrb[122].mxu1 }
 0x61c   : > { %v6866_v22 = vpop.f32.mrb[123].mxu1 }
 0x61d   : > { %v6867_v3 = vadd.f32 %v6866_v22, %v6865_v13  ;;  %v7044_v53 = vadd.f32 %v10401_v28, %v6864_v61 }
 0x61f   : > { %v7056_v12 = vadd.f32 %v10404_v50, %v6867_v3 }
 0x624   : > { %v6868_v14 = vpop.f32.mrb[124].mxu1 }
 0x625   : > { %v6869_v42 = vpop.f32.mrb[125].mxu1 }
 0x626   : > { %v6870_v7 = vadd.f32 %v6869_v42, %v6868_v14  ;;  %v6871_v6 = vpop.f32.mrb[126].mxu1 }
 0x627   : > { %v6872_v21 = vpop.f32.mrb[127].mxu1 }
 0x628   : > { %v7038_v15 = vadd.f32 %v10407_v38, %v6870_v7  ;;  %v6873_v24 = vadd.f32 %v6872_v21, %v6871_v6 }
 0x62a   : > { %v7050_v30 = vadd.f32 %v10409_v51, %v6873_v24 }
 0x62c   : > { %v7012_v60 = vpop.f32.mrb[192].mxu0 }
 0x62d   : > { %v7039_v47 = vadd.f32 %v7038_v15, %v7012_v60  ;;  %v5624_v41 = vpop.f32.mrb[193].mxu0 }
 0x62e   : > { %v7045_v57 = vadd.f32 %v7044_v53, %v5624_v41  ;;  %v7013_v28 = vpop.f32.mrb[194].mxu0 }
 0x62f   : > { %5665 = vst [vmem:[%s10568_s10 + $0x10] sm:$0xff] %v7039_v47  ;;  %v7051_v50 = vadd.f32 %v7050_v30, %v7013_v28  ;;  %v5627_v0 = vpop.f32.mrb[195].mxu0  ;;  %v6874_v38 = vpop.f32.mrb[128].mxu1 }
 0x630   : > { %5663 = vst [vmem:[%s10568_s10] sm:$0xff] %v7045_v57  ;;  %v7057_v5 = vadd.f32 %v7056_v12, %v5627_v0  ;;  %v6875_v33 = vpop.f32.mrb[129].mxu1 }
 0x631   : > { %5666 = vst [vmem:[%s10568_s10 + $0x18] sm:$0xff] %v7051_v50  ;;  %v6876_v51 = vadd.f32 %v6875_v33, %v6874_v38  ;;  %v6877_v62 = vpop.f32.mrb[130].mxu1 }
 0x632   : > { %5664 = vst [vmem:[%s10568_s10 + $0x8] sm:$0xff] %v7057_v5  ;;  %v6878_v31 = vpop.f32.mrb[131].mxu1 }
 0x633   : > { %v6879_v56 = vadd.f32 %v6878_v31, %v6877_v62  ;;  %v7066_v48 = vadd.f32 %v10412_v25, %v6876_v51 }
 0x635   : > { %v7076_v4 = vadd.f32 %v10415_v36, %v6879_v56 }
 0x639   : > { %v6880_v1 = vpop.f32.mrb[132].mxu1 }
 0x63a   : > { %v6881_v43 = vpop.f32.mrb[133].mxu1 }
 0x63b   : > { %v6882_v52 = vadd.f32 %v6881_v43, %v6880_v1  ;;  %v6883_v17 = vpop.f32.mrb[134].mxu1 }
 0x63c   : > { %v6884_v26 = vpop.f32.mrb[135].mxu1 }
 0x63d   : > { %v6885_v16 = vadd.f32 %v6884_v26, %v6883_v17  ;;  %v7061_v2 = vadd.f32 %v10418_v40, %v6882_v52 }
 0x63f   : > { %v7071_v9 = vadd.f32 %v10421_v59, %v6885_v16 }
 0x641   : > { %v7016_v11 = vpop.f32.mrb[52].mxu1 }
 0x642   : > { %v7062_v25 = vadd.f32 %v7061_v2, %v7016_v11  ;;  %v5640_v36 = vpop.f32.mrb[53].mxu1 }
 0x643   : > { %v7067_v63 = vadd.f32 %v7066_v48, %v5640_v36  ;;  %v7017_v19 = vpop.f32.mrb[54].mxu1 }
 0x644   : > { %5669 = vst [vmem:[%s10568_s10 + $0x30] sm:$0xff] %v7062_v25  ;;  %v7072_v10 = vadd.f32 %v7071_v9, %v7017_v19  ;;  %v5643_v32 = vpop.f32.mrb[55].mxu1 }
 0x645   : > { %5667 = vst [vmem:[%s10568_s10 + $0x20] sm:$0xff] %v7067_v63  ;;  %v7077_v40 = vadd.f32 %v7076_v4, %v5643_v32 }
 0x646   : > { %5670 = vst [vmem:[%s10568_s10 + $0x38] sm:$0xff] %v7072_v10 }
 0x647   : > { %5668 = vst [vmem:[%s10568_s10 + $0x28] sm:$0xff] %v7077_v40 }
 0x648   : > { %8168 = shalt.err (!%p8165_p3)
}
 0x649   : > { %s8169_s6 = scalar_lea.hbm %s10584_s14, 1024  ;;  %s8173_s22 = scalar_lea.hbm %s10638_s4, 2048 }
 0x64a   : > { %p8170_p4 = scmp.ne.s32.totalorder %s10584_s14, %s8169_s6  ;;  %p8174_p9 = scmp.lt.u32.totalorder %s10584_s14, %s10638_s4 }
 0x64b   : > { %p8175_p10 = scmp.lt.u32.totalorder %s8173_s22, %s8169_s6  ;;  %p8177_p12 = scmp.lt.u32.totalorder %s8169_s6, %s10584_s14 }
 0x64c   : > { %p8171_p7 = pnand %p8170_p4, %p8290_p5 }
 0x64d   : > { %p8176_p11 = por %p8175_p10, %p8174_p9 }
 0x64e   : > { %p8172_p8 = pneg %p8171_p7 }
 0x64f   : > { %p8178_p13 = por %p8177_p12, %p8176_p11 }
 0x651   : > { %p8179_p0 = pnand %p8178_p13, %p8172_p8 }
 0x653   : > { %8182 = shalt.err (!%p8179_p0)
}
 0x654   : > { %s8225_s29 = smov 128   ;;  %s8226_s10 = smov 8  }
 0x655   : > { %7106 = dma.vmem_to_hbm [thread:$0]  (%p8290_p5), %s10586_s12, 1024, %s10584_s14, %s10593_s19, %s8225_s29, %s8225_s29, %s8226_s10  }
 0x656 PF: > { %p7112_p1 = scmp.ge.s32.totalorder %s8217_s18, 2  ;;  %s5700_s11 = sand.u32 1, %s8205_s15  }
 0x657   : > { %s5701_s13 = scalar_lea.sflag [#allocation3], %s5700_s11 }
 0x658   : > { %p7109_p2 = pnand %p7112_p1, %p8294_p6 }
 0x65a   : > { %8200 = dma.done.wait (!%p7109_p2), %s5701_s13, 1024  }
 0x65b   : > { %8202 = vsyncadd (!%p7109_p2), %s5701_s13, 4294966272  ;;  %p14_p3 = scmp.ge.s32.totalorder %s8277_s21, 4   ;;  %s10683_s15 = smov %s8209_s16 }
 0x65c   : > { %s10684_s16 = smov %s8213_s17  ;;  %s10685_s17 = smov %s8288_s24 }
 0x65d   : > { %s10686_s18 = smov %s8277_s21  ;;  %16 = sbr.rel (!%p14_p3) target bundleno = 3 (0x3), region = 82 }
 0x664   :  { %5706 = vsyncpa [#allocation3], 1 }
 0x665   :  { %5708 = vsyncpa [#allocation3 + $0x1], 1 }

</bundles_post_ra>
